<compile_context>
chip_gen: v6e
topology: v6e:2x2x1
jax: 0.10.0
libtpu: 0.0.40
codegen_flags: <defaults>
</compile_context>

<pallas_src>
import jax
import jax.numpy as jnp
from jax.experimental import pallas as pl
from jax.experimental.pallas import tpu as pltpu


# --------------------------------------------------------------------------- #
# Kernel
# --------------------------------------------------------------------------- #

def _softplus(v, dtype):
    """PyTorch softplus(x)=log(1+exp(x)), lean stable form.

    max/abs/add go to the VALU; exp/log1p go to the EUP slot.  `dtype` is the
    transcendental compute dtype: bf16 on v6e/v7x (bf16 EUP ~2x on the binding
    unit), f32 on v5e / unknown chips.
    """
    v = v.astype(dtype)
    return jnp.maximum(v, 0.0) + jnp.log1p(jnp.exp(-jnp.abs(v)))


def make_net1_kernel(n_layers, h_dim, mxu_dtype, act_dtype):
    """Kernel closed over static n_layers / h_dim / MXU & EUP dtypes."""

    def kernel(*refs):
        it = iter(refs)
        xT_ref = next(it)                          # (x_dim, tb), input dtype (f32)
        w0_ref, b0_ref = next(it), next(it)        # fused [process_x; linear1]
        w02_ref, b02_ref = next(it), next(it)      # (h, h), (h, 1)
        if n_layers > 0:
            w1s_ref, b1s_ref = next(it), next(it)  # (n, h, h), (n, h, 1)
            w2s_ref, b2s_ref = next(it), next(it)
        wout_ref, bout_ref = next(it), next(it)    # (y, h), (y, 1)
        o_ref = next(it)                           # (y_dim, tb)

        f32 = jnp.float32

        # layer0 = LinearRes(x_dim, h_dim): process_x and linear1 share the
        # same input -> one fused (2*h_dim, x_dim) matmul, then split.
        # (x_scale is already folded into w0 by the wrapper; x stays un-quantized.)
        z0 = jnp.dot(w0_ref[...], xT_ref[...],
                     preferred_element_type=f32) + b0_ref[...]
        y_old = z0[:h_dim, :]                           # process_x(x)    (h, tb) f32
        h1 = _softplus(z0[h_dim:, :], act_dtype)        # act(linear1(x)) (h, tb)
        y_new = jnp.dot(w02_ref[...], h1.astype(mxu_dtype),
                        preferred_element_type=f32) + b02_ref[...]
        h = _softplus(y_old + y_new, act_dtype)         # (h, tb)

        # layer1 = Sequential of n_layers LinearRes(h_dim, h_dim) (Identity skip)
        for l in range(n_layers):
            t = _softplus(jnp.dot(w1s_ref[l], h.astype(mxu_dtype),
                                  preferred_element_type=f32) + b1s_ref[l],
                          act_dtype)
            y_new = jnp.dot(w2s_ref[l], t.astype(mxu_dtype),
                            preferred_element_type=f32) + b2s_ref[l]
            h = _softplus(h.astype(f32) + y_new, act_dtype)   # residual add in f32

        # layer2 = Linear(h_dim, y_dim) (weight pre-scaled by gamma at init;
        # bias kept for general forward semantics even though it is zero here).
        y = jnp.dot(wout_ref[...], h.astype(mxu_dtype),
                    preferred_element_type=f32) + bout_ref[...]
        o_ref[...] = y.astype(o_ref.dtype)              # lane-dense (y_dim, tb) store

    return kernel


# --------------------------------------------------------------------------- #
# Parameter init (PyTorch nn.Linear style) and pure-JAX reference
# --------------------------------------------------------------------------- #

def init_params(key, x_dim, h_dim, n_layers, y_dim, gamma, dtype=jnp.float32):
    """PyTorch-Linear-style init (uniform +-1/sqrt(fan_in)); weights stored in
    PyTorch layout (out_dim, in_dim), biases as (out_dim, 1)."""

    def linear(k, in_dim, out_dim):
        kw, kb = jax.random.split(k)
        bound = 1.0 / float(in_dim) ** 0.5
        w = jax.random.uniform(kw, (out_dim, in_dim), dtype, -bound, bound)
        b = jax.random.uniform(kb, (out_dim, 1), dtype, -bound, bound)
        return w, b

    keys = jax.random.split(key, 4 + 2 * n_layers)
    ki = iter(keys)

    params = {}
    # layer0 (LinearRes x_dim->h_dim): process_x, linear1, linear2
    params["wpx"], params["bpx"] = linear(next(ki), x_dim, h_dim)
    params["w01"], params["b01"] = linear(next(ki), x_dim, h_dim)
    params["w02"], params["b02"] = linear(next(ki), h_dim, h_dim)
    # layer1 stack (LinearRes h_dim->h_dim, Identity skip): linear1, linear2
    params["layers"] = []
    for _ in range(n_layers):
        w1, b1 = linear(next(ki), h_dim, h_dim)
        w2, b2 = linear(next(ki), h_dim, h_dim)
        params["layers"].append((w1, b1, w2, b2))
    # layer2: weight *= gamma, bias *= 0
    wout, _ = linear(next(ki), h_dim, y_dim)
    params["wout"] = wout * gamma
    params["bout"] = jnp.zeros((y_dim, 1), dtype)
    return params


def net1_reference(x, params, x_scale, n_layers):
    """Pure-JAX reference mirroring the PyTorch forward (row layout, f32)."""
    if isinstance(x_scale, (tuple, list)):
        x = x * jnp.asarray(x_scale, x.dtype).reshape(1, -1)
    else:
        x = x * x_scale
    sp = lambda v: _softplus(v, jnp.float32)
    y_old = x @ params["wpx"].T + params["bpx"].T
    y_new = sp(x @ params["w01"].T + params["b01"].T) @ params["w02"].T + params["b02"].T
    h = sp(y_old + y_new)
    for (w1, b1, w2, b2) in params["layers"]:
        y_new = sp(h @ w1.T + b1.T) @ w2.T + b2.T
        h = sp(h + y_new)
    return h @ params["wout"].T + params["bout"].T


# --------------------------------------------------------------------------- #
# Chip / tiling / VMEM heuristics
# --------------------------------------------------------------------------- #

_MAX_BATCH_TILE = 8192      # lane-tile cap; keeps tiles + temporaries << VMEM


def _device_kind():
    try:
        return jax.devices()[0].device_kind.lower()
    except Exception:
        return ""


def _num_tensorcores():
    # v7x has 2 TensorCores per chip; a 1-step grid would idle one of them.
    return 2 if "v7" in _device_kind() else 1


def _default_dtypes():
    """(mxu_dtype, act_dtype) per chip generation."""
    kind = _device_kind()
    if ("v6" in kind) or ("v7" in kind):
        return jnp.bfloat16, jnp.bfloat16    # bf16 MXU + bf16 EUP softplus
    if "v5" in kind:
        return jnp.bfloat16, jnp.float32     # bf16 MXU fine; no bf16 VPU/EUP
    return jnp.float32, jnp.float32          # unknown chip: safe default


def _pick_batch_tile(B, n_cores):
    """Largest lane-aligned tile <= _MAX_BATCH_TILE whose step count is a
    multiple of n_cores (so the "parallel" grid axis feeds every TensorCore).
    Per-grid-step fixed cost (~0.35us) dominates tiny tiles, so fewer, bigger
    steps win; single step on 1-TC chips."""
    if B % 128 != 0:
        return B                              # single full-extent block (legal)
    steps = n_cores
    while steps <= B // 128:
        if B % steps == 0:
            tb = B // steps
            if tb % 128 == 0 and tb <= _MAX_BATCH_TILE:
                return tb
        steps += n_cores
    return 128


def _ceil_to(v, m):
    return (v + m - 1) // m * m


def _vmem_padded_bytes(shape, dtype):
    """VMEM footprint of one buffer including (sublane, lane) padding."""
    item = jnp.dtype(dtype).itemsize
    sublane = {4: 8, 2: 16, 1: 32}.get(item, 8)
    shape = (1, 1) + tuple(int(d) for d in shape)
    lead = 1
    for d in shape[:-2]:
        lead *= d
    return lead * _ceil_to(shape[-2], sublane) * _ceil_to(shape[-1], 128) * item


def _vmem_cap_bytes():
    try:
        cap = int(pltpu.get_tpu_info().vmem_capacity_bytes)
        return (cap * 3) // 4                 # headroom; v7x only has 64 MiB
    except Exception:
        return 48 << 20


# --------------------------------------------------------------------------- #
# Forward wrappers
# --------------------------------------------------------------------------- #

def net1_forward_t(xT, params, x_scale, n_layers, *, batch_tile=None,
                   mxu_dtype=None, act_dtype=None):
    """Transposed-layout forward: xT is (x_dim, B), returns (y_dim, B).

    This is the zero-copy entry point: batch lives on the lane axis end to
    end, so there are no wrapper-side x/out transposes (no extra HBM passes)
    and every softplus / store in the kernel is lane-dense.
    """
    x_dim, B = xT.shape
    h_dim = params["w02"].shape[0]
    y_dim = params["wout"].shape[0]
    out_dtype = xT.dtype

    if mxu_dtype is None or act_dtype is None:
        d_mxu, d_act = _default_dtypes()
        mxu_dtype = d_mxu if mxu_dtype is None else mxu_dtype
        act_dtype = d_act if act_dtype is None else act_dtype

    tb = _pick_batch_tile(B, _num_tensorcores()) if batch_tile is None else batch_tile
    assert tb == B or (B % tb == 0 and tb % 128 == 0), (
        "batch_tile must equal B, or be a multiple of 128 that divides B "
        "(lane-axis tiling constraint)")
    grid = (B // tb,)

    # Fold the preprocess scale into layer-0 weights: (x*s) @ W.T == x @ (W*s).T
    if isinstance(x_scale, (tuple, list)):
        assert len(x_scale) == x_dim, "len(scale) != x_dim"
        scale = jnp.asarray(x_scale, jnp.float32).reshape(1, x_dim)
    else:
        scale = jnp.full((1, x_dim), float(x_scale), jnp.float32)
    w0 = jnp.concatenate([params["wpx"], params["w01"]], axis=0) * scale   # (2h, x_dim)
    b0 = jnp.concatenate([params["bpx"], params["b01"]], axis=0)           # (2h, 1)

    def wcast(w):      # MXU operand dtype (bf16 on v5e/v6e/v7x by default)
        return w.astype(mxu_dtype)

    def bcast(b):      # biases stay f32
        return b.astype(jnp.float32)

    flat_inputs = [xT, wcast(w0), bcast(b0),
                   wcast(params["w02"]), bcast(params["b02"])]
    if n_layers > 0:
        # Stack per-layer params into 4 resident arrays (constant ref count).
        w1s = jnp.stack([w1 for (w1, b1, w2, b2) in params["layers"]])
        b1s = jnp.stack([b1 for (w1, b1, w2, b2) in params["layers"]])
        w2s = jnp.stack([w2 for (w1, b1, w2, b2) in params["layers"]])
        b2s = jnp.stack([b2 for (w1, b1, w2, b2) in params["layers"]])
        flat_inputs += [wcast(w1s), bcast(b1s), wcast(w2s), bcast(b2s)]
    flat_inputs += [wcast(params["wout"]), bcast(params["bout"])]

    def resident_spec(a):
        nd = a.ndim

        def imap(i, _nd=nd):
            return (0,) * _nd

        return pl.BlockSpec(a.shape, imap)

    in_specs = [pl.BlockSpec((x_dim, tb), lambda i: (0, i))]   # xT tiled on lanes
    in_specs += [resident_spec(a) for a in flat_inputs[1:]]
    out_spec = pl.BlockSpec((y_dim, tb), lambda i: (0, i))     # lane-dense output

    # Advisory cost estimate for the XLA scheduler.
    flops = 2 * B * (x_dim * 2 * h_dim + h_dim * h_dim * (1 + 2 * n_layers)
                     + h_dim * y_dim)
    transcendentals = 2 * B * h_dim * (2 * n_layers + 2)       # exp + log1p / softplus
    bytes_accessed = (sum(int(a.size) * a.dtype.itemsize for a in flat_inputs)
                      + B * y_dim * jnp.dtype(out_dtype).itemsize)

    # VMEM ask: padded, double-buffered tiles + resident weights + temporaries.
    resident_bytes = sum(_vmem_padded_bytes(a.shape, a.dtype) for a in flat_inputs[1:])
    tile_bytes = (_vmem_padded_bytes((x_dim, tb), xT.dtype)
                  + _vmem_padded_bytes((y_dim, tb), out_dtype))
    interm_bytes = 16 * h_dim * tb * 4                         # generous live-temp bound
    need = 2 * resident_bytes + 2 * tile_bytes + interm_bytes
    vmem_limit = int(min(_vmem_cap_bytes(), max(32 << 20, need + (8 << 20))))

    kernel = make_net1_kernel(n_layers, h_dim, mxu_dtype, act_dtype)

    return pl.pallas_call(
        kernel,
        out_shape=jax.ShapeDtypeStruct((y_dim, B), out_dtype),
        grid_spec=pltpu.PrefetchScalarGridSpec(
            num_scalar_prefetch=0,
            grid=grid,
            in_specs=in_specs,
            out_specs=out_spec,
        ),
        compiler_params=pltpu.CompilerParams(
            dimension_semantics=("parallel",),
            vmem_limit_bytes=vmem_limit),
        cost_estimate=pl.CostEstimate(flops=int(flops),
                                      transcendentals=int(transcendentals),
                                      bytes_accessed=int(bytes_accessed)),
    )(*flat_inputs)


def net1_forward(x, params, x_scale, n_layers, **kwargs):
    """Module-layout forward: x is (B, x_dim), returns (B, y_dim).

    Adds one XLA transpose on x and one on the (tiny, y_dim-row) output to
    match the PyTorch module's layout; performance-sensitive callers should
    use `net1_forward_t` and keep the batch-on-lanes layout end to end.
    """
    return net1_forward_t(x.T, params, x_scale, n_layers, **kwargs).T


# --------------------------------------------------------------------------- #
# Demo / self-test
# --------------------------------------------------------------------------- #

if __name__ == "__main__":
    # Net1(x_dim, h_dim, n_layers, x_scale, alpha, gamma, y_dim); alpha is
    # unused in forward().
    B, x_dim, h_dim, n_layers, y_dim = 512, 4, 32, 2, 3
    x_scale = 0.5
    gamma = 0.1

    key = jax.random.PRNGKey(0)
    k_in, k_par = jax.random.split(key)
    x = jax.random.normal(k_in, (B, x_dim), jnp.float32)
    params = init_params(k_par, x_dim, h_dim, n_layers, y_dim, gamma)

    y_ref = net1_reference(x, params, x_scale, n_layers)

    # 1) exact f32 path (module layout): tight check vs the pure-JAX reference.
    y = jax.block_until_ready(
        net1_forward(x, params, x_scale, n_layers,
                     mxu_dtype=jnp.float32, act_dtype=jnp.float32))
    assert y.shape == (B, y_dim)
    assert jnp.allclose(y, y_ref, atol=1e-4, rtol=1e-4), "f32 mismatch vs reference"

    # 2) chip-default fast path on the zero-copy transposed layout:
    #    bf16 MXU + bf16 softplus on v6e/v7x, bf16 MXU + f32 softplus on v5e.
    yT = jax.block_until_ready(net1_forward_t(x.T, params, x_scale, n_layers))
    assert yT.shape == (y_dim, B)
    assert jnp.allclose(yT.T, y_ref, atol=1e-1, rtol=1e-1), \
        "fast-path (transposed) mismatch vs reference"

    # 3) chip-default fast path through the module-layout wrapper.
    y_fast = jax.block_until_ready(net1_forward(x, params, x_scale, n_layers))
    assert y_fast.shape == (B, y_dim)
    assert jnp.allclose(y_fast, y_ref, atol=1e-1, rtol=1e-1), \
        "fast-path mismatch vs reference"

    print("KERNEL_OK")
</pallas_src>

<mosaic_0001>
module attributes {stable_mosaic.version = 11 : i64} {
  func.func @kernel(%arg0: i32, %arg1: memref<4x512xf32, #tpu.memory_space<vmem>>, %arg2: memref<64x4xf32, #tpu.memory_space<vmem>>, %arg3: memref<64x1xf32, #tpu.memory_space<vmem>>, %arg4: memref<32x32xf32, #tpu.memory_space<vmem>>, %arg5: memref<32x1xf32, #tpu.memory_space<vmem>>, %arg6: memref<2x32x32xf32, #tpu.memory_space<vmem>>, %arg7: memref<2x32x1xf32, #tpu.memory_space<vmem>>, %arg8: memref<2x32x32xf32, #tpu.memory_space<vmem>>, %arg9: memref<2x32x1xf32, #tpu.memory_space<vmem>>, %arg10: memref<3x32xf32, #tpu.memory_space<vmem>>, %arg11: memref<3x1xf32, #tpu.memory_space<vmem>>, %arg12: memref<3x512xf32, #tpu.memory_space<vmem>>) attributes {dimension_semantics = [#tpu.dimension_semantics<parallel>], iteration_bounds = array<i64: 1>, scalar_prefetch = 0 : i64, scratch_operands = 0 : i64, tpu.core_type = #tpu.core_type<tc>, window_params = [{transform_indices = @transform_0, window_bounds = array<i64: 4, 512>}, {pipeline_mode = #tpu.pipeline_mode<synchronous>, transform_indices = @transform_1, window_bounds = array<i64: 64, 4>}, {pipeline_mode = #tpu.pipeline_mode<synchronous>, transform_indices = @transform_2, window_bounds = array<i64: 64, 1>}, {pipeline_mode = #tpu.pipeline_mode<synchronous>, transform_indices = @transform_3, window_bounds = array<i64: 32, 32>}, {pipeline_mode = #tpu.pipeline_mode<synchronous>, transform_indices = @transform_4, window_bounds = array<i64: 32, 1>}, {pipeline_mode = #tpu.pipeline_mode<synchronous>, transform_indices = @transform_5, window_bounds = array<i64: 2, 32, 32>}, {pipeline_mode = #tpu.pipeline_mode<synchronous>, transform_indices = @transform_6, window_bounds = array<i64: 2, 32, 1>}, {pipeline_mode = #tpu.pipeline_mode<synchronous>, transform_indices = @transform_7, window_bounds = array<i64: 2, 32, 32>}, {pipeline_mode = #tpu.pipeline_mode<synchronous>, transform_indices = @transform_8, window_bounds = array<i64: 2, 32, 1>}, {pipeline_mode = #tpu.pipeline_mode<synchronous>, transform_indices = @transform_9, window_bounds = array<i64: 3, 32>}, {pipeline_mode = #tpu.pipeline_mode<synchronous>, transform_indices = @transform_10, window_bounds = array<i64: 3, 1>}, {transform_indices = @transform_11, window_bounds = array<i64: 3, 512>}]} {
    %c0 = arith.constant 0 : index
    %c0_0 = arith.constant 0 : index
    %0 = vector.load %arg2[%c0, %c0_0] : memref<64x4xf32, #tpu.memory_space<vmem>>, vector<64x4xf32>
    %c0_1 = arith.constant 0 : index
    %c0_2 = arith.constant 0 : index
    %1 = vector.load %arg1[%c0_1, %c0_2] : memref<4x512xf32, #tpu.memory_space<vmem>>, vector<4x512xf32>
    %cst = arith.constant dense<0.000000e+00> : vector<64x512xf32>
    %2 = tpu.matmul %0, %1, %cst {dimension_numbers = #tpu.dot_dimension_numbers<[1], [0], [0], [1], [0, 0, 1, 1], [], []>} : vector<64x4xf32>, vector<4x512xf32>, vector<64x512xf32> -> vector<64x512xf32>
    %c0_3 = arith.constant 0 : index
    %c0_4 = arith.constant 0 : index
    %3 = vector.load %arg3[%c0_3, %c0_4] : memref<64x1xf32, #tpu.memory_space<vmem>>, vector<64x1xf32>
    %4 = vector.broadcast %3 : vector<64x1xf32> to vector<64x512xf32>
    %5 = arith.addf %2, %4 : vector<64x512xf32>
    %6 = vector.extract_strided_slice %5 {offsets = [0, 0], sizes = [32, 512], strides = [1, 1]} : vector<64x512xf32> to vector<32x512xf32>
    %7 = vector.extract_strided_slice %5 {offsets = [32, 0], sizes = [32, 512], strides = [1, 1]} : vector<64x512xf32> to vector<32x512xf32>
    %cst_5 = arith.constant 0.000000e+00 : f32
    %8 = vector.broadcast %cst_5 : f32 to vector<32x512xf32>
    %9 = arith.maximumf %7, %8 : vector<32x512xf32>
    %10 = math.absf %7 : vector<32x512xf32>
    %cst_6 = arith.constant 0.000000e+00 : f32
    %11 = vector.broadcast %cst_6 : f32 to vector<32x512xf32>
    %12 = arith.subf %11, %10 : vector<32x512xf32>
    %13 = math.exp %12 : vector<32x512xf32>
    %14 = math.log1p %13 : vector<32x512xf32>
    %15 = arith.addf %9, %14 : vector<32x512xf32>
    %c0_7 = arith.constant 0 : index
    %c0_8 = arith.constant 0 : index
    %16 = vector.load %arg4[%c0_7, %c0_8] : memref<32x32xf32, #tpu.memory_space<vmem>>, vector<32x32xf32>
    %cst_9 = arith.constant dense<0.000000e+00> : vector<32x512xf32>
    %17 = tpu.matmul %16, %15, %cst_9 {dimension_numbers = #tpu.dot_dimension_numbers<[1], [0], [0], [1], [0, 0, 1, 1], [], []>} : vector<32x32xf32>, vector<32x512xf32>, vector<32x512xf32> -> vector<32x512xf32>
    %c0_10 = arith.constant 0 : index
    %c0_11 = arith.constant 0 : index
    %18 = vector.load %arg5[%c0_10, %c0_11] : memref<32x1xf32, #tpu.memory_space<vmem>>, vector<32x1xf32>
    %19 = vector.broadcast %18 : vector<32x1xf32> to vector<32x512xf32>
    %20 = arith.addf %17, %19 : vector<32x512xf32>
    %21 = arith.addf %6, %20 : vector<32x512xf32>
    %cst_12 = arith.constant 0.000000e+00 : f32
    %22 = vector.broadcast %cst_12 : f32 to vector<32x512xf32>
    %23 = arith.maximumf %21, %22 : vector<32x512xf32>
    %24 = math.absf %21 : vector<32x512xf32>
    %cst_13 = arith.constant 0.000000e+00 : f32
    %25 = vector.broadcast %cst_13 : f32 to vector<32x512xf32>
    %26 = arith.subf %25, %24 : vector<32x512xf32>
    %27 = math.exp %26 : vector<32x512xf32>
    %28 = math.log1p %27 : vector<32x512xf32>
    %29 = arith.addf %23, %28 : vector<32x512xf32>
    %c0_14 = arith.constant 0 : index
    %c0_15 = arith.constant 0 : index
    %c0_16 = arith.constant 0 : index
    %30 = vector.load %arg6[%c0_14, %c0_15, %c0_16] : memref<2x32x32xf32, #tpu.memory_space<vmem>>, vector<1x32x32xf32>
    %31 = vector.shape_cast %30 : vector<1x32x32xf32> to vector<32x32xf32>
    %cst_17 = arith.constant dense<0.000000e+00> : vector<32x512xf32>
    %32 = tpu.matmul %31, %29, %cst_17 {dimension_numbers = #tpu.dot_dimension_numbers<[1], [0], [0], [1], [0, 0, 1, 1], [], []>} : vector<32x32xf32>, vector<32x512xf32>, vector<32x512xf32> -> vector<32x512xf32>
    %c0_18 = arith.constant 0 : index
    %c0_19 = arith.constant 0 : index
    %c0_20 = arith.constant 0 : index
    %33 = vector.load %arg7[%c0_18, %c0_19, %c0_20] : memref<2x32x1xf32, #tpu.memory_space<vmem>>, vector<1x32x1xf32>
    %34 = vector.shape_cast %33 : vector<1x32x1xf32> to vector<32x1xf32>
    %35 = vector.broadcast %34 : vector<32x1xf32> to vector<32x512xf32>
    %36 = arith.addf %32, %35 : vector<32x512xf32>
    %cst_21 = arith.constant 0.000000e+00 : f32
    %37 = vector.broadcast %cst_21 : f32 to vector<32x512xf32>
    %38 = arith.maximumf %36, %37 : vector<32x512xf32>
    %39 = math.absf %36 : vector<32x512xf32>
    %cst_22 = arith.constant 0.000000e+00 : f32
    %40 = vector.broadcast %cst_22 : f32 to vector<32x512xf32>
    %41 = arith.subf %40, %39 : vector<32x512xf32>
    %42 = math.exp %41 : vector<32x512xf32>
    %43 = math.log1p %42 : vector<32x512xf32>
    %44 = arith.addf %38, %43 : vector<32x512xf32>
    %c0_23 = arith.constant 0 : index
    %c0_24 = arith.constant 0 : index
    %c0_25 = arith.constant 0 : index
    %45 = vector.load %arg8[%c0_23, %c0_24, %c0_25] : memref<2x32x32xf32, #tpu.memory_space<vmem>>, vector<1x32x32xf32>
    %46 = vector.shape_cast %45 : vector<1x32x32xf32> to vector<32x32xf32>
    %cst_26 = arith.constant dense<0.000000e+00> : vector<32x512xf32>
    %47 = tpu.matmul %46, %44, %cst_26 {dimension_numbers = #tpu.dot_dimension_numbers<[1], [0], [0], [1], [0, 0, 1, 1], [], []>} : vector<32x32xf32>, vector<32x512xf32>, vector<32x512xf32> -> vector<32x512xf32>
    %c0_27 = arith.constant 0 : index
    %c0_28 = arith.constant 0 : index
    %c0_29 = arith.constant 0 : index
    %48 = vector.load %arg9[%c0_27, %c0_28, %c0_29] : memref<2x32x1xf32, #tpu.memory_space<vmem>>, vector<1x32x1xf32>
    %49 = vector.shape_cast %48 : vector<1x32x1xf32> to vector<32x1xf32>
    %50 = vector.broadcast %49 : vector<32x1xf32> to vector<32x512xf32>
    %51 = arith.addf %47, %50 : vector<32x512xf32>
    %52 = arith.addf %29, %51 : vector<32x512xf32>
    %cst_30 = arith.constant 0.000000e+00 : f32
    %53 = vector.broadcast %cst_30 : f32 to vector<32x512xf32>
    %54 = arith.maximumf %52, %53 : vector<32x512xf32>
    %55 = math.absf %52 : vector<32x512xf32>
    %cst_31 = arith.constant 0.000000e+00 : f32
    %56 = vector.broadcast %cst_31 : f32 to vector<32x512xf32>
    %57 = arith.subf %56, %55 : vector<32x512xf32>
    %58 = math.exp %57 : vector<32x512xf32>
    %59 = math.log1p %58 : vector<32x512xf32>
    %60 = arith.addf %54, %59 : vector<32x512xf32>
    %c1 = arith.constant 1 : index
    %c0_32 = arith.constant 0 : index
    %c0_33 = arith.constant 0 : index
    %61 = vector.load %arg6[%c1, %c0_32, %c0_33] : memref<2x32x32xf32, #tpu.memory_space<vmem>>, vector<1x32x32xf32>
    %62 = vector.shape_cast %61 : vector<1x32x32xf32> to vector<32x32xf32>
    %cst_34 = arith.constant dense<0.000000e+00> : vector<32x512xf32>
    %63 = tpu.matmul %62, %60, %cst_34 {dimension_numbers = #tpu.dot_dimension_numbers<[1], [0], [0], [1], [0, 0, 1, 1], [], []>} : vector<32x32xf32>, vector<32x512xf32>, vector<32x512xf32> -> vector<32x512xf32>
    %c1_35 = arith.constant 1 : index
    %c0_36 = arith.constant 0 : index
    %c0_37 = arith.constant 0 : index
    %64 = vector.load %arg7[%c1_35, %c0_36, %c0_37] : memref<2x32x1xf32, #tpu.memory_space<vmem>>, vector<1x32x1xf32>
    %65 = vector.shape_cast %64 : vector<1x32x1xf32> to vector<32x1xf32>
    %66 = vector.broadcast %65 : vector<32x1xf32> to vector<32x512xf32>
    %67 = arith.addf %63, %66 : vector<32x512xf32>
    %cst_38 = arith.constant 0.000000e+00 : f32
    %68 = vector.broadcast %cst_38 : f32 to vector<32x512xf32>
    %69 = arith.maximumf %67, %68 : vector<32x512xf32>
    %70 = math.absf %67 : vector<32x512xf32>
    %cst_39 = arith.constant 0.000000e+00 : f32
    %71 = vector.broadcast %cst_39 : f32 to vector<32x512xf32>
    %72 = arith.subf %71, %70 : vector<32x512xf32>
    %73 = math.exp %72 : vector<32x512xf32>
    %74 = math.log1p %73 : vector<32x512xf32>
    %75 = arith.addf %69, %74 : vector<32x512xf32>
    %c1_40 = arith.constant 1 : index
    %c0_41 = arith.constant 0 : index
    %c0_42 = arith.constant 0 : index
    %76 = vector.load %arg8[%c1_40, %c0_41, %c0_42] : memref<2x32x32xf32, #tpu.memory_space<vmem>>, vector<1x32x32xf32>
    %77 = vector.shape_cast %76 : vector<1x32x32xf32> to vector<32x32xf32>
    %cst_43 = arith.constant dense<0.000000e+00> : vector<32x512xf32>
    %78 = tpu.matmul %77, %75, %cst_43 {dimension_numbers = #tpu.dot_dimension_numbers<[1], [0], [0], [1], [0, 0, 1, 1], [], []>} : vector<32x32xf32>, vector<32x512xf32>, vector<32x512xf32> -> vector<32x512xf32>
    %c1_44 = arith.constant 1 : index
    %c0_45 = arith.constant 0 : index
    %c0_46 = arith.constant 0 : index
    %79 = vector.load %arg9[%c1_44, %c0_45, %c0_46] : memref<2x32x1xf32, #tpu.memory_space<vmem>>, vector<1x32x1xf32>
    %80 = vector.shape_cast %79 : vector<1x32x1xf32> to vector<32x1xf32>
    %81 = vector.broadcast %80 : vector<32x1xf32> to vector<32x512xf32>
    %82 = arith.addf %78, %81 : vector<32x512xf32>
    %83 = arith.addf %60, %82 : vector<32x512xf32>
    %cst_47 = arith.constant 0.000000e+00 : f32
    %84 = vector.broadcast %cst_47 : f32 to vector<32x512xf32>
    %85 = arith.maximumf %83, %84 : vector<32x512xf32>
    %86 = math.absf %83 : vector<32x512xf32>
    %cst_48 = arith.constant 0.000000e+00 : f32
    %87 = vector.broadcast %cst_48 : f32 to vector<32x512xf32>
    %88 = arith.subf %87, %86 : vector<32x512xf32>
    %89 = math.exp %88 : vector<32x512xf32>
    %90 = math.log1p %89 : vector<32x512xf32>
    %91 = arith.addf %85, %90 : vector<32x512xf32>
    %c0_49 = arith.constant 0 : index
    %c0_50 = arith.constant 0 : index
    %92 = vector.load %arg10[%c0_49, %c0_50] : memref<3x32xf32, #tpu.memory_space<vmem>>, vector<3x32xf32>
    %cst_51 = arith.constant dense<0.000000e+00> : vector<3x512xf32>
    %93 = tpu.matmul %92, %91, %cst_51 {dimension_numbers = #tpu.dot_dimension_numbers<[1], [0], [0], [1], [0, 0, 1, 1], [], []>} : vector<3x32xf32>, vector<32x512xf32>, vector<3x512xf32> -> vector<3x512xf32>
    %c0_52 = arith.constant 0 : index
    %c0_53 = arith.constant 0 : index
    %94 = vector.load %arg11[%c0_52, %c0_53] : memref<3x1xf32, #tpu.memory_space<vmem>>, vector<3x1xf32>
    %95 = vector.broadcast %94 : vector<3x1xf32> to vector<3x512xf32>
    %96 = arith.addf %93, %95 : vector<3x512xf32>
    %c0_54 = arith.constant 0 : index
    %c0_55 = arith.constant 0 : index
    %97 = vector.load %arg12[%c0_54, %c0_55] : memref<3x512xf32, #tpu.memory_space<vmem>>, vector<3x512xf32>
    tpu.vector_store %arg12[%c0_54, %c0_55], %96 {strides = array<i32>} : memref<3x512xf32, #tpu.memory_space<vmem>>, vector<3x512xf32>,
    return
  }
  func.func @transform_0(%arg0: i32) -> (i32, i32) {
    %c0_i32 = arith.constant 0 : i32
    %c0_i32_0 = arith.constant 0 : i32
    return %c0_i32, %arg0 : i32, i32
  }
  func.func @transform_1(%arg0: i32) -> (i32, i32) {
    %c0_i32 = arith.constant 0 : i32
    %c0_i32_0 = arith.constant 0 : i32
    %c0_i32_1 = arith.constant 0 : i32
    return %c0_i32, %c0_i32_0 : i32, i32
  }
  func.func @transform_2(%arg0: i32) -> (i32, i32) {
    %c0_i32 = arith.constant 0 : i32
    %c0_i32_0 = arith.constant 0 : i32
    %c0_i32_1 = arith.constant 0 : i32
    return %c0_i32, %c0_i32_0 : i32, i32
  }
  func.func @transform_3(%arg0: i32) -> (i32, i32) {
    %c0_i32 = arith.constant 0 : i32
    %c0_i32_0 = arith.constant 0 : i32
    %c0_i32_1 = arith.constant 0 : i32
    return %c0_i32, %c0_i32_0 : i32, i32
  }
  func.func @transform_4(%arg0: i32) -> (i32, i32) {
    %c0_i32 = arith.constant 0 : i32
    %c0_i32_0 = arith.constant 0 : i32
    %c0_i32_1 = arith.constant 0 : i32
    return %c0_i32, %c0_i32_0 : i32, i32
  }
  func.func @transform_5(%arg0: i32) -> (i32, i32, i32) {
    %c0_i32 = arith.constant 0 : i32
    %c0_i32_0 = arith.constant 0 : i32
    %c0_i32_1 = arith.constant 0 : i32
    %c0_i32_2 = arith.constant 0 : i32
    return %c0_i32, %c0_i32_0, %c0_i32_1 : i32, i32, i32
  }
  func.func @transform_6(%arg0: i32) -> (i32, i32, i32) {
    %c0_i32 = arith.constant 0 : i32
    %c0_i32_0 = arith.constant 0 : i32
    %c0_i32_1 = arith.constant 0 : i32
    %c0_i32_2 = arith.constant 0 : i32
    return %c0_i32, %c0_i32_0, %c0_i32_1 : i32, i32, i32
  }
  func.func @transform_7(%arg0: i32) -> (i32, i32, i32) {
    %c0_i32 = arith.constant 0 : i32
    %c0_i32_0 = arith.constant 0 : i32
    %c0_i32_1 = arith.constant 0 : i32
    %c0_i32_2 = arith.constant 0 : i32
    return %c0_i32, %c0_i32_0, %c0_i32_1 : i32, i32, i32
  }
  func.func @transform_8(%arg0: i32) -> (i32, i32, i32) {
    %c0_i32 = arith.constant 0 : i32
    %c0_i32_0 = arith.constant 0 : i32
    %c0_i32_1 = arith.constant 0 : i32
    %c0_i32_2 = arith.constant 0 : i32
    return %c0_i32, %c0_i32_0, %c0_i32_1 : i32, i32, i32
  }
  func.func @transform_9(%arg0: i32) -> (i32, i32) {
    %c0_i32 = arith.constant 0 : i32
    %c0_i32_0 = arith.constant 0 : i32
    %c0_i32_1 = arith.constant 0 : i32
    return %c0_i32, %c0_i32_0 : i32, i32
  }
  func.func @transform_10(%arg0: i32) -> (i32, i32) {
    %c0_i32 = arith.constant 0 : i32
    %c0_i32_0 = arith.constant 0 : i32
    %c0_i32_1 = arith.constant 0 : i32
    return %c0_i32, %c0_i32_0 : i32, i32
  }
  func.func @transform_11(%arg0: i32) -> (i32, i32) {
    %c0_i32 = arith.constant 0 : i32
    %c0_i32_0 = arith.constant 0 : i32
    return %c0_i32, %arg0 : i32, i32
  }
}

</mosaic_0001>

<bundles_post_ra>
// kernel: tpu_custom_call.1
= control target key start
LH: loop header
LB: loop body
LE: loop exit
PB: predicated region body
PF: predicated region fallthrough
CT: control target
= control target key end

     0   :  { %vm126_vm0 = vcmask 1043456   ;;  %v6147_v4 = vmov 0.0   ;;  %vm101_vm1 = vcmask 31744   ;;  %v3612_v6 = vmov 0   ;;  %s6135_s0 = inlined_call_operand.vmem [shape: f32[4,512], index: 0, kind: input, shape index: {}]   ;;  %s6136_s1 = inlined_call_operand.vmem [shape: f32[64,4], index: 1, kind: input, shape index: {}]   ;;  %s6137_s2 = inlined_call_operand.vmem [shape: f32[64,1], index: 2, kind: input, shape index: {}]   ;;  %s6138_s3 = inlined_call_operand.vmem [shape: f32[32,32], index: 3, kind: input, shape index: {}]   ;;  %s6139_s4 = inlined_call_operand.vmem [shape: f32[32,1], index: 4, kind: input, shape index: {}]   ;;  %s6140_s5 = inlined_call_operand.vmem [shape: f32[2,32,32], index: 5, kind: input, shape index: {}]   ;;  %s6141_s6 = inlined_call_operand.vmem [shape: f32[2,32,1], index: 6, kind: input, shape index: {}]   ;;  %s6142_s7 = inlined_call_operand.vmem [shape: f32[2,32,32], index: 7, kind: input, shape index: {}]   ;;  %s6143_s8 = inlined_call_operand.vmem [shape: f32[2,32,1], index: 8, kind: input, shape index: {}]   ;;  %s6144_s9 = inlined_call_operand.vmem [shape: f32[3,32], index: 9, kind: input, shape index: {}]   ;;  %s6145_s10 = inlined_call_operand.vmem [shape: f32[3,1], index: 10, kind: input, shape index: {}]   ;;  %s6146_s11 = inlined_call_operand.hbm [shape: f32[3,512], index: 11, kind: output, shape index: {}]  }
   0x1   :  { %v47_v0 = vld [vmem:[%s6135_s0] sm:$0xff]  ;;  %v48_v1 = vld [vmem:[%s6135_s0 + $0x8] sm:$0xff]  ;;  %199 = vmatprep.mubr.f32.mxu0 %v6147_v4  ;;  %312 = vmatprep.mubr.f32.mxu1 %v6147_v4  ;;  %v56_v7 = vld [vmem:[%s6137_s2 + $0x38] sm:$0xff] }
   0x2   :  { %v99_v2 = vcombine.high %v47_v0, %v47_v0  ;;  %v100_v3 = vcombine.high %v48_v1, %v48_v1  ;;  %v39_v5 = vld [vmem:[%s6136_s1] sm:$0xff]  ;;  %3201 = vset.pattern.permute.xlu0 %v3612_v6  ;;  %3202 = vset.pattern.permute.xlu1 %v3612_v6  ;;  %v54_v8 = vld [vmem:[%s6137_s2 + $0x28] sm:$0xff]  ;;  %v55_v10 = vld [vmem:[%s6137_s2 + $0x30] sm:$0xff] }
   0x3   :  { %v40_v9 = vld [vmem:[%s6136_s1 + $0x8] sm:$0xff]  ;;  %94 = vperm.xlu0 %3201, %v56_v7   ;;  %84 = vperm.xlu1 %3202, %v54_v8   ;;  %v53_v11 = vld [vmem:[%s6137_s2 + $0x20] sm:$0xff]  ;;  %v41_v12 = vld [vmem:[%s6136_s1 + $0x10] sm:$0xff] }
   0x4   :  { %3120 = vmatprep.subr.msk.mxu0 %vm126_vm0, %v99_v2  ;;  %3130 = vmatprep.subr.msk.mxu1 %vm126_vm0, %v100_v3  ;;  %v52_v13 = vld [vmem:[%s6137_s2 + $0x18] sm:$0xff] }
   0x5   :  { %3121 = vmatpush1.msk.msra.mxu0 %vm126_vm0, %v47_v0  ;;  %3131 = vmatpush1.msk.msra.mxu1 %vm126_vm0, %v48_v1  ;;  %v608_v14 = vld [vmem:[%s6139_s4 + $0x18] sm:$0xff] }
   0x6   :  { %3122 = vmatmul.mubr.msk.f32.vlgmr.msra.gmra.mxu0 %vm101_vm1, %v39_v5  ;;  %3132 = vmatmul.mubr.msk.f32.vlgmr.msra.gmra.mxu1 %vm101_vm1, %v39_v5 }
   0x7   :  { %205 = vmatprep.mubr.f32.mxu0 %v6147_v4  ;;  %318 = vmatprep.mubr.f32.mxu1 %v6147_v4 }
   0x8   :  { %89 = vperm.xlu0 %3201, %v55_v10   ;;  %79 = vperm.xlu1 %3202, %v53_v11  }
   0xa   :  { %3123 = vmatmul.mubr.msk.f32.gmra.mxu0 %vm101_vm1, %v40_v9  ;;  %3133 = vmatmul.mubr.msk.f32.gmra.mxu1 %vm101_vm1, %v40_v9 }
   0xb   :  { %211 = vmatprep.mubr.f32.mxu0 %v6147_v4  ;;  %324 = vmatprep.mubr.f32.mxu1 %v6147_v4 }
   0xe   :  { %3124 = vmatmul.mubr.msk.f32.gmra.mxu0 %vm101_vm1, %v41_v12  ;;  %3134 = vmatmul.mubr.msk.f32.gmra.mxu1 %vm101_vm1, %v41_v12 }
   0xf   :  { %16 = vsyncpa [#allocation3], 0  ;;  %217 = vmatprep.mubr.f32.mxu0 %v6147_v4  ;;  %330 = vmatprep.mubr.f32.mxu1 %v6147_v4  ;;  %v42_v15 = vld [vmem:[%s6136_s1 + $0x18] sm:$0xff]  ;;  %v51_v16 = vld [vmem:[%s6137_s2 + $0x10] sm:$0xff]  ;;  %vm629_vm13 = vcmask 261120  }
  0x10   :  { %74 = vperm.xlu0 %3201, %v52_v13   ;;  %626 = vperm.xlu1 %3202, %v608_v14   ;;  %v607_v17 = vld [vmem:[%s6139_s4 + $0x10] sm:$0xff]  ;;  %v43_v18 = vld [vmem:[%s6136_s1 + $0x20] sm:$0xff]  ;;  %v50_v19 = vld [vmem:[%s6137_s2 + $0x8] sm:$0xff] }
  0x11   :  { %v606_v20 = vld [vmem:[%s6139_s4 + $0x8] sm:$0xff]  ;;  %v49_v22 = vld [vmem:[%s6137_s2] sm:$0xff]  ;;  %v45_v24 = vld [vmem:[%s6136_s1 + $0x30] sm:$0xff] }
  0x12   :  { %3125 = vmatmul.mubr.msk.f32.gmra.mxu0 %vm101_vm1, %v42_v15  ;;  %3135 = vmatmul.mubr.msk.f32.gmra.mxu1 %vm101_vm1, %v42_v15  ;;  %v44_v21 = vld [vmem:[%s6136_s1 + $0x28] sm:$0xff]  ;;  %v605_v23 = vld [vmem:[%s6139_s4] sm:$0xff]  ;;  %v1083_v25 = vld [vmem:[%s6141_s6 + $0x18] sm:$0xff] }
  0x13   :  { %223 = vmatprep.mubr.f32.mxu0 %v6147_v4  ;;  %336 = vmatprep.mubr.f32.mxu1 %v6147_v4  ;;  %v1082_v26 = vld [vmem:[%s6141_s6 + $0x10] sm:$0xff]  ;;  %v46_v27 = vld [vmem:[%s6136_s1 + $0x38] sm:$0xff]  ;;  %v1081_v28 = vld [vmem:[%s6141_s6 + $0x8] sm:$0xff] }
  0x14   :  { %69 = vperm.xlu0 %3201, %v51_v16   ;;  %621 = vperm.xlu1 %3202, %v607_v17   ;;  %v1080_v29 = vld [vmem:[%s6141_s6] sm:$0xff]  ;;  %v1541_v30 = vld [vmem:[%s6143_s8 + $0x18] sm:$0xff]  ;;  %v1540_v31 = vld [vmem:[%s6143_s8 + $0x10] sm:$0xff] }
  0x15   :  { %v1539_v32 = vld [vmem:[%s6143_s8 + $0x8] sm:$0xff]  ;;  %v1538_v33 = vld [vmem:[%s6143_s8] sm:$0xff]  ;;  %v3171_v34 = vld [vmem:[%s6141_s6 + $0x38] sm:$0xff] }
  0x16   :  { %3126 = vmatmul.mubr.msk.f32.gmra.mxu0 %vm101_vm1, %v43_v18  ;;  %3136 = vmatmul.mubr.msk.f32.gmra.mxu1 %vm101_vm1, %v43_v18  ;;  %v3170_v35 = vld [vmem:[%s6141_s6 + $0x30] sm:$0xff]  ;;  %v3169_v36 = vld [vmem:[%s6141_s6 + $0x28] sm:$0xff]  ;;  %v3168_v37 = vld [vmem:[%s6141_s6 + $0x20] sm:$0xff] }
  0x17   :  { %229 = vmatprep.mubr.f32.mxu0 %v6147_v4  ;;  %342 = vmatprep.mubr.f32.mxu1 %v6147_v4  ;;  %v3187_v38 = vld [vmem:[%s6143_s8 + $0x38] sm:$0xff]  ;;  %v3186_v39 = vld [vmem:[%s6143_s8 + $0x30] sm:$0xff]  ;;  %v3185_v40 = vld [vmem:[%s6143_s8 + $0x28] sm:$0xff] }
  0x18   :  { %64 = vperm.xlu0 %3201, %v50_v19   ;;  %616 = vperm.xlu1 %3202, %v606_v20   ;;  %v3184_v41 = vld [vmem:[%s6143_s8 + $0x20] sm:$0xff] }
  0x19   :  { %v2945_v42 = vld [vmem:[%s6145_s10] sm:$0x7] }
  0x1a   :  { %3127 = vmatmul.mubr.msk.f32.gmra.mxu0 %vm101_vm1, %v44_v21  ;;  %3137 = vmatmul.mubr.msk.f32.gmra.mxu1 %vm101_vm1, %v44_v21 }
  0x1b   :  { %235 = vmatprep.mubr.f32.mxu0 %v6147_v4  ;;  %348 = vmatprep.mubr.f32.mxu1 %v6147_v4 }
  0x1c   :  { %59 = vperm.xlu0 %3201, %v49_v22   ;;  %611 = vperm.xlu1 %3202, %v605_v23  }
  0x1e   :  { %3128 = vmatmul.mubr.msk.f32.gmra.mxu0 %vm101_vm1, %v45_v24  ;;  %3138 = vmatmul.mubr.msk.f32.gmra.mxu1 %vm101_vm1, %v45_v24 }
  0x1f   :  { %241 = vmatprep.mubr.f32.mxu0 %v6147_v4  ;;  %354 = vmatprep.mubr.f32.mxu1 %v6147_v4 }
  0x20   :  { %1101 = vperm.xlu0 %3201, %v1083_v25   ;;  %1096 = vperm.xlu1 %3202, %v1082_v26  }
  0x22   :  { %3129 = vmatmul.mubr.msk.f32.gmra.mxu0 %vm101_vm1, %v46_v27  ;;  %3139 = vmatmul.mubr.msk.f32.gmra.mxu1 %vm101_vm1, %v46_v27 }
  0x23   :  { %706 = vmatprep.mubr.f32.mxu0 %v6147_v4  ;;  %795 = vmatprep.mubr.f32.mxu1 %v6147_v4 }
  0x24   :  { %1091 = vperm.xlu0 %3201, %v1081_v28   ;;  %1086 = vperm.xlu1 %3202, %v1080_v29  }
  0x28   :  { %1559 = vperm.xlu0 %3201, %v1541_v30   ;;  %1554 = vperm.xlu1 %3202, %v1540_v31  }
  0x2c   :  { %1549 = vperm.xlu0 %3201, %v1539_v32   ;;  %1544 = vperm.xlu1 %3202, %v1538_v33  }
  0x30   :  { %2035 = vperm.xlu0 %3201, %v3171_v34   ;;  %2030 = vperm.xlu1 %3202, %v3170_v35  }
  0x34   :  { %2025 = vperm.xlu0 %3201, %v3169_v36   ;;  %2020 = vperm.xlu1 %3202, %v3168_v37  }
  0x38   :  { %2495 = vperm.xlu0 %3201, %v3187_v38   ;;  %2490 = vperm.xlu1 %3202, %v3186_v39  }
  0x3c   :  { %2485 = vperm.xlu0 %3201, %v3185_v40   ;;  %2480 = vperm.xlu1 %3202, %v3184_v41  }
  0x40   :  { %2948 = vperm.xlu0 %3201, %v2945_v42  }
  0x7e   :  { %v85_v53 = vpop.permute.xlu1 %84  ;;  %v3857_v63 = vpop.permute.xlu0 %94 }
  0x83   :  { %v80_v60 = vpop.permute.xlu1 %79  ;;  %v90_v13 = vpop.permute.xlu0 %89 }
  0xc6   :  { %v3825_v43 = vpop.f32.mrf.mxu0  ;;  %v3827_v44 = vpop.f32.mrf.mxu1 }
  0xc7   :  { %6200 = vst [vmem:[#allocation5_spill] sm:$0xff] %v3825_v43  ;;  %6201 = vst [vmem:[#allocation6_spill] sm:$0xff] %v3827_v44 }
  0xc8   :  { %v3829_v45 = vpop.f32.mrf.mxu0  ;;  %v3831_v46 = vpop.f32.mrf.mxu1 }
  0xc9   :  { %6202 = vst [vmem:[#allocation7_spill] sm:$0xff] %v3829_v45  ;;  %6203 = vst [vmem:[#allocation8_spill] sm:$0xff] %v3831_v46 }
  0xca   :  { %v3833_v47 = vpop.f32.mrf.mxu0  ;;  %v3835_v48 = vpop.f32.mrf.mxu1 }
  0xcb   :  { %6204 = vst [vmem:[#allocation9_spill] sm:$0xff] %v3833_v47  ;;  %6205 = vst [vmem:[#allocation10_spill] sm:$0xff] %v3835_v48 }
  0xcc   :  { %v3837_v49 = vpop.f32.mrf.mxu0  ;;  %v3839_v50 = vpop.f32.mrf.mxu1 }
  0xcd   :  { %6206 = vst [vmem:[#allocation11_spill] sm:$0xff] %v3837_v49  ;;  %6207 = vst [vmem:[#allocation12_spill] sm:$0xff] %v3839_v50 }
  0xce   :  { %v3841_v51 = vpop.f32.mrf.mxu0  ;;  %v3843_v52 = vpop.f32.mrf.mxu1 }
  0xcf   :  { %6208 = vst [vmem:[#allocation13_spill] sm:$0xff] %v3841_v51  ;;  %6209 = vst [vmem:[#allocation14_spill] sm:$0xff] %v3843_v52 }
  0xd0   :  { %v3845_v54 = vpop.f32.mrf.mxu0  ;;  %v3847_v55 = vpop.f32.mrf.mxu1 }
  0xd1   :  { %6210 = vst [vmem:[#allocation15_spill] sm:$0xff] %v3845_v54  ;;  %6211 = vst [vmem:[#allocation16_spill] sm:$0xff] %v3847_v55 }
  0xd2   :  { %v3849_v56 = vpop.f32.mrf.mxu0  ;;  %v3851_v57 = vpop.f32.mrf.mxu1 }
  0xd3   :  { %6212 = vst [vmem:[#allocation17_spill] sm:$0xff] %v3849_v56  ;;  %6213 = vst [vmem:[#allocation18_spill] sm:$0xff] %v3851_v57 }
  0xd4   :  { %v3853_v58 = vpop.f32.mrf.mxu0  ;;  %v3855_v59 = vpop.f32.mrf.mxu1 }
  0xd5   :  { %6214 = vst [vmem:[#allocation19_spill] sm:$0xff] %v3853_v58  ;;  %6215 = vst [vmem:[#allocation20_spill] sm:$0xff] %v3855_v59 }
  0xd6   :  { %v225_v61 = vpop.f32.mrf.mxu0  ;;  %v338_v62 = vpop.f32.mrf.mxu1 }
  0xd7   :  { %v3859_v0 = vadd.f32 %v225_v61, %v80_v60  ;;  %v3861_v1 = vadd.f32 %v338_v62, %v80_v60 }
  0xd8   :  { %v227_v2 = vpop.f32.mrf.mxu0  ;;  %v340_v3 = vpop.f32.mrf.mxu1 }
  0xd9   :  { %6216 = vst [vmem:[#allocation21_spill] sm:$0xff] %v3861_v1  ;;  %v377_v5 = vand.u32 2147483647, %v3859_v0  ;;  %v379_v8 = vand.u32 2147483647, %v3861_v1  ;;  %v3880_v32 = vadd.f32 %v227_v2, %v80_v60 }
  0xda   :  { %v231_v6 = vpop.f32.mrf.mxu0  ;;  %v344_v7 = vpop.f32.mrf.mxu1 }
  0xdb   :  { %v3865_v9 = vadd.f32 %v231_v6, %v85_v53  ;;  %v3867_v10 = vadd.f32 %v344_v7, %v85_v53  ;;  %v393_v14 = vsub.f32 0.0, %v377_v5  ;;  %v395_v18 = vsub.f32 0.0, %v379_v8 }
  0xdc   :  { %v233_v11 = vpop.f32.mrf.mxu0  ;;  %v346_v12 = vpop.f32.mrf.mxu1  ;;  %v3893_v6 = vadd.f32 %v340_v3, %v80_v60 }
  0xdd   :  { %6217 = vst [vmem:[#allocation22_spill] sm:$0xff] %v3867_v10  ;;  %v381_v15 = vand.u32 2147483647, %v3865_v9  ;;  %v383_v20 = vand.u32 2147483647, %v3867_v10  ;;  %v3873_v27 = vadd.f32 %v233_v11, %v85_v53  ;;  %v3884_v36 = vadd.f32 %v346_v12, %v85_v53 }
  0xde   :  { %v237_v16 = vpop.f32.mrf.mxu0  ;;  %v350_v17 = vpop.f32.mrf.mxu1  ;;  %v409_v22 = vmul.f32 1.442695, %v393_v14  ;;  %v413_v26 = vmul.f32 1.442695, %v395_v18  ;;  %6219 = vst [vmem:[#allocation24_spill] sm:$0xff] %v3893_v6 }
  0xdf   :  { %v3870_v19 = vadd.f32 %v237_v16, %v90_v13  ;;  %v397_v23 = vsub.f32 0.0, %v381_v15  ;;  %v399_v29 = vsub.f32 0.0, %v383_v20  ;;  %v3876_v30 = vadd.f32 %v350_v17, %v90_v13  ;;  %6218 = vst [vmem:[#allocation23_spill] sm:$0xff] %v3884_v36 }
  0xe0   :  { %v239_v21 = vpop.f32.mrf.mxu0  ;;  %v352_v24 = vpop.f32.mrf.mxu1  ;;  %3205 = vpow2.f32 %v409_v22  ;;  %v382_v40 = vand.u32 2147483647, %v3873_v27  ;;  %v384_v15 = vand.u32 2147483647, %v3884_v36  ;;  %v378_v17 = vand.u32 2147483647, %v3880_v32 }
  0xe1   :  { %v385_v28 = vand.u32 2147483647, %v3870_v19  ;;  %v3878_v31 = vadd.f32 %v239_v21, %v90_v13  ;;  %v3882_v34 = vadd.f32 %v352_v24, %v90_v13  ;;  %v417_v35 = vmul.f32 1.442695, %v397_v23 }
  0xe2   :  { %v243_v25 = vpop.f32.mrf.mxu0  ;;  %v387_v37 = vand.u32 2147483647, %v3876_v30  ;;  %v356_v38 = vpop.f32.mrf.mxu1  ;;  %3207 = vpow2.f32 %v413_v26  ;;  %v421_v61 = vmul.f32 1.442695, %v399_v29  ;;  %v398_v14 = vsub.f32 0.0, %v382_v40 }
  0xe3   :  { %v401_v33 = vsub.f32 0.0, %v385_v28  ;;  %v386_v42 = vand.u32 2147483647, %v3878_v31  ;;  %v388_v2 = vand.u32 2147483647, %v3882_v34  ;;  %v3891_v5 = vadd.f32 %v243_v25, %v3857_v63 }
  0xe4   :  { %v245_v39 = vpop.f32.mrf.mxu0  ;;  %v403_v62 = vsub.f32 0.0, %v387_v37  ;;  %v3896_v7 = vadd.f32 %v356_v38, %v3857_v63  ;;  %3209 = vpow2.f32 %v417_v35  ;;  %v380_v20 = vand.u32 2147483647, %v3893_v6  ;;  %v358_v25 = vpop.f32.mrf.mxu1 }
  0xe5   :  { %v425_v41 = vmul.f32 1.442695, %v401_v33  ;;  %v402_v53 = vsub.f32 0.0, %v386_v42  ;;  %v3899_v8 = vadd.f32 %v245_v39, %v3857_v63  ;;  %v404_v12 = vsub.f32 0.0, %v388_v2 }
  0xe6   :  { %v429_v11 = vmul.f32 1.442695, %v403_v62  ;;  %v389_v13 = vand.u32 2147483647, %v3891_v5  ;;  %v391_v3 = vand.u32 2147483647, %v3896_v7  ;;  %v3908_v33 = vadd.f32 %v358_v25, %v3857_v63 }
  0xe7   :  { %3211 = vpow2.f32 %v425_v41  ;;  %v427_v16 = vmul.f32 1.442695, %v402_v53  ;;  %v390_v18 = vand.u32 2147483647, %v3899_v8  ;;  %v431_v21 = vmul.f32 1.442695, %v404_v12 }
  0xe8   :  { %3213 = vpow2.f32 %v421_v61  ;;  %v405_v60 = vsub.f32 0.0, %v389_v13  ;;  %v419_v22 = vmul.f32 1.442695, %v398_v14  ;;  %v400_v23 = vsub.f32 0.0, %v384_v15 }
  0xe9   :  { %3215 = vpow2.f32 %v429_v11  ;;  %v407_v26 = vsub.f32 0.0, %v391_v3  ;;  %v394_v28 = vsub.f32 0.0, %v378_v17  ;;  %v406_v29 = vsub.f32 0.0, %v390_v18 }
  0xea   :  { %3217 = vpow2.f32 %v427_v16  ;;  %v433_v24 = vmul.f32 1.442695, %v405_v60  ;;  %v396_v37 = vsub.f32 0.0, %v380_v20  ;;  %v423_v38 = vmul.f32 1.442695, %v400_v23 }
  0xeb   :  { %v437_v39 = vmul.f32 1.442695, %v407_v26  ;;  %v435_v41 = vmul.f32 1.442695, %v406_v29  ;;  %v411_v42 = vmul.f32 1.442695, %v394_v28 }
  0xec   :  { %3219 = vpow2.f32 %v433_v24  ;;  %v392_v62 = vand.u32 2147483647, %v3908_v33  ;;  %v415_v53 = vmul.f32 1.442695, %v396_v37 }
  0xed   :  { %3221 = vpow2.f32 %v431_v21  ;;  %v3910_v35 = vpop.eup %3205 }
  0xee   :  { %3223 = vpow2.f32 %v419_v22  ;;  %v441_v61 = vadd.f32 1.0, %v3910_v35  ;;  %v408_v12 = vsub.f32 0.0, %v392_v62  ;;  %v444_v22 = vmul.f32 -0.5, %v3910_v35 }
  0xef   :  { %v3912_v40 = vpop.eup %3207  ;;  %3225 = vpow2.f32 %v437_v39 }
  0xf0   :  { %3227 = vpow2.f32 %v423_v38  ;;  %v459_v11 = vadd.f32 1.0, %v3912_v40  ;;  %v439_v60 = vmul.f32 1.442695, %v408_v12  ;;  %v462_v25 = vmul.f32 -0.5, %v3912_v40 }
  0xf1   :  { %v3916_v2 = vpop.eup %3209  ;;  %3229 = vpow2.f32 %v435_v41 }
  0xf2   :  { %3231 = vpow2.f32 %v411_v42  ;;  %v477_v16 = vadd.f32 1.0, %v3916_v2  ;;  %v480_v42 = vmul.f32 -0.5, %v3916_v2  ;;  %v463_v4 = vadd.f32 1.0, %v462_v25 }
  0xf3   :  { %3233 = vlog2.f32 %v441_v61 }
  0xf4   :  { %v3918_v63 = vpop.eup %3211  ;;  %3235 = vpow2.f32 %v415_v53  ;;  %v481_v15 = vadd.f32 1.0, %v480_v42  ;;  %v3977_v42 = vmul.f32 %v3912_v40, %v463_v4 }
  0xf5   :  { %v3921_v13 = vpop.eup %3213  ;;  %v513_v20 = vadd.f32 1.0, %v3918_v63  ;;  %3237 = vlog2.f32 %v459_v11  ;;  %v445_v11 = vadd.f32 1.0, %v444_v22  ;;  %v519_v58 = vand.u32 2147483647, %v3918_v63 }
  0xf6   :  { %v3926_v3 = vpop.eup %3215  ;;  %v495_v24 = vadd.f32 1.0, %v3921_v13  ;;  %3239 = vpow2.f32 %v439_v60  ;;  %v447_v60 = vand.u32 2147483647, %v3910_v35  ;;  %v498_v17 = vmul.f32 -0.5, %v3921_v13  ;;  %6222 = vst [vmem:[#allocation25_spill] sm:$0xff] %v3977_v42 }
  0xf7   :  { %v3931_v21 = vpop.eup %3217  ;;  %3241 = vlog2.f32 %v477_v16  ;;  %v531_v39 = vadd.f32 1.0, %v3926_v3  ;;  %v3966_v12 = vmul.f32 %v3910_v35, %v445_v11  ;;  %v534_v35 = vmul.f32 -0.5, %v3926_v3 }
  0xf8   :  { %3243 = vlog2.f32 %v513_v20  ;;  %v522_v62 = vadd.f32 1.0, %v3931_v21  ;;  %vm3972_vm2 = vcmp.lt.f32.partialorder %v447_v60, 0.0004427343  ;;  %v525_v23 = vmul.f32 -0.5, %v3931_v21 }
  0xf9   :  { %v3939_v29 = vpop.eup %3219  ;;  %3245 = vlog2.f32 %v495_v24  ;;  %v499_v24 = vadd.f32 1.0, %v498_v17  ;;  %v3987_v28 = vmul.f32 %v3916_v2, %v481_v15  ;;  %v535_v15 = vadd.f32 1.0, %v534_v35 }
  0xfa   :  { %v3944_v41 = vpop.eup %3221  ;;  %v549_v16 = vadd.f32 1.0, %v3939_v29  ;;  %3247 = vlog2.f32 %v531_v39  ;;  %v516_v39 = vmul.f32 -0.5, %v3918_v63  ;;  %v526_v46 = vadd.f32 1.0, %v525_v23 }
  0xfb   :  { %v3949_v53 = vpop.eup %3223  ;;  %v540_v14 = vadd.f32 1.0, %v3944_v41  ;;  %3249 = vlog2.f32 %v522_v62  ;;  %v483_v62 = vand.u32 2147483647, %v3916_v2  ;;  %v4000_v2 = vmul.f32 %v3921_v13, %v499_v24 }
  0xfc   :  { %v3959_v22 = vpop.eup %3225  ;;  %v486_v38 = vadd.f32 1.0, %v3949_v53  ;;  %3251 = vlog2.f32 %v549_v16  ;;  %v517_v59 = vadd.f32 1.0, %v516_v39  ;;  %v552_v16 = vmul.f32 -0.5, %v3939_v29 }
  0xfd   :  { %v3963_v25 = vpop.eup %3227  ;;  %v567_v20 = vadd.f32 1.0, %v3959_v22  ;;  %3253 = vlog2.f32 %v540_v14  ;;  %vm3995_vm3 = vcmp.lt.f32.partialorder %v483_v62, 0.0004427343  ;;  %v528_v56 = vand.u32 2147483647, %v3931_v21 }
  0xfe   :  { %v3970_v18 = vpop.eup %3229  ;;  %3255 = vlog2.f32 %v486_v38  ;;  %v504_v17 = vadd.f32 1.0, %v3963_v25  ;;  %v537_v38 = vand.u32 2147483647, %v3926_v3  ;;  %v555_v55 = vand.u32 2147483647, %v3939_v29 }
  0xff   :  { %v3981_v11 = vpop.eup %3231  ;;  %v558_v4 = vadd.f32 1.0, %v3970_v18  ;;  %3257 = vlog2.f32 %v567_v20  ;;  %v489_v20 = vmul.f32 -0.5, %v3949_v53  ;;  %v543_v24 = vmul.f32 -0.5, %v3944_v41 }
 0x100   :  { %v3234_v60 = vpop.eup %3233  ;;  %vm4013_vm4 = vcmp.lt.f32.partialorder %v519_v58, 0.0004427343  ;;  %v553_v23 = vadd.f32 1.0, %v552_v16  ;;  %v4021_v51 = vmul.f32 %v3926_v3, %v535_v15  ;;  %v570_v49 = vmul.f32 -0.5, %v3959_v22 }
 0x101   :  { %v3991_v37 = vpop.eup %3235  ;;  %3259 = vlog2.f32 %v558_v4  ;;  %v4005_v39 = vmul.f32 0.6931472, %v3234_v60  ;;  %v518_v4 = vmul.f32 %v3918_v63, %v517_v59  ;;  %v492_v60 = vand.u32 2147483647, %v3949_v53 }
 0x102   :  { %v3238_v61 = vpop.eup %3237  ;;  %3261 = vlog2.f32 %v504_v17  ;;  %v4031_v63 = vmul.f32 %v3931_v21, %v526_v46  ;;  %v450_v16 = vadd.f32 1.0, %v3981_v11  ;;  %vm4034_vm5 = vcmp.lt.f32.partialorder %v537_v38, 0.0004427343 }
 0x103   :  { %v4003_v57 = vpop.eup %3239  ;;  %v4018_v45 = vmul.f32 0.6931472, %v3238_v61  ;;  %vm4038_vm6 = vcmp.lt.f32.partialorder %v555_v55, 0.0004427343  ;;  %v573_v15 = vand.u32 2147483647, %v3959_v22  ;;  %v554_v38 = vmul.f32 %v3939_v29, %v553_v23 }
 0x104   :  { %v3242_v62 = vpop.eup %3241  ;;  %v576_v54 = vadd.f32 1.0, %v4003_v57  ;;  %vm4044_vm7 = vcmp.lt.f32.partialorder %v528_v56, 0.0004427343  ;;  %v544_v46 = vadd.f32 1.0, %v543_v24  ;;  %v571_v44 = vadd.f32 1.0, %v570_v49 }
 0x105   :  { %v3244_v35 = vpop.eup %3243  ;;  %6227 = vst [vmem:[#allocation26_spill] sm:$0xff] %v4018_v45  ;;  %v4028_v59 = vmul.f32 0.6931472, %v3242_v62  ;;  %v561_v62 = vmul.f32 -0.5, %v3970_v18  ;;  %v564_v47 = vand.u32 2147483647, %v3970_v18 }
 0x106   :  { %v3246_v50 = vpop.eup %3245  ;;  %3263 = vlog2.f32 %v576_v54  ;;  %v515_v17 = vmul.f32 0.6931472, %v3244_v35  ;;  %v546_v35 = vand.u32 2147483647, %v3944_v41  ;;  %v490_v43 = vadd.f32 1.0, %v489_v20 }
 0x107   :  { %v3248_v61 = vpop.eup %3247  ;;  %v4048_v48 = vmul.f32 0.6931472, %v3246_v50  ;;  %3265 = vlog2.f32 %v450_v16  ;;  %v468_v6 = vadd.f32 1.0, %v3991_v37  ;;  %v579_v50 = vmul.f32 -0.5, %v4003_v57 }
 0x108   :  { %v3250_v21 = vpop.eup %3249  ;;  %vm4059_vm8 = vcmp.lt.f32.partialorder %v492_v60, 0.0004427343  ;;  %v507_v29 = vmul.f32 -0.5, %v3963_v25  ;;  %v521_v49 = vsel %vm4013_vm4, %v518_v4, %v515_v17  ;;  %vm4066_vm9 = vcmp.lt.f32.partialorder %v573_v15, 0.0004427343 }
 0x109   :  { %v3252_v55 = vpop.eup %3251  ;;  %v562_v16 = vadd.f32 1.0, %v561_v62  ;;  %3267 = vlog2.f32 %v468_v6  ;;  %v4070_v56 = vmul.f32 0.6931472, %v3248_v61  ;;  %v524_v60 = vmul.f32 0.6931472, %v3250_v21 }
 0x10a   :  { %v3254_v23 = vpop.eup %3253  ;;  %v551_v1 = vmul.f32 0.6931472, %v3252_v55  ;;  %v545_v36 = vmul.f32 %v3944_v41, %v544_v46  ;;  %vm4073_vm10 = vcmp.lt.f32.partialorder %v546_v35, 0.0004427343  ;;  %v572_v52 = vmul.f32 %v3959_v22, %v571_v44 }
 0x10b   :  { %v3256_v10 = vpop.eup %3255  ;;  %vm4078_vm11 = vcmp.lt.f32.partialorder %v564_v47, 0.0004427343  ;;  %v491_v6 = vmul.f32 %v3949_v53, %v490_v43  ;;  %v453_v61 = vmul.f32 -0.5, %v3981_v11  ;;  %v6242_v15 = vmax.f32 %v3870_v19, 0.0 }
 0x10c   :  { %v3258_v45 = vpop.eup %3257  ;;  %v580_v41 = vadd.f32 1.0, %v579_v50  ;;  %v508_v46 = vadd.f32 1.0, %v507_v29  ;;  %v510_v21 = vand.u32 2147483647, %v3963_v25  ;;  %v6243_v35 = vand.u32 2147483647, %v3921_v13 }
 0x10d   :  { %v593_v62 = vadd.f32 %v521_v49, %v6242_v15  ;;  %v563_v22 = vmul.f32 %v3970_v18, %v562_v16  ;;  %v582_v43 = vand.u32 2147483647, %v4003_v57  ;;  %v488_v53 = vmul.f32 0.6931472, %v3256_v10 }
 0x10e   :  { %v3260_v17 = vpop.eup %3259  ;;  %vm4089_vm12 = vcmp.lt.f32.partialorder %v6243_v35, 0.0004427343  ;;  %v539_v19 = vsel %vm4034_vm5, %v4021_v51, %v4070_v56  ;;  %v557_v50 = vsel %vm4038_vm6, %v554_v38, %v551_v1  ;;  %v569_v13 = vmul.f32 0.6931472, %v3258_v45 }
 0x10f   :  { %v560_v47 = vmul.f32 0.6931472, %v3260_v17  ;;  %v3262_v55 = vpop.eup %3261  ;;  %v530_v29 = vsel %vm4044_vm7, %v4031_v63, %v524_v60  ;;  %v542_v49 = vmul.f32 0.6931472, %v3254_v23  ;;  %v454_v16 = vadd.f32 1.0, %v453_v61 }
 0x110   :  { %v471_v10 = vmul.f32 -0.5, %v3991_v37  ;;  %v6246_v15 = vmax.f32 %v3899_v8, 0.0  ;;  %v581_v51 = vmul.f32 %v4003_v57, %v580_v41  ;;  %v509_v1 = vmul.f32 %v3963_v25, %v508_v46  ;;  %v6274_v25 = vld [vmem:[#allocation5_spill] sm:$0xff] }
 0x111   :  { %v566_v18 = vsel %vm4078_vm11, %v563_v22, %v560_v47  ;;  %v456_v45 = vand.u32 2147483647, %v3981_v11  ;;  %v6247_v58 = vmax.f32 %v3891_v5, 0.0  ;;  %v494_v38 = vsel %vm4059_vm8, %v491_v6, %v488_v53 }
 0x112   :  { %v598_v3 = vadd.f32 %v566_v18, %v6246_v15  ;;  %v506_v56 = vmul.f32 0.6931472, %v3262_v55  ;;  %v575_v23 = vsel %vm4066_vm9, %v572_v52, %v569_v13  ;;  %vm583_vm14 = vcmp.lt.f32.partialorder %v582_v43, 0.0004427343 }
 0x113   :  { %v3264_v17 = vpop.eup %3263  ;;  %v597_v63 = vadd.f32 %v557_v50, %v6247_v58  ;;  %v6248_v57 = vmax.f32 %v3878_v31, 0.0  ;;  %vm4120_vm15 = vcmp.lt.f32.partialorder %v510_v21, 0.0004427343  ;;  %v548_v24 = vsel %vm4073_vm10, %v545_v36, %v542_v49  ;;  %v6265_v50 = vld [vmem:[#allocation25_spill] sm:$0xff]  ;;  %v6271_v49 = vld [vmem:[#allocation24_spill] sm:$0xff]  ;;  %v4208_v58 = vpop.permute.xlu1 %626 }
 0x114   :  { %v578_v54 = vmul.f32 0.6931472, %v3264_v17  ;;  %666 = vmatprep.subr.mxu0 %v598_v3  ;;  %v3266_v60 = vpop.eup %3265  ;;  %v455_v4 = vmul.f32 %v3981_v11, %v454_v16  ;;  %v472_v6 = vadd.f32 1.0, %v471_v10  ;;  %v6251_v20 = vmax.f32 %v3908_v33, 0.0  ;;  %v602_v3 = vld [vmem:[%s6138_s3 + $0x8] sm:$0xff] }
 0x115   :  { %v594_v8 = vadd.f32 %v530_v29, %v6248_v57  ;;  %667 = vmatpush1.msra.mxu0 %v597_v63  ;;  %v6252_v31 = vmax.f32 %v3873_v27, 0.0  ;;  %v452_v41 = vmul.f32 0.6931472, %v3266_v60  ;;  %v474_v46 = vand.u32 2147483647, %v3991_v37  ;;  %v6269_v29 = vld [vmem:[#allocation22_spill] sm:$0xff] }
 0x116   :  { %v584_v5 = vsel %vm583_vm14, %v581_v51, %v578_v54  ;;  %v6253_v21 = vmax.f32 %v3865_v9, 0.0  ;;  %v6254_v36 = vsel %vm3995_vm3, %v3987_v28, %v4028_v59  ;;  %v6255_v11 = vmax.f32 %v3896_v7, 0.0  ;;  %v3268_v27 = vpop.eup %3267  ;;  %v603_v51 = vld [vmem:[%s6138_s3 + $0x10] sm:$0xff] }
 0x117   :  { %v600_v52 = vadd.f32 %v584_v5, %v6251_v20  ;;  %668 = vmatprep.subr.mxu0 %v594_v8  ;;  %v590_v61 = vadd.f32 %v494_v38, %v6252_v31  ;;  %v512_v33 = vsel %vm4120_vm15, %v509_v1, %v506_v56  ;;  %vm457_vm0 = vcmp.lt.f32.partialorder %v456_v45, 0.0004427343  ;;  %v604_v1 = vld [vmem:[%s6138_s3 + $0x18] sm:$0xff]  ;;  %v4206_v45 = vpop.permute.xlu0 %74  ;;  %v622_v54 = vpop.permute.xlu1 %621 }
 0x118   :  { %v589_v42 = vadd.f32 %v6254_v36, %v6253_v21  ;;  %v599_v35 = vadd.f32 %v575_v23, %v6255_v11  ;;  %669 = vmatpush1.msra.mxu0 %v593_v62  ;;  %v6256_v47 = vand.u32 2147483647, %v3912_v40  ;;  %v503_v9 = vsel %vm4089_vm12, %v4000_v2, %v4048_v48  ;;  %v6264_v2 = vld [vmem:[#allocation26_spill] sm:$0xff] }
 0x119   :  { %755 = vmatprep.subr.mxu1 %v600_v52  ;;  %v6259_v7 = vmax.f32 %v3882_v34, 0.0  ;;  %670 = vmatprep.subr.mxu0 %v590_v61  ;;  %v458_v14 = vsel %vm457_vm0, %v455_v4, %v452_v41  ;;  %v6260_v59 = vmax.f32 %v3876_v30, 0.0  ;;  %v6261_v40 = vmax.f32 %v3880_v32, 0.0  ;;  %v6275_v52 = vld [vmem:[#allocation9_spill] sm:$0xff]  ;;  %v6276_v36 = vld [vmem:[#allocation6_spill] sm:$0xff] }
 0x11a   :  { %vm4145_vm1 = vcmp.lt.f32.partialorder %v6256_v47, 0.0004427343  ;;  %756 = vmatpush1.msra.mxu1 %v599_v35  ;;  %671 = vmatpush1.msra.mxu0 %v589_v42  ;;  %v470_v53 = vmul.f32 0.6931472, %v3268_v27  ;;  %v473_v55 = vmul.f32 %v3991_v37, %v472_v6  ;;  %v6262_v44 = vmax.f32 %v3859_v0, 0.0  ;;  %v601_v0 = vld [vmem:[%s6138_s3] sm:$0xff] }
 0x11b   :  { %v596_v28 = vadd.f32 %v548_v24, %v6259_v7  ;;  %v595_v62 = vadd.f32 %v539_v19, %v6260_v59  ;;  %v586_v43 = vadd.f32 %v458_v14, %v6261_v40  ;;  %v6263_v48 = vsel %vm3972_vm2, %v3966_v12, %v4005_v39  ;;  %v6266_v19 = vld [vmem:[#allocation23_spill] sm:$0xff]  ;;  %v6268_v37 = vld [vmem:[#allocation21_spill] sm:$0xff]  ;;  %v70_v63 = vpop.permute.xlu0 %69  ;;  %v617_v56 = vpop.permute.xlu1 %616  ;;  %v6278_v7 = vld [vmem:[#allocation10_spill] sm:$0xff] }
 0x11c   :  { %v585_v34 = vadd.f32 %v6263_v48, %v6262_v44  ;;  %v467_v30 = vsel %vm4145_vm1, %v6265_v50, %v6264_v2  ;;  %v6267_v32 = vmax.f32 %v6266_v19, 0.0  ;;  %vm475_vm3 = vcmp.lt.f32.partialorder %v474_v46, 0.0004427343  ;;  %v6279_v40 = vld [vmem:[#allocation11_spill] sm:$0xff] }
 0x11d   :  { %757 = vmatprep.subr.mxu1 %v596_v28  ;;  %v363_v26 = vmax.f32 %v6268_v37, 0.0  ;;  %v6270_v18 = vmax.f32 %v6269_v29, 0.0  ;;  %672 = vmatprep.subr.mxu0 %v586_v43  ;;  %v476_v39 = vsel %vm475_vm3, %v473_v55, %v470_v53  ;;  %v6272_v16 = vmax.f32 %v6271_v49, 0.0 }
 0x11e   :  { %v592_v13 = vadd.f32 %v512_v33, %v6267_v32  ;;  %758 = vmatpush1.msra.mxu1 %v595_v62  ;;  %673 = vmatpush1.msra.mxu0 %v585_v34  ;;  %v6273_v15 = vmov 0.0   ;;  %v6281_v34 = vld [vmem:[#allocation13_spill] sm:$0xff]  ;;  %v6282_v32 = vld [vmem:[#allocation7_spill] sm:$0xff] }
 0x11f   :  { %v591_v12 = vadd.f32 %v503_v9, %v6270_v18  ;;  %v588_v10 = vadd.f32 %v476_v39, %v6272_v16  ;;  %v587_v17 = vadd.f32 %v467_v30, %v363_v26  ;;  %3140 = vmatmul.mubr.msk.f32.vlgmr.msra.gmra.mxu0 %vm629_vm13, %v601_v0  ;;  %v65_v38 = vpop.permute.xlu0 %64  ;;  %v4212_v57 = vpop.permute.xlu1 %611  ;;  %v214_v2 = vadd.f32 %v6281_v34, %v70_v63  ;;  %v6284_v26 = vld [vmem:[#allocation14_spill] sm:$0xff] }
 0x120   :  { %759 = vmatprep.subr.mxu1 %v592_v13  ;;  %712 = vmatprep.mubr.f32.mxu0 %v6273_v15  ;;  %v208_v31 = vadd.f32 %v6275_v52, %v65_v38  ;;  %v321_v28 = vadd.f32 %v6278_v7, %v65_v38  ;;  %v210_v43 = vadd.f32 %v6279_v40, %v65_v38 }
 0x121   :  { %760 = vmatpush1.msra.mxu1 %v591_v12  ;;  %v327_v29 = vadd.f32 %v6284_v26, %v70_v63  ;;  %v6285_v12 = vld [vmem:[#allocation15_spill] sm:$0xff] }
 0x122   :  { %761 = vmatprep.subr.mxu1 %v588_v10  ;;  %v216_v39 = vadd.f32 %v6285_v12, %v70_v63 }
 0x123   :  { %762 = vmatpush1.msra.mxu1 %v587_v17  ;;  %3141 = vmatmul.mubr.msk.f32.gmra.mxu0 %vm629_vm13, %v602_v3  ;;  %v4210_v23 = vpop.permute.xlu0 %59 }
 0x124   :  { %3144 = vmatmul.mubr.msk.f32.vlgmr.msra.gmra.mxu1 %vm629_vm13, %v601_v0  ;;  %718 = vmatprep.mubr.f32.mxu0 %v6273_v15  ;;  %v202_v60 = vadd.f32 %v6274_v25, %v4210_v23  ;;  %v315_v42 = vadd.f32 %v6276_v36, %v4210_v23  ;;  %v204_v13 = vadd.f32 %v6282_v32, %v4210_v23  ;;  %v6283_v0 = vld [vmem:[#allocation12_spill] sm:$0xff]  ;;  %v6287_v36 = vld [vmem:[#allocation17_spill] sm:$0xff] }
 0x125   :  { %801 = vmatprep.mubr.f32.mxu1 %v6273_v15  ;;  %v323_v37 = vadd.f32 %v6283_v0, %v65_v38 }
 0x127   :  { %3142 = vmatmul.mubr.msk.f32.gmra.mxu0 %vm629_vm13, %v603_v51 }
 0x128   :  { %3145 = vmatmul.mubr.msk.f32.gmra.mxu1 %vm629_vm13, %v602_v3  ;;  %724 = vmatprep.mubr.f32.mxu0 %v6273_v15  ;;  %v6286_v3 = vld [vmem:[#allocation16_spill] sm:$0xff] }
 0x129   :  { %807 = vmatprep.mubr.f32.mxu1 %v6273_v15 }
 0x12b   :  { %3143 = vmatmul.mubr.msk.f32.gmra.mxu0 %vm629_vm13, %v604_v1 }
 0x12c   :  { %3146 = vmatmul.mubr.msk.f32.gmra.mxu1 %vm629_vm13, %v603_v51  ;;  %1180 = vmatprep.mubr.f32.mxu0 %v6273_v15  ;;  %v329_v51 = vadd.f32 %v6286_v3, %v70_v63  ;;  %v6290_v3 = vld [vmem:[#allocation19_spill] sm:$0xff] }
 0x12d   :  { %813 = vmatprep.mubr.f32.mxu1 %v6273_v15 }
 0x130   :  { %3147 = vmatmul.mubr.msk.f32.gmra.mxu1 %vm629_vm13, %v604_v1 }
 0x131   :  { %1269 = vmatprep.mubr.f32.mxu1 %v6273_v15 }
 0x1df   :  { %v708_v8 = vpop.f32.mrf.mxu0 }
 0x1e0   :  { %v709_v5 = vadd.f32 %v708_v8, %v4212_v57 }
 0x1e1   :  { %v710_v24 = vpop.f32.mrf.mxu0 }
 0x1e2   :  { %v4217_v4 = vadd.f32 %v709_v5, %v202_v60  ;;  %v711_v8 = vadd.f32 %v710_v24, %v4212_v57 }
 0x1e3   :  { %v714_v20 = vpop.f32.mrf.mxu0 }
 0x1e4   :  { %v797_v6 = vpop.f32.mrf.mxu1  ;;  %v715_v46 = vadd.f32 %v714_v20, %v617_v56  ;;  %v852_v11 = vand.u32 2147483647, %v4217_v4 }
 0x1e5   :  { %v798_v61 = vadd.f32 %v797_v6, %v4212_v57  ;;  %v716_v21 = vpop.f32.mrf.mxu0 }
 0x1e6   :  { %v799_v41 = vpop.f32.mrf.mxu1  ;;  %v4224_v35 = vadd.f32 %v715_v46, %v208_v31  ;;  %v868_v59 = vsub.f32 0.0, %v852_v11  ;;  %v717_v62 = vadd.f32 %v716_v21, %v617_v56 }
 0x1e7   :  { %v4226_v47 = vadd.f32 %v798_v61, %v315_v42  ;;  %v720_v9 = vpop.f32.mrf.mxu0  ;;  %v220_v42 = vadd.f32 %v6287_v36, %v4206_v45 }
 0x1e8   :  { %v803_v33 = vpop.f32.mrf.mxu1  ;;  %v856_v14 = vand.u32 2147483647, %v4224_v35  ;;  %v4235_v30 = vadd.f32 %v717_v62, %v210_v43  ;;  %v721_v19 = vadd.f32 %v720_v9, %v622_v54  ;;  %v884_v18 = vmul.f32 1.442695, %v868_v59  ;;  %v6288_v59 = vld [vmem:[#allocation8_spill] sm:$0xff] }
 0x1e9   :  { %v804_v27 = vadd.f32 %v803_v33, %v617_v56  ;;  %6277 = vst [vmem:[#allocation26_spill] sm:$0xff] %v4226_v47  ;;  %v854_v44 = vand.u32 2147483647, %v4226_v47  ;;  %v722_v48 = vpop.f32.mrf.mxu0  ;;  %v4257_v33 = vadd.f32 %v711_v8, %v204_v13  ;;  %v800_v9 = vadd.f32 %v799_v41, %v4212_v57 }
 0x1ea   :  { %v805_v22 = vpop.f32.mrf.mxu1  ;;  %v872_v50 = vsub.f32 0.0, %v856_v14  ;;  %v4243_v16 = vadd.f32 %v721_v19, %v214_v2  ;;  %v723_v25 = vadd.f32 %v722_v48, %v622_v54  ;;  %v857_v38 = vand.u32 2147483647, %v4235_v30 }
 0x1eb   :  { %v4231_v53 = vadd.f32 %v804_v27, %v321_v28  ;;  %v870_v1 = vsub.f32 0.0, %v854_v44  ;;  %v726_v60 = vpop.f32.mrf.mxu0  ;;  %3269 = vpow2.f32 %v884_v18  ;;  %v806_v52 = vadd.f32 %v805_v22, %v617_v56 }
 0x1ec   :  { %v809_v55 = vpop.f32.mrf.mxu1  ;;  %v892_v5 = vmul.f32 1.442695, %v872_v50  ;;  %v860_v6 = vand.u32 2147483647, %v4243_v16  ;;  %v4251_v31 = vadd.f32 %v723_v25, %v216_v39  ;;  %v727_v24 = vadd.f32 %v726_v60, %v4208_v58  ;;  %v6291_v25 = vld [vmem:[#allocation20_spill] sm:$0xff] }
 0x1ed   :  { %6280 = vst [vmem:[#allocation25_spill] sm:$0xff] %v4231_v53  ;;  %v858_v49 = vand.u32 2147483647, %v4231_v53  ;;  %v810_v10 = vadd.f32 %v809_v55, %v622_v54  ;;  %v888_v11 = vmul.f32 1.442695, %v870_v1  ;;  %v873_v56 = vsub.f32 0.0, %v857_v38  ;;  %v728_v13 = vpop.f32.mrf.mxu0 }
 0x1ee   :  { %v811_v17 = vpop.f32.mrf.mxu1  ;;  %v876_v21 = vsub.f32 0.0, %v860_v6  ;;  %v861_v27 = vand.u32 2147483647, %v4251_v31  ;;  %3271 = vpow2.f32 %v892_v5  ;;  %v4265_v28 = vadd.f32 %v727_v24, %v220_v42 }
 0x1ef   :  { %v4249_v20 = vadd.f32 %v810_v10, %v327_v29  ;;  %v812_v61 = vadd.f32 %v811_v17, %v622_v54  ;;  %v874_v46 = vsub.f32 0.0, %v858_v49  ;;  %v4263_v54 = vadd.f32 %v806_v52, %v323_v37 }
 0x1f0   :  { %v900_v7 = vmul.f32 1.442695, %v876_v21  ;;  %v815_v14 = vpop.f32.mrf.mxu1  ;;  %v317_v62 = vadd.f32 %v6288_v59, %v4210_v23  ;;  %3273 = vpow2.f32 %v888_v11  ;;  %v853_v55 = vand.u32 2147483647, %v4257_v33  ;;  %v6289_v23 = vld [vmem:[#allocation18_spill] sm:$0xff] }
 0x1f1   :  { %v862_v63 = vand.u32 2147483647, %v4249_v20  ;;  %v4261_v22 = vadd.f32 %v812_v61, %v329_v51  ;;  %v896_v40 = vmul.f32 1.442695, %v874_v46  ;;  %v877_v44 = vsub.f32 0.0, %v861_v27 }
 0x1f2   :  { %v4270_v57 = vadd.f32 %v800_v9, %v317_v62  ;;  %v894_v41 = vmul.f32 1.442695, %v873_v56  ;;  %v816_v34 = vadd.f32 %v815_v14, %v4208_v58  ;;  %v859_v2 = vand.u32 2147483647, %v4263_v54  ;;  %v817_v17 = vpop.f32.mrf.mxu1 }
 0x1f3   :  { %v878_v43 = vsub.f32 0.0, %v862_v63  ;;  %v863_v48 = vand.u32 2147483647, %v4261_v22  ;;  %3275 = vpow2.f32 %v900_v7  ;;  %v864_v50 = vand.u32 2147483647, %v4265_v28 }
 0x1f4   :  { %v333_v19 = vadd.f32 %v6289_v23, %v4206_v45  ;;  %3277 = vpow2.f32 %v896_v40  ;;  %v869_v0 = vsub.f32 0.0, %v853_v55  ;;  %v902_v37 = vmul.f32 1.442695, %v877_v44 }
 0x1f5   :  { %v904_v32 = vmul.f32 1.442695, %v878_v43  ;;  %v855_v26 = vand.u32 2147483647, %v4270_v57  ;;  %3279 = vpow2.f32 %v894_v41  ;;  %v879_v29 = vsub.f32 0.0, %v863_v48 }
 0x1f6   :  { %v4279_v18 = vadd.f32 %v816_v34, %v333_v19  ;;  %v875_v12 = vsub.f32 0.0, %v859_v2  ;;  %v880_v39 = vsub.f32 0.0, %v864_v50  ;;  %v729_v49 = vadd.f32 %v728_v13, %v4208_v58 }
 0x1f7   :  { %3281 = vpow2.f32 %v904_v32  ;;  %v222_v51 = vadd.f32 %v6290_v3, %v4206_v45  ;;  %v886_v1 = vmul.f32 1.442695, %v869_v0  ;;  %v335_v60 = vadd.f32 %v6291_v25, %v4206_v45 }
 0x1f8   :  { %v4282_v10 = vpop.eup %3269  ;;  %3283 = vpow2.f32 %v902_v37  ;;  %v908_v8 = vmul.f32 1.442695, %v880_v39  ;;  %v871_v5 = vsub.f32 0.0, %v855_v26  ;;  %v906_v38 = vmul.f32 1.442695, %v879_v29 }
 0x1f9   :  { %v866_v6 = vand.u32 2147483647, %v4279_v18  ;;  %v898_v61 = vmul.f32 1.442695, %v875_v12  ;;  %v4291_v46 = vadd.f32 %v729_v49, %v222_v51  ;;  %v818_v21 = vadd.f32 %v817_v17, %v4208_v58 }
 0x1fa   :  { %3285 = vpow2.f32 %v908_v8  ;;  %v916_v63 = vadd.f32 1.0, %v4282_v10  ;;  %v890_v9 = vmul.f32 1.442695, %v871_v5  ;;  %v919_v44 = vmul.f32 -0.5, %v4282_v10 }
 0x1fb   :  { %v4289_v52 = vpop.eup %3271  ;;  %v882_v24 = vsub.f32 0.0, %v866_v6  ;;  %3287 = vpow2.f32 %v886_v1  ;;  %v865_v36 = vand.u32 2147483647, %v4291_v46  ;;  %v4296_v42 = vadd.f32 %v818_v21, %v335_v60 }
 0x1fc   :  { %v952_v11 = vadd.f32 1.0, %v4289_v52  ;;  %3289 = vpow2.f32 %v906_v38  ;;  %v955_v32 = vmul.f32 -0.5, %v4289_v52  ;;  %v922_v12 = vand.u32 2147483647, %v4282_v10 }
 0x1fd   :  { %v4298_v45 = vpop.eup %3273  ;;  %v912_v27 = vmul.f32 1.442695, %v882_v24  ;;  %3291 = vpow2.f32 %v898_v61  ;;  %v881_v56 = vsub.f32 0.0, %v865_v36  ;;  %v867_v7 = vand.u32 2147483647, %v4296_v42 }
 0x1fe   :  { %3293 = vlog2.f32 %v916_v63  ;;  %v934_v59 = vadd.f32 1.0, %v4298_v45  ;;  %v937_v34 = vmul.f32 -0.5, %v4298_v45  ;;  %v920_v3 = vadd.f32 1.0, %v919_v44 }
 0x1ff   :  { %3295 = vpow2.f32 %v912_v27  ;;  %v910_v40 = vmul.f32 1.442695, %v881_v56  ;;  %v883_v43 = vsub.f32 0.0, %v867_v7  ;;  %v956_v8 = vadd.f32 1.0, %v955_v32 }
 0x200   :  { %v4302_v58 = vpop.eup %3275  ;;  %3297 = vlog2.f32 %v952_v11  ;;  %v938_v51 = vadd.f32 1.0, %v937_v34  ;;  %v958_v25 = vand.u32 2147483647, %v4289_v52  ;;  %vm4341_vm2 = vcmp.lt.f32.partialorder %v922_v12, 0.0004427343 }
 0x201   :  { %v4304_v14 = vpop.eup %3277  ;;  %3299 = vpow2.f32 %v890_v9  ;;  %v988_v48 = vadd.f32 1.0, %v4302_v58  ;;  %v914_v50 = vmul.f32 1.442695, %v883_v43  ;;  %v4350_v56 = vmul.f32 %v4282_v10, %v920_v3 }
 0x202   :  { %v4308_v55 = vpop.eup %3279  ;;  %v970_v2 = vadd.f32 1.0, %v4304_v14  ;;  %3301 = vpow2.f32 %v910_v40  ;;  %v973_v39 = vmul.f32 -0.5, %v4304_v14  ;;  %v4353_v7 = vmul.f32 %v4298_v45, %v938_v51 }
 0x203   :  { %3303 = vlog2.f32 %v934_v59  ;;  %v961_v29 = vadd.f32 1.0, %v4308_v55  ;;  %6294 = vst [vmem:[#allocation23_spill] sm:$0xff] %v4350_v56  ;;  %v991_v59 = vmul.f32 -0.5, %v4302_v58  ;;  %v4357_v43 = vmul.f32 %v4289_v52, %v956_v8 }
 0x204   :  { %v4315_v23 = vpop.eup %3281  ;;  %3305 = vpow2.f32 %v914_v50  ;;  %v974_v11 = vadd.f32 1.0, %v973_v39  ;;  %vm4359_vm4 = vcmp.lt.f32.partialorder %v958_v25, 0.0004427343  ;;  %v964_v10 = vmul.f32 -0.5, %v4308_v55 }
 0x205   :  { %v4320_v0 = vpop.eup %3283  ;;  %3307 = vlog2.f32 %v988_v48  ;;  %v1006_v1 = vadd.f32 1.0, %v4315_v23  ;;  %v1009_v50 = vmul.f32 -0.5, %v4315_v23  ;;  %v992_v8 = vadd.f32 1.0, %v991_v59 }
 0x206   :  { %3309 = vlog2.f32 %v970_v2  ;;  %v997_v5 = vadd.f32 1.0, %v4320_v0  ;;  %v994_v2 = vand.u32 2147483647, %v4302_v58  ;;  %v4372_v12 = vmul.f32 %v4304_v14, %v974_v11 }
 0x207   :  { %v4328_v17 = vpop.eup %3285  ;;  %3311 = vlog2.f32 %v961_v29  ;;  %v965_v62 = vadd.f32 1.0, %v964_v10  ;;  %v1010_v59 = vadd.f32 1.0, %v1009_v50  ;;  %v993_v50 = vmul.f32 %v4302_v58, %v992_v8 }
 0x208   :  { %v4334_v38 = vpop.eup %3287  ;;  %v1024_v27 = vadd.f32 1.0, %v4328_v17  ;;  %3313 = vlog2.f32 %v1006_v1  ;;  %vm4388_vm5 = vcmp.lt.f32.partialorder %v994_v2, 0.0004427343  ;;  %v1027_v32 = vmul.f32 -0.5, %v4328_v17 }
 0x209   :  { %v4339_v63 = vpop.eup %3289  ;;  %3315 = vlog2.f32 %v997_v5  ;;  %v967_v5 = vand.u32 2147483647, %v4308_v55  ;;  %v925_v10 = vadd.f32 1.0, %v4334_v38  ;;  %v4413_v2 = vmul.f32 %v4315_v23, %v1010_v59 }
 0x20a   :  { %v4347_v9 = vpop.eup %3291  ;;  %v1015_v52 = vadd.f32 1.0, %v4339_v63  ;;  %3317 = vlog2.f32 %v1024_v27  ;;  %v1000_v27 = vmul.f32 -0.5, %v4320_v0  ;;  %v1018_v36 = vmul.f32 -0.5, %v4339_v63 }
 0x20b   :  { %v3294_v40 = vpop.eup %3293  ;;  %v979_v3 = vadd.f32 1.0, %v4347_v9  ;;  %v4416_v58 = vmul.f32 %v4308_v55, %v965_v62  ;;  %v1028_v55 = vadd.f32 1.0, %v1027_v32  ;;  %vm4449_vm9 = vcmp.lt.f32.partialorder %v967_v5, 0.0004427343 }
 0x20c   :  { %v4365_v34 = vpop.eup %3295  ;;  %v4378_v1 = vmul.f32 0.6931472, %v3294_v40  ;;  %v1001_v6 = vadd.f32 1.0, %v1000_v27  ;;  %v1030_v27 = vand.u32 2147483647, %v4328_v17  ;;  %v1019_v21 = vadd.f32 1.0, %v1018_v36 }
 0x20d   :  { %v3298_v29 = vpop.eup %3297  ;;  %v1042_v39 = vadd.f32 1.0, %v4365_v34  ;;  %v1045_v11 = vmul.f32 -0.5, %v4365_v34  ;;  %v1021_v36 = vand.u32 2147483647, %v4339_v63  ;;  %v1029_v60 = vmul.f32 %v4328_v17, %v1028_v55 }
 0x20e   :  { %v4376_v51 = vpop.eup %3299  ;;  %6297 = vst [vmem:[#allocation21_spill] sm:$0xff] %v4378_v1  ;;  %v4386_v26 = vmul.f32 0.6931472, %v3298_v29  ;;  %vm4442_vm8 = vcmp.lt.f32.partialorder %v1030_v27, 0.0004427343  ;;  %v6312_v55 = vmax.f32 %v4243_v16, 0.0 }
 0x20f   :  { %v4382_v13 = vpop.eup %3301  ;;  %3319 = vlog2.f32 %v1042_v39  ;;  %v1012_v39 = vand.u32 2147483647, %v4315_v23  ;;  %v982_v23 = vmul.f32 -0.5, %v4347_v9  ;;  %v943_v59 = vadd.f32 1.0, %v4376_v51 }
 0x210   :  { %v3304_v41 = vpop.eup %3303  ;;  %v1033_v40 = vadd.f32 1.0, %v4382_v13  ;;  %3321 = vlog2.f32 %v1015_v52  ;;  %vm4458_vm10 = vcmp.lt.f32.partialorder %v1021_v36, 0.0004427343  ;;  %v6351_v44 = vmax.f32 %v4257_v33, 0.0 }
 0x211   :  { %v4393_v19 = vpop.eup %3305  ;;  %3323 = vlog2.f32 %v979_v3  ;;  %v4404_v61 = vmul.f32 0.6931472, %v3304_v41  ;;  %v1003_v3 = vand.u32 2147483647, %v4320_v0  ;;  %vm4418_vm6 = vcmp.lt.f32.partialorder %v1012_v39, 0.0004427343 }
 0x212   :  { %v3308_v37 = vpop.eup %3307  ;;  %3325 = vlog2.f32 %v1033_v40  ;;  %v1051_v52 = vadd.f32 1.0, %v4393_v19  ;;  %v983_v53 = vadd.f32 1.0, %v982_v23  ;;  %v928_v23 = vmul.f32 -0.5, %v4334_v38 }
 0x213   :  { %v3310_v29 = vpop.eup %3309  ;;  %v990_v41 = vmul.f32 0.6931472, %v3308_v37  ;;  %v4429_v37 = vmul.f32 %v4320_v0, %v1001_v6  ;;  %vm4431_vm7 = vcmp.lt.f32.partialorder %v1003_v3, 0.0004427343  ;;  %v4447_v6 = vmul.f32 %v4339_v63, %v1019_v21 }
 0x214   :  { %3327 = vlog2.f32 %v1051_v52  ;;  %v3312_v8 = vpop.eup %3311  ;;  %v4423_v25 = vmul.f32 0.6931472, %v3310_v29  ;;  %v1048_v52 = vand.u32 2147483647, %v4365_v34  ;;  %v1036_v29 = vmul.f32 -0.5, %v4382_v13 }
 0x215   :  { %3329 = vlog2.f32 %v925_v10  ;;  %v3314_v62 = vpop.eup %3313  ;;  %v4438_v48 = vmul.f32 0.6931472, %v3312_v8  ;;  %v996_v32 = vsel %vm4388_vm5, %v993_v50, %v990_v41  ;;  %v1046_v8 = vadd.f32 1.0, %v1045_v11 }
 0x216   :  { %v3316_v10 = vpop.eup %3315  ;;  %3331 = vlog2.f32 %v943_v59  ;;  %v4453_v15 = vmul.f32 0.6931472, %v3314_v62  ;;  %v1054_v59 = vmul.f32 -0.5, %v4393_v19  ;;  %v1039_v50 = vand.u32 2147483647, %v4382_v13 }
 0x217   :  { %v3318_v49 = vpop.eup %3317  ;;  %v999_v41 = vmul.f32 0.6931472, %v3316_v10  ;;  %v985_v21 = vand.u32 2147483647, %v4347_v9  ;;  %vm4463_vm11 = vcmp.lt.f32.partialorder %v1048_v52, 0.0004427343  ;;  %v969_v17 = vsel %vm4449_vm9, %v4416_v58, %v4438_v48 }
 0x218   :  { %v1037_v11 = vadd.f32 1.0, %v1036_v29  ;;  %v4474_v36 = vadd.f32 %v996_v32, %v6312_v55  ;;  %v1026_v10 = vmul.f32 0.6931472, %v3318_v49  ;;  %v1057_v47 = vand.u32 2147483647, %v4393_v19 }
 0x219   :  { %v946_v52 = vmul.f32 -0.5, %v4376_v51  ;;  %v6314_v29 = vand.u32 2147483647, %v4304_v14  ;;  %v1014_v48 = vsel %vm4418_vm6, %v4413_v2, %v4453_v15  ;;  %v1047_v16 = vmul.f32 %v4365_v34, %v1046_v8 }
 0x21a   :  { %6313 = vst [vmem:[#allocation22_spill] sm:$0xff] %v4474_v36  ;;  %v1055_v58 = vadd.f32 1.0, %v1054_v59  ;;  %v984_v49 = vmul.f32 %v4347_v9, %v983_v53  ;;  %vm4490_vm14 = vcmp.lt.f32.partialorder %v1039_v50, 0.0004427343  ;;  %v1005_v14 = vsel %vm4431_vm7, %v4429_v37, %v999_v41 }
 0x21b   :  { %vm4480_vm12 = vcmp.lt.f32.partialorder %v6314_v29, 0.0004427343  ;;  %vm4497_vm15 = vcmp.lt.f32.partialorder %v985_v21, 0.0004427343  ;;  %v1038_v34 = vmul.f32 %v4382_v13, %v1037_v11  ;;  %v929_v40 = vadd.f32 1.0, %v928_v23 }
 0x21c   :  { %v3320_v63 = vpop.eup %3319  ;;  %v1032_v9 = vsel %vm4442_vm8, %v1029_v60, %v1026_v10  ;;  %vm4504_vm0 = vcmp.lt.f32.partialorder %v1057_v47, 0.0004427343  ;;  %v931_v39 = vand.u32 2147483647, %v4334_v38  ;;  %v947_v37 = vadd.f32 1.0, %v946_v52 }
 0x21d   :  { %v3322_v62 = vpop.eup %3321  ;;  %v1044_v3 = vmul.f32 0.6931472, %v3320_v63  ;;  %v1056_v13 = vmul.f32 %v4393_v19, %v1055_v58  ;;  %v6323_v0 = vmax.f32 %v4291_v46, 0.0  ;;  %v949_v11 = vand.u32 2147483647, %v4376_v51 }
 0x21e   :  { %v3324_v1 = vpop.eup %3323  ;;  %v1017_v2 = vmul.f32 0.6931472, %v3322_v62  ;;  %v6325_v23 = vmax.f32 %v4265_v28, 0.0  ;;  %v6327_v46 = vmax.f32 %v4296_v42, 0.0  ;;  %v6329_v28 = vmax.f32 %v4251_v31, 0.0 }
 0x21f   :  { %v3326_v32 = vpop.eup %3325  ;;  %v981_v21 = vmul.f32 0.6931472, %v3324_v1  ;;  %v1050_v63 = vsel %vm4463_vm11, %v1047_v16, %v1044_v3  ;;  %v930_v1 = vmul.f32 %v4334_v38, %v929_v40  ;;  %vm4538_vm1 = vcmp.lt.f32.partialorder %v931_v39, 0.0004427343  ;;  %v1077_v39 = vld [vmem:[%s6140_s5 + $0x8] sm:$0xff] }
 0x220   :  { %v1035_v15 = vmul.f32 0.6931472, %v3326_v32  ;;  %v4521_v62 = vadd.f32 %v1032_v9, %v6325_v23  ;;  %v1023_v19 = vsel %vm4458_vm10, %v4447_v6, %v1017_v2  ;;  %v4536_v16 = vadd.f32 %v1005_v14, %v6329_v28  ;;  %v6358_v2 = vld [vmem:[#allocation26_spill] sm:$0xff] }
 0x221   :  { %v3328_v53 = vpop.eup %3327  ;;  %v948_v27 = vmul.f32 %v4376_v51, %v947_v37  ;;  %v6333_v6 = vmax.f32 %v4279_v18, 0.0  ;;  %v987_v42 = vsel %vm4497_vm15, %v984_v49, %v981_v21  ;;  %v978_v3 = vsel %vm4480_vm12, %v4372_v12, %v4423_v25  ;;  %v1078_v37 = vld [vmem:[%s6140_s5 + $0x10] sm:$0xff] }
 0x222   :  { %v3330_v59 = vpop.eup %3329  ;;  %v1041_v50 = vsel %vm4490_vm14, %v1038_v34, %v1035_v15  ;;  %v1053_v41 = vmul.f32 0.6931472, %v3328_v53  ;;  %6326 = vst [vmem:[#allocation5_spill] sm:$0xff] %v4521_v62  ;;  %6330 = vst [vmem:[#allocation6_spill] sm:$0xff] %v4536_v16  ;;  %v6335_v18 = vmax.f32 %v4261_v22, 0.0  ;;  %v6337_v55 = vmax.f32 %v4235_v30, 0.0 }
 0x223   :  { %v4516_v47 = vadd.f32 %v1041_v50, %v6323_v0  ;;  %v927_v60 = vmul.f32 0.6931472, %v3330_v59  ;;  %v3332_v5 = vpop.eup %3331  ;;  %v4545_v38 = vadd.f32 %v1050_v63, %v6333_v6  ;;  %vm4566_vm3 = vcmp.lt.f32.partialorder %v949_v11, 0.0004427343  ;;  %v6354_v34 = vld [vmem:[#allocation23_spill] sm:$0xff]  ;;  %v6359_v53 = vld [vmem:[#allocation25_spill] sm:$0xff]  ;;  %v1097_v50 = vpop.permute.xlu1 %1096 }
 0x224   :  { %v1059_v10 = vsel %vm4504_vm0, %v1056_v13, %v1053_v41  ;;  %v945_v32 = vmul.f32 0.6931472, %v3332_v5  ;;  %v4560_v51 = vadd.f32 %v1023_v19, %v6335_v18  ;;  %v4564_v49 = vadd.f32 %v969_v17, %v6337_v55  ;;  %v1079_v59 = vld [vmem:[%s6140_s5 + $0x18] sm:$0xff]  ;;  %v4662_v41 = vpop.permute.xlu0 %1101 }
 0x225   :  { %6324 = vst [vmem:[#allocation24_spill] sm:$0xff] %v4516_v47  ;;  %1140 = vmatprep.subr.mxu0 %v4516_v47  ;;  %v4532_v52 = vadd.f32 %v1059_v10, %v6327_v46  ;;  %6334 = vst [vmem:[#allocation10_spill] sm:$0xff] %v4545_v38  ;;  %v933_v31 = vsel %vm4538_vm1, %v930_v1, %v927_v60  ;;  %v6341_v29 = vand.u32 2147483647, %v4298_v45  ;;  %v6344_v12 = vmax.f32 %v4224_v35, 0.0 }
 0x226   :  { %1141 = vmatpush1.msra.mxu0 %v4521_v62  ;;  %6336 = vst [vmem:[#allocation11_spill] sm:$0xff] %v4560_v51  ;;  %6338 = vst [vmem:[#allocation13_spill] sm:$0xff] %v4564_v49  ;;  %v6345_v22 = vsel %vm4359_vm4, %v4357_v43, %v4386_v26  ;;  %v6347_v25 = vmax.f32 %v4249_v20, 0.0  ;;  %v951_v45 = vsel %vm4566_vm3, %v948_v27, %v945_v32  ;;  %v839_v26 = vmax.f32 %v4270_v57, 0.0 }
 0x227   :  { %6328 = vst [vmem:[#allocation9_spill] sm:$0xff] %v4532_v52  ;;  %1229 = vmatprep.subr.mxu1 %v4532_v52  ;;  %1142 = vmatprep.subr.mxu0 %v4536_v16  ;;  %vm4572_vm5 = vcmp.lt.f32.partialorder %v6341_v29, 0.0004427343  ;;  %v4583_v30 = vadd.f32 %v6345_v22, %v6344_v12  ;;  %v6349_v20 = vmax.f32 %v4263_v54, 0.0  ;;  %v6353_v15 = vmax.f32 %v4217_v4, 0.0  ;;  %v1076_v4 = vld [vmem:[%s6140_s5] sm:$0xff]  ;;  %v1087_v13 = vpop.permute.xlu1 %1086 }
 0x228   :  { %v4587_v17 = vadd.f32 %v1014_v48, %v6347_v25  ;;  %1230 = vmatpush1.msra.mxu1 %v4545_v38  ;;  %1143 = vmatpush1.msra.mxu0 %v4474_v36  ;;  %v942_v35 = vsel %vm4572_vm5, %v4353_v7, %v4404_v61  ;;  %v4606_v48 = vadd.f32 %v933_v31, %v6351_v44  ;;  %v6355_v61 = vld [vmem:[#allocation21_spill] sm:$0xff]  ;;  %v838_v40 = vmax.f32 %v6358_v2, 0.0  ;;  %v1092_v1 = vpop.permute.xlu0 %1091 }
 0x229   :  { %6346 = vst [vmem:[#allocation7_spill] sm:$0xff] %v4583_v30  ;;  %1231 = vmatprep.subr.mxu1 %v4560_v51  ;;  %1144 = vmatprep.subr.mxu0 %v4564_v49  ;;  %v4602_v43 = vadd.f32 %v987_v42, %v6349_v20  ;;  %v6356_v7 = vsel %vm4341_vm2, %v6354_v34, %v6355_v61  ;;  %v6360_v9 = vmax.f32 %v6359_v53, 0.0  ;;  %v6364_v8 = vmov 0.0  }
 0x22a   :  { %6348 = vst [vmem:[#allocation12_spill] sm:$0xff] %v4587_v17  ;;  %6352 = vst [vmem:[#allocation15_spill] sm:$0xff] %v4606_v48  ;;  %v4615_v57 = vadd.f32 %v6356_v7, %v6353_v15  ;;  %1232 = vmatpush1.msra.mxu1 %v4587_v17  ;;  %1145 = vmatpush1.msra.mxu0 %v4583_v30  ;;  %v4629_v33 = vadd.f32 %v951_v45, %v839_v26 }
 0x22b   :  { %6350 = vst [vmem:[#allocation14_spill] sm:$0xff] %v4602_v43  ;;  %v4620_v54 = vadd.f32 %v978_v3, %v6360_v9  ;;  %1233 = vmatprep.subr.mxu1 %v4602_v43  ;;  %1146 = vmatprep.subr.mxu0 %v4606_v48  ;;  %v4631_v24 = vadd.f32 %v942_v35, %v838_v40 }
 0x22c   :  { %6357 = vst [vmem:[#allocation16_spill] sm:$0xff] %v4615_v57  ;;  %6362 = vst [vmem:[#allocation8_spill] sm:$0xff] %v4629_v33  ;;  %1147 = vmatpush1.msra.mxu0 %v4615_v57 }
 0x22d   :  { %6361 = vst [vmem:[#allocation17_spill] sm:$0xff] %v4620_v54  ;;  %6363 = vst [vmem:[#allocation18_spill] sm:$0xff] %v4631_v24  ;;  %1234 = vmatpush1.msra.mxu1 %v4620_v54  ;;  %3148 = vmatmul.mubr.msk.f32.vlgmr.msra.gmra.mxu0 %vm629_vm13, %v1076_v4 }
 0x22e   :  { %1235 = vmatprep.subr.mxu1 %v4629_v33  ;;  %1186 = vmatprep.mubr.f32.mxu0 %v6364_v8 }
 0x22f   :  { %1236 = vmatpush1.msra.mxu1 %v4631_v24 }
 0x230   :  { %3152 = vmatmul.mubr.msk.f32.vlgmr.msra.gmra.mxu1 %vm629_vm13, %v1076_v4 }
 0x231   :  { %1275 = vmatprep.mubr.f32.mxu1 %v6364_v8  ;;  %3149 = vmatmul.mubr.msk.f32.gmra.mxu0 %vm629_vm13, %v1077_v39 }
 0x232   :  { %1192 = vmatprep.mubr.f32.mxu0 %v6364_v8 }
 0x234   :  { %3153 = vmatmul.mubr.msk.f32.gmra.mxu1 %vm629_vm13, %v1077_v39 }
 0x235   :  { %1281 = vmatprep.mubr.f32.mxu1 %v6364_v8  ;;  %3150 = vmatmul.mubr.msk.f32.gmra.mxu0 %vm629_vm13, %v1078_v37 }
 0x236   :  { %1198 = vmatprep.mubr.f32.mxu0 %v6364_v8 }
 0x238   :  { %3154 = vmatmul.mubr.msk.f32.gmra.mxu1 %vm629_vm13, %v1078_v37 }
 0x239   :  { %1287 = vmatprep.mubr.f32.mxu1 %v6364_v8  ;;  %3151 = vmatmul.mubr.msk.f32.gmra.mxu0 %vm629_vm13, %v1079_v59 }
 0x23a   :  { %1638 = vmatprep.mubr.f32.mxu0 %v6364_v8 }
 0x23c   :  { %3155 = vmatmul.mubr.msk.f32.gmra.mxu1 %vm629_vm13, %v1079_v59 }
 0x23d   :  { %1727 = vmatprep.mubr.f32.mxu1 %v6364_v8 }
 0x2ed   :  { %v1182_v21 = vpop.f32.mrf.mxu0 }
 0x2ee   :  { %v4664_v63 = vadd.f32 %v1182_v21, %v1087_v13 }
 0x2ef   :  { %v1184_v60 = vpop.f32.mrf.mxu0 }
 0x2f0   :  { %v1271_v0 = vpop.f32.mrf.mxu1  ;;  %v1310_v11 = vand.u32 2147483647, %v4664_v63  ;;  %v4692_v59 = vadd.f32 %v1184_v60, %v1087_v13 }
 0x2f1   :  { %v4667_v23 = vadd.f32 %v1271_v0, %v1087_v13  ;;  %v1188_v19 = vpop.f32.mrf.mxu0 }
 0x2f2   :  { %v1273_v10 = vpop.f32.mrf.mxu1  ;;  %v1326_v5 = vsub.f32 0.0, %v1310_v11  ;;  %v4669_v46 = vadd.f32 %v1188_v19, %v1092_v1 }
 0x2f3   :  { %6365 = vst [vmem:[#allocation19_spill] sm:$0xff] %v4667_v23  ;;  %v1190_v58 = vpop.f32.mrf.mxu0  ;;  %v1312_v27 = vand.u32 2147483647, %v4667_v23  ;;  %v4697_v0 = vadd.f32 %v1273_v10, %v1087_v13  ;;  %v1311_v10 = vand.u32 2147483647, %v4692_v59 }
 0x2f4   :  { %v1277_v28 = vpop.f32.mrf.mxu1  ;;  %v1314_v32 = vand.u32 2147483647, %v4669_v46  ;;  %v1342_v3 = vmul.f32 1.442695, %v1326_v5  ;;  %v4678_v22 = vadd.f32 %v1190_v58, %v1092_v1 }
 0x2f5   :  { %v4672_v6 = vadd.f32 %v1277_v28, %v1092_v1  ;;  %v1194_v31 = vpop.f32.mrf.mxu0  ;;  %v1328_v14 = vsub.f32 0.0, %v1312_v27  ;;  %6367 = vst [vmem:[#allocation23_spill] sm:$0xff] %v4697_v0 }
 0x2f6   :  { %v1279_v42 = vpop.f32.mrf.mxu1  ;;  %v1330_v29 = vsub.f32 0.0, %v1314_v32  ;;  %v4676_v56 = vadd.f32 %v1194_v31, %v1097_v50  ;;  %3333 = vpow2.f32 %v1342_v3  ;;  %v1315_v2 = vand.u32 2147483647, %v4678_v22 }
 0x2f7   :  { %v1316_v18 = vand.u32 2147483647, %v4672_v6  ;;  %v1196_v12 = vpop.f32.mrf.mxu0  ;;  %v1346_v20 = vmul.f32 1.442695, %v1328_v14  ;;  %v4688_v40 = vadd.f32 %v1279_v42, %v1092_v1 }
 0x2f8   :  { %v1283_v55 = vpop.f32.mrf.mxu1  ;;  %v1350_v45 = vmul.f32 1.442695, %v1330_v29  ;;  %v1318_v26 = vand.u32 2147483647, %v4676_v56  ;;  %v4683_v34 = vadd.f32 %v1196_v12, %v1097_v50  ;;  %v1331_v28 = vsub.f32 0.0, %v1315_v2 }
 0x2f9   :  { %v1332_v35 = vsub.f32 0.0, %v1316_v18  ;;  %v4681_v44 = vadd.f32 %v1283_v55, %v1097_v50  ;;  %v1200_v7 = vpop.f32.mrf.mxu0  ;;  %6366 = vst [vmem:[#allocation20_spill] sm:$0xff] %v4688_v40  ;;  %v1317_v58 = vand.u32 2147483647, %v4688_v40  ;;  %v1313_v55 = vand.u32 2147483647, %v4697_v0 }
 0x2fa   :  { %v1285_v25 = vpop.f32.mrf.mxu1  ;;  %v1334_v15 = vsub.f32 0.0, %v1318_v26  ;;  %3335 = vpow2.f32 %v1350_v45  ;;  %v1319_v37 = vand.u32 2147483647, %v4683_v34  ;;  %v1352_v14 = vmul.f32 1.442695, %v1331_v28 }
 0x2fb   :  { %v4685_v61 = vadd.f32 %v1285_v25, %v1097_v50  ;;  %v1320_v53 = vand.u32 2147483647, %v4681_v44  ;;  %v1354_v4 = vmul.f32 1.442695, %v1332_v35  ;;  %3337 = vpow2.f32 %v1346_v20  ;;  %v1202_v5 = vpop.f32.mrf.mxu0 }
 0x2fc   :  { %v1289_v9 = vpop.f32.mrf.mxu1  ;;  %v1358_v39 = vmul.f32 1.442695, %v1334_v15  ;;  %v4695_v50 = vadd.f32 %v1200_v7, %v4662_v41  ;;  %v1335_v11 = vsub.f32 0.0, %v1319_v37  ;;  %v4707_v13 = vadd.f32 %v1202_v5, %v4662_v41 }
 0x2fd   :  { %v1336_v21 = vsub.f32 0.0, %v1320_v53  ;;  %v1321_v19 = vand.u32 2147483647, %v4685_v61  ;;  %v4701_v1 = vadd.f32 %v1289_v9, %v4662_v41  ;;  %v1333_v29 = vsub.f32 0.0, %v1317_v58 }
 0x2fe   :  { %3339 = vpow2.f32 %v1358_v39  ;;  %v1322_v60 = vand.u32 2147483647, %v4695_v50  ;;  %v1360_v27 = vmul.f32 1.442695, %v1335_v11  ;;  %v1291_v25 = vpop.f32.mrf.mxu1  ;;  %v1323_v26 = vand.u32 2147483647, %v4707_v13 }
 0x2ff   :  { %3341 = vpow2.f32 %v1354_v4  ;;  %v1324_v42 = vand.u32 2147483647, %v4701_v1  ;;  %v1362_v31 = vmul.f32 1.442695, %v1336_v21  ;;  %v1337_v32 = vsub.f32 0.0, %v1321_v19 }
 0x300   :  { %v1338_v3 = vsub.f32 0.0, %v1322_v60  ;;  %3343 = vpow2.f32 %v1360_v27  ;;  %v1327_v20 = vsub.f32 0.0, %v1311_v10  ;;  %v1329_v7 = vsub.f32 0.0, %v1313_v55 }
 0x301   :  { %v1340_v18 = vsub.f32 0.0, %v1324_v42  ;;  %3345 = vpow2.f32 %v1362_v31  ;;  %v1364_v15 = vmul.f32 1.442695, %v1337_v32  ;;  %v1356_v2 = vmul.f32 1.442695, %v1333_v29 }
 0x302   :  { %v1366_v12 = vmul.f32 1.442695, %v1338_v3  ;;  %v4715_v53 = vadd.f32 %v1291_v25, %v4662_v41  ;;  %v1339_v39 = vsub.f32 0.0, %v1323_v26  ;;  %v1344_v21 = vmul.f32 1.442695, %v1327_v20 }
 0x303   :  { %v4711_v45 = vpop.eup %3333  ;;  %v1370_v35 = vmul.f32 1.442695, %v1340_v18  ;;  %v1348_v11 = vmul.f32 1.442695, %v1329_v7 }
 0x304   :  { %3347 = vpow2.f32 %v1366_v12  ;;  %v1374_v9 = vadd.f32 1.0, %v4711_v45  ;;  %v1368_v19 = vmul.f32 1.442695, %v1339_v39  ;;  %v1325_v5 = vand.u32 2147483647, %v4715_v53 }
 0x305   :  { %3349 = vpow2.f32 %v1352_v14  ;;  %v1377_v14 = vmul.f32 -0.5, %v4711_v45 }
 0x306   :  { %3351 = vpow2.f32 %v1370_v35  ;;  %v1341_v27 = vsub.f32 0.0, %v1325_v5 }
 0x307   :  { %v4718_v4 = vpop.eup %3335  ;;  %3353 = vpow2.f32 %v1364_v15 }
 0x308   :  { %v4720_v37 = vpop.eup %3337  ;;  %3355 = vpow2.f32 %v1356_v2  ;;  %v1410_v41 = vadd.f32 1.0, %v4718_v4  ;;  %v1372_v10 = vmul.f32 1.442695, %v1341_v27  ;;  %v1413_v35 = vmul.f32 -0.5, %v4718_v4 }
 0x309   :  { %3357 = vlog2.f32 %v1374_v9  ;;  %v1392_v60 = vadd.f32 1.0, %v4720_v37  ;;  %v1395_v29 = vmul.f32 -0.5, %v4720_v37  ;;  %v1416_v42 = vand.u32 2147483647, %v4718_v4 }
 0x30a   :  { %3359 = vpow2.f32 %v1368_v19  ;;  %v6409_v27 = vmax.f32 %v4685_v61, 0.0  ;;  %v6413_v61 = vmax.f32 %v4681_v44, 0.0 }
 0x30b   :  { %v4723_v28 = vpop.eup %3339  ;;  %3361 = vpow2.f32 %v1344_v21  ;;  %v1380_v21 = vand.u32 2147483647, %v4711_v45  ;;  %vm4791_vm4 = vcmp.lt.f32.partialorder %v1416_v42, 0.0004427343 }
 0x30c   :  { %v4726_v58 = vpop.eup %3341  ;;  %3363 = vpow2.f32 %v1348_v11  ;;  %v1446_v31 = vadd.f32 1.0, %v4723_v28  ;;  %v1449_v12 = vmul.f32 -0.5, %v4723_v28 }
 0x30d   :  { %v4731_v32 = vpop.eup %3343  ;;  %3365 = vlog2.f32 %v1410_v41  ;;  %v1428_v55 = vadd.f32 1.0, %v4726_v58  ;;  %v1431_v11 = vmul.f32 -0.5, %v4726_v58  ;;  %v1378_v41 = vadd.f32 1.0, %v1377_v14 }
 0x30e   :  { %3367 = vlog2.f32 %v1392_v60  ;;  %v4739_v25 = vpop.eup %3345  ;;  %v1455_v9 = vadd.f32 1.0, %v4731_v32  ;;  %v1396_v60 = vadd.f32 1.0, %v1395_v29  ;;  %vm4768_vm2 = vcmp.lt.f32.partialorder %v1380_v21, 0.0004427343 }
 0x30f   :  { %3369 = vpow2.f32 %v1372_v10  ;;  %v1414_v10 = vadd.f32 1.0, %v1413_v35  ;;  %v1464_v26 = vadd.f32 1.0, %v4739_v25  ;;  %v1432_v7 = vadd.f32 1.0, %v1431_v11 }
 0x310   :  { %3371 = vlog2.f32 %v1446_v31  ;;  %v4775_v3 = vmul.f32 %v4711_v45, %v1378_v41  ;;  %v1452_v11 = vand.u32 2147483647, %v4723_v28  ;;  %v1450_v41 = vadd.f32 1.0, %v1449_v12 }
 0x311   :  { %v4744_v15 = vpop.eup %3347  ;;  %3373 = vlog2.f32 %v1428_v55  ;;  %v4785_v52 = vmul.f32 %v4718_v4, %v1414_v10  ;;  %v4800_v4 = vmul.f32 %v4726_v58, %v1432_v7  ;;  %v1458_v12 = vmul.f32 -0.5, %v4731_v32 }
 0x312   :  { %v4749_v39 = vpop.eup %3349  ;;  %v1482_v19 = vadd.f32 1.0, %v4744_v15  ;;  %3375 = vlog2.f32 %v1455_v9  ;;  %v4778_v9 = vmul.f32 %v4720_v37, %v1396_v60  ;;  %v1467_v60 = vmul.f32 -0.5, %v4739_v25 }
 0x313   :  { %v4754_v5 = vpop.eup %3351  ;;  %v1419_v14 = vadd.f32 1.0, %v4749_v39  ;;  %v1425_v38 = vand.u32 2147483647, %v4749_v39  ;;  %vm4808_vm6 = vcmp.lt.f32.partialorder %v1452_v11, 0.0004427343 }
 0x314   :  { %v4761_v55 = vpop.eup %3353  ;;  %3377 = vlog2.f32 %v1482_v19  ;;  %v1500_v2 = vadd.f32 1.0, %v4754_v5  ;;  %6370 = vst [vmem:[#allocation21_spill] sm:$0xff] %v4778_v9  ;;  %v1470_v7 = vand.u32 2147483647, %v4739_v25  ;;  %v1468_v43 = vadd.f32 1.0, %v1467_v60 }
 0x315   :  { %v4766_v29 = vpop.eup %3355  ;;  %3379 = vlog2.f32 %v1464_v26  ;;  %v1473_v19 = vadd.f32 1.0, %v4761_v55  ;;  %v1422_v26 = vmul.f32 -0.5, %v4749_v39  ;;  %v1461_v48 = vand.u32 2147483647, %v4731_v32 }
 0x316   :  { %v3358_v31 = vpop.eup %3357  ;;  %3381 = vlog2.f32 %v1419_v14  ;;  %v1437_v10 = vadd.f32 1.0, %v4766_v29  ;;  %v1503_v11 = vmul.f32 -0.5, %v4754_v5  ;;  %v1506_v30 = vand.u32 2147483647, %v4754_v5 }
 0x317   :  { %v4782_v18 = vpop.eup %3359  ;;  %3383 = vlog2.f32 %v1500_v2  ;;  %v4804_v47 = vmul.f32 0.6931472, %v3358_v31  ;;  %v1485_v2 = vmul.f32 -0.5, %v4744_v15  ;;  %v1451_v31 = vmul.f32 %v4723_v28, %v1450_v41 }
 0x318   :  { %v4789_v35 = vpop.eup %3361  ;;  %v1491_v21 = vadd.f32 1.0, %v4782_v18  ;;  %v1459_v28 = vadd.f32 1.0, %v1458_v12  ;;  %v1494_v49 = vmul.f32 -0.5, %v4782_v18  ;;  %vm4834_vm7 = vcmp.lt.f32.partialorder %v1461_v48, 0.0004427343 }
 0x319   :  { %v4797_v20 = vpop.eup %3363  ;;  %v1383_v41 = vadd.f32 1.0, %v4789_v35  ;;  %v1486_v60 = vadd.f32 1.0, %v1485_v2  ;;  %v1479_v48 = vand.u32 2147483647, %v4761_v55  ;;  %vm4863_vm9 = vcmp.lt.f32.partialorder %v1506_v30, 0.0004427343 }
 0x31a   :  { %v3366_v42 = vpop.eup %3365  ;;  %3385 = vlog2.f32 %v1491_v21  ;;  %v1488_v21 = vand.u32 2147483647, %v4744_v15  ;;  %v1495_v23 = vadd.f32 1.0, %v1494_v49  ;;  %vm4876_vm12 = vcmp.lt.f32.partialorder %v1425_v38, 0.0004427343 }
 0x31b   :  { %v3368_v33 = vpop.eup %3367  ;;  %3387 = vlog2.f32 %v1473_v19  ;;  %v1412_v16 = vmul.f32 0.6931472, %v3366_v42  ;;  %v1476_v42 = vmul.f32 -0.5, %v4761_v55  ;;  %v1423_v19 = vadd.f32 1.0, %v1422_v26 }
 0x31c   :  { %v4814_v62 = vpop.eup %3369  ;;  %3389 = vlog2.f32 %v1437_v10  ;;  %v4825_v54 = vmul.f32 0.6931472, %v3368_v33  ;;  %v4831_v10 = vmul.f32 %v4739_v25, %v1468_v43  ;;  %vm4843_vm8 = vcmp.lt.f32.partialorder %v1488_v21, 0.0004427343 }
 0x31d   :  { %v3372_v51 = vpop.eup %3371  ;;  %v1509_v17 = vadd.f32 1.0, %v4814_v62  ;;  %v1418_v12 = vsel %vm4791_vm4, %v4785_v52, %v1412_v16  ;;  %v1497_v25 = vand.u32 2147483647, %v4782_v18  ;;  %v1487_v8 = vmul.f32 %v4744_v15, %v1486_v60 }
 0x31e   :  { %v3374_v36 = vpop.eup %3373  ;;  %v1448_v24 = vmul.f32 0.6931472, %v3372_v51  ;;  %v1504_v51 = vadd.f32 1.0, %v1503_v11  ;;  %v1460_v52 = vmul.f32 %v4731_v32, %v1459_v28  ;;  %v1512_v21 = vmul.f32 -0.5, %v4814_v62 }
 0x31f   :  { %3391 = vlog2.f32 %v1509_v17  ;;  %v3376_v33 = vpop.eup %3375  ;;  %v4841_v2 = vmul.f32 0.6931472, %v3374_v36  ;;  %v1477_v36 = vadd.f32 1.0, %v1476_v42  ;;  %v1440_v11 = vmul.f32 -0.5, %v4766_v29 }
 0x320   :  { %3393 = vlog2.f32 %v1383_v41  ;;  %v1401_v41 = vadd.f32 1.0, %v4797_v20  ;;  %v1454_v45 = vsel %vm4808_vm6, %v1451_v31, %v1448_v24  ;;  %v6379_v26 = vmax.f32 %v4669_v46, 0.0 }
 0x321   :  { %v3378_v43 = vpop.eup %3377  ;;  %v4861_v49 = vmul.f32 %v4754_v5, %v1504_v51  ;;  %v1457_v15 = vmul.f32 0.6931472, %v3376_v33  ;;  %vm4867_vm10 = vcmp.lt.f32.partialorder %v1497_v25, 0.0004427343  ;;  %vm4871_vm11 = vcmp.lt.f32.partialorder %v1479_v48, 0.0004427343 }
 0x322   :  { %v3380_v16 = vpop.eup %3379  ;;  %3395 = vlog2.f32 %v1401_v41  ;;  %v4858_v0 = vadd.f32 %v1418_v12, %v6379_v26  ;;  %v1484_v9 = vmul.f32 0.6931472, %v3378_v43  ;;  %v1424_v46 = vmul.f32 %v4749_v39, %v1423_v19 }
 0x323   :  { %v3382_v40 = vpop.eup %3381  ;;  %v1386_v30 = vmul.f32 -0.5, %v4789_v35  ;;  %v6388_v60 = vmax.f32 %v4676_v56, 0.0  ;;  %vm4883_vm14 = vcmp.lt.f32.partialorder %v1470_v7, 0.0004427343  ;;  %v1496_v12 = vmul.f32 %v4782_v18, %v1495_v23  ;;  %v6415_v56 = vld [vmem:[#allocation23_spill] sm:$0xff] }
 0x324   :  { %v3384_v24 = vpop.eup %3383  ;;  %v1515_v51 = vand.u32 2147483647, %v4814_v62  ;;  %v1478_v39 = vmul.f32 %v4761_v55, %v1477_v36  ;;  %v1513_v43 = vadd.f32 1.0, %v1512_v21  ;;  %v1421_v25 = vmul.f32 0.6931472, %v3382_v40 }
 0x325   :  { %v1526_v42 = vadd.f32 %v1454_v45, %v6388_v60  ;;  %v1441_v48 = vadd.f32 1.0, %v1440_v11  ;;  %v6391_v41 = vand.u32 2147483647, %v4726_v58  ;;  %v1466_v7 = vmul.f32 0.6931472, %v3380_v16  ;;  %v1536_v16 = vld [vmem:[%s6142_s7 + $0x10] sm:$0xff] }
 0x326   :  { %v1490_v45 = vsel %vm4843_vm8, %v1487_v8, %v1484_v9  ;;  %v1463_v23 = vsel %vm4834_vm7, %v1460_v52, %v1457_v15  ;;  %v1389_v18 = vand.u32 2147483647, %v4789_v35  ;;  %v1502_v36 = vmul.f32 0.6931472, %v3384_v24 }
 0x327   :  { %v3386_v5 = vpop.eup %3385  ;;  %vm4892_vm15 = vcmp.lt.f32.partialorder %v6391_v41, 0.0004427343  ;;  %v1387_v21 = vadd.f32 1.0, %v1386_v30  ;;  %v1404_v58 = vmul.f32 -0.5, %v4797_v20  ;;  %v6394_v11 = vmax.f32 %v4707_v13, 0.0 }
 0x328   :  { %v3388_v38 = vpop.eup %3387  ;;  %v1493_v19 = vmul.f32 0.6931472, %v3386_v5  ;;  %vm4906_vm0 = vcmp.lt.f32.partialorder %v1515_v51, 0.0004427343  ;;  %v1443_v57 = vand.u32 2147483647, %v4766_v29  ;;  %v1514_v15 = vmul.f32 %v4814_v62, %v1513_v43 }
 0x329   :  { %v3390_v55 = vpop.eup %3389  ;;  %v1475_v8 = vmul.f32 0.6931472, %v3388_v38  ;;  %v6397_v17 = vmax.f32 %v4695_v50, 0.0  ;;  %v1427_v24 = vsel %vm4876_vm12, %v1424_v46, %v1421_v25  ;;  %v1442_v14 = vmul.f32 %v4766_v29, %v1441_v48 }
 0x32a   :  { %v1499_v40 = vsel %vm4867_vm10, %v1496_v12, %v1493_v19  ;;  %v6398_v5 = vmax.f32 %v4683_v34, 0.0  ;;  %v1439_v12 = vmul.f32 0.6931472, %v3390_v55  ;;  %vm4919_vm1 = vcmp.lt.f32.partialorder %v1389_v18, 0.0004427343 }
 0x32b   :  { %v1531_v26 = vadd.f32 %v1499_v40, %v6394_v11  ;;  %v1530_v52 = vadd.f32 %v1490_v45, %v6397_v17  ;;  %v1508_v62 = vsel %vm4863_vm9, %v4861_v49, %v1502_v36  ;;  %v1388_v46 = vmul.f32 %v4789_v35, %v1387_v21  ;;  %v1534_v45 = vld [vmem:[%s6142_s7] sm:$0xff] }
 0x32c   :  { %v3392_v9 = vpop.eup %3391  ;;  %v1527_v60 = vadd.f32 %v1463_v23, %v6398_v5  ;;  %v1405_v29 = vadd.f32 1.0, %v1404_v58  ;;  %v1481_v34 = vsel %vm4871_vm11, %v1478_v39, %v1475_v8  ;;  %v6401_v38 = vmax.f32 %v4678_v22, 0.0  ;;  %v1537_v8 = vld [vmem:[%s6142_s7 + $0x18] sm:$0xff] }
 0x32d   :  { %v3394_v13 = vpop.eup %3393  ;;  %1598 = vmatprep.subr.mxu0 %v1531_v26  ;;  %v1511_v30 = vmul.f32 0.6931472, %v3392_v9  ;;  %v1407_v43 = vand.u32 2147483647, %v4797_v20  ;;  %v1472_v49 = vsel %vm4883_vm14, %v4831_v10, %v1466_v7  ;;  %v6402_v32 = vmax.f32 %v4715_v53, 0.0  ;;  %v5011_v9 = vpop.permute.xlu0 %1559 }
 0x32e   :  { %1599 = vmatpush1.msra.mxu0 %v1530_v52  ;;  %v1385_v50 = vmul.f32 0.6931472, %v3394_v13  ;;  %v1523_v19 = vadd.f32 %v1427_v24, %v6401_v38  ;;  %vm4939_vm3 = vcmp.lt.f32.partialorder %v1443_v57, 0.0004427343  ;;  %v6405_v22 = vmax.f32 %v4664_v63, 0.0  ;;  %v1555_v57 = vpop.permute.xlu1 %1554  ;;  %v6422_v38 = vld [vmem:[#allocation18_spill] sm:$0xff] }
 0x32f   :  { %v1517_v28 = vsel %vm4906_vm0, %v1514_v15, %v1511_v30  ;;  %1600 = vmatprep.subr.mxu0 %v1527_v60  ;;  %v3396_v39 = vpop.eup %3395  ;;  %v6406_v33 = vsel %vm4768_vm2, %v4775_v3, %v4804_v47  ;;  %v6407_v53 = vmax.f32 %v4701_v1, 0.0  ;;  %v6408_v41 = vmax.f32 %v4692_v59, 0.0 }
 0x330   :  { %v1533_v35 = vadd.f32 %v1517_v28, %v6402_v32  ;;  %1601 = vmatpush1.msra.mxu0 %v1526_v42  ;;  %v1391_v31 = vsel %vm4919_vm1, %v1388_v46, %v1385_v50  ;;  %v1518_v10 = vadd.f32 %v6406_v33, %v6405_v22  ;;  %v1445_v42 = vsel %vm4939_vm3, %v1442_v14, %v1439_v12  ;;  %v6420_v14 = vld [vmem:[#allocation16_spill] sm:$0xff] }
 0x331   :  { %v1532_v48 = vadd.f32 %v1508_v62, %v6407_v53  ;;  %1602 = vmatprep.subr.mxu0 %v1523_v19  ;;  %v1519_v7 = vadd.f32 %v1391_v31, %v6408_v41  ;;  %v1436_v63 = vsel %vm4892_vm15, %v4800_v4, %v4841_v2  ;;  %v1529_v47 = vadd.f32 %v1481_v34, %v6409_v27  ;;  %v1550_v30 = vpop.permute.xlu0 %1549 }
 0x332   :  { %1687 = vmatprep.subr.mxu1 %v1533_v35  ;;  %1603 = vmatpush1.msra.mxu0 %v4858_v0  ;;  %v1403_v1 = vmul.f32 0.6931472, %v3396_v39  ;;  %v1406_v3 = vmul.f32 %v4797_v20, %v1405_v29  ;;  %v6410_v59 = vand.u32 2147483647, %v4720_v37  ;;  %v1300_v4 = vmax.f32 %v4672_v6, 0.0  ;;  %v6414_v0 = vld [vmem:[#allocation21_spill] sm:$0xff]  ;;  %v1545_v17 = vpop.permute.xlu1 %1544 }
 0x333   :  { %v1528_v2 = vadd.f32 %v1472_v49, %v6413_v61  ;;  %1688 = vmatpush1.msra.mxu1 %v1532_v48  ;;  %1604 = vmatprep.subr.mxu0 %v1519_v7  ;;  %vm1408_vm2 = vcmp.lt.f32.partialorder %v1407_v43, 0.0004427343  ;;  %v1297_v18 = vmax.f32 %v6415_v56, 0.0  ;;  %v6416_v37 = vld [vmem:[#allocation20_spill] sm:$0xff]  ;;  %v6418_v6 = vld [vmem:[#allocation19_spill] sm:$0xff]  ;;  %v6419_v11 = vmov 0.0  }
 0x334   :  { %vm4971_vm5 = vcmp.lt.f32.partialorder %v6410_v59, 0.0004427343  ;;  %1689 = vmatprep.subr.mxu1 %v1529_v47  ;;  %v6417_v55 = vmax.f32 %v6416_v37, 0.0  ;;  %v1409_v40 = vsel %vm1408_vm2, %v1406_v3, %v1403_v1  ;;  %1605 = vmatpush1.msra.mxu0 %v1518_v10  ;;  %v1296_v21 = vmax.f32 %v6418_v6, 0.0  ;;  %v6421_v29 = vld [vmem:[#allocation7_spill] sm:$0xff]  ;;  %v6423_v39 = vld [vmem:[#allocation13_spill] sm:$0xff] }
 0x335   :  { %v1400_v20 = vsel %vm4971_vm5, %v6414_v0, %v4825_v54  ;;  %v1524_v44 = vadd.f32 %v1436_v63, %v1300_v4  ;;  %1690 = vmatpush1.msra.mxu1 %v1528_v2  ;;  %3156 = vmatmul.mubr.msk.f32.vlgmr.msra.gmra.mxu0 %vm629_vm13, %v1534_v45  ;;  %v1521_v58 = vadd.f32 %v1409_v40, %v1297_v18  ;;  %v1535_v54 = vld [vmem:[%s6142_s7 + $0x8] sm:$0xff]  ;;  %v6424_v48 = vld [vmem:[#allocation17_spill] sm:$0xff]  ;;  %v6425_v4 = vld [vmem:[#allocation22_spill] sm:$0xff] }
 0x336   :  { %v1525_v36 = vadd.f32 %v1445_v42, %v6417_v55  ;;  %1644 = vmatprep.mubr.f32.mxu0 %v6419_v11  ;;  %v1520_v26 = vadd.f32 %v1400_v20, %v1296_v21  ;;  %v6426_v0 = vld [vmem:[#allocation12_spill] sm:$0xff] }
 0x338   :  { %1691 = vmatprep.subr.mxu1 %v1525_v36 }
 0x339   :  { %1692 = vmatpush1.msra.mxu1 %v1524_v44  ;;  %3157 = vmatmul.mubr.msk.f32.gmra.mxu0 %vm629_vm13, %v1535_v54 }
 0x33a   :  { %1693 = vmatprep.subr.mxu1 %v1521_v58  ;;  %1650 = vmatprep.mubr.f32.mxu0 %v6419_v11  ;;  %v6427_v58 = vld [vmem:[#allocation6_spill] sm:$0xff] }
 0x33b   :  { %1694 = vmatpush1.msra.mxu1 %v1520_v26 }
 0x33c   :  { %3160 = vmatmul.mubr.msk.f32.vlgmr.msra.gmra.mxu1 %vm629_vm13, %v1534_v45 }
 0x33d   :  { %1733 = vmatprep.mubr.f32.mxu1 %v6419_v11  ;;  %3158 = vmatmul.mubr.msk.f32.gmra.mxu0 %vm629_vm13, %v1536_v16 }
 0x33e   :  { %1656 = vmatprep.mubr.f32.mxu0 %v6419_v11 }
 0x340   :  { %3161 = vmatmul.mubr.msk.f32.gmra.mxu1 %vm629_vm13, %v1535_v54 }
 0x341   :  { %1739 = vmatprep.mubr.f32.mxu1 %v6419_v11  ;;  %3159 = vmatmul.mubr.msk.f32.gmra.mxu0 %vm629_vm13, %v1537_v8 }
 0x342   :  { %2114 = vmatprep.mubr.f32.mxu0 %v6419_v11 }
 0x344   :  { %3162 = vmatmul.mubr.msk.f32.gmra.mxu1 %vm629_vm13, %v1536_v16 }
 0x345   :  { %1745 = vmatprep.mubr.f32.mxu1 %v6419_v11 }
 0x348   :  { %3163 = vmatmul.mubr.msk.f32.gmra.mxu1 %vm629_vm13, %v1537_v8 }
 0x349   :  { %2203 = vmatprep.mubr.f32.mxu1 %v6419_v11 }
 0x3f5   :  { %v1640_v52 = vpop.f32.mrf.mxu0 }
 0x3f6   :  { %v1641_v15 = vadd.f32 %v1640_v52, %v1545_v17  ;;  %v6428_v52 = vld [vmem:[#allocation11_spill] sm:$0xff] }
 0x3f7   :  { %v1642_v24 = vpop.f32.mrf.mxu0 }
 0x3f8   :  { %v5014_v13 = vadd.f32 %v1641_v15, %v6420_v14  ;;  %v1643_v37 = vadd.f32 %v1642_v24, %v1545_v17  ;;  %v6429_v24 = vld [vmem:[#allocation15_spill] sm:$0xff] }
 0x3f9   :  { %v1646_v5 = vpop.f32.mrf.mxu0 }
 0x3fa   :  { %v1784_v60 = vand.u32 2147483647, %v5014_v13  ;;  %v1647_v51 = vadd.f32 %v1646_v5, %v1550_v30  ;;  %v5049_v14 = vadd.f32 %v1643_v37, %v6429_v24 }
 0x3fb   :  { %v1648_v50 = vpop.f32.mrf.mxu0 }
 0x3fc   :  { %v1729_v12 = vpop.f32.mrf.mxu1  ;;  %v5018_v28 = vadd.f32 %v1647_v51, %v6421_v29  ;;  %v1800_v34 = vsub.f32 0.0, %v1784_v60  ;;  %v1649_v43 = vadd.f32 %v1648_v50, %v1550_v30  ;;  %v6430_v60 = vld [vmem:[#allocation14_spill] sm:$0xff]  ;;  %v6432_v29 = vld [vmem:[#allocation8_spill] sm:$0xff] }
 0x3fd   :  { %v1730_v62 = vadd.f32 %v1729_v12, %v1545_v17  ;;  %v1652_v25 = vpop.f32.mrf.mxu0 }
 0x3fe   :  { %v1731_v46 = vpop.f32.mrf.mxu1  ;;  %v1788_v49 = vand.u32 2147483647, %v5018_v28  ;;  %v5025_v22 = vadd.f32 %v1649_v43, %v6423_v39  ;;  %v1816_v10 = vmul.f32 1.442695, %v1800_v34  ;;  %v1653_v1 = vadd.f32 %v1652_v25, %v1555_v57 }
 0x3ff   :  { %v5021_v19 = vadd.f32 %v1730_v62, %v6422_v38  ;;  %v1654_v27 = vpop.f32.mrf.mxu0  ;;  %v1732_v16 = vadd.f32 %v1731_v46, %v1545_v17  ;;  %v6431_v62 = vld [vmem:[#allocation5_spill] sm:$0xff] }
 0x400   :  { %v1735_v32 = vpop.f32.mrf.mxu1  ;;  %v1804_v31 = vsub.f32 0.0, %v1788_v49  ;;  %v1789_v47 = vand.u32 2147483647, %v5025_v22  ;;  %3397 = vpow2.f32 %v1816_v10  ;;  %v5034_v61 = vadd.f32 %v1653_v1, %v6425_v4  ;;  %v6433_v10 = vld [vmem:[#allocation10_spill] sm:$0xff] }
 0x401   :  { %v1736_v35 = vadd.f32 %v1735_v32, %v1550_v30  ;;  %v1786_v53 = vand.u32 2147483647, %v5021_v19  ;;  %v1655_v2 = vadd.f32 %v1654_v27, %v1555_v57  ;;  %v1658_v18 = vpop.f32.mrf.mxu0  ;;  %v5060_v34 = vadd.f32 %v1732_v16, %v6432_v29 }
 0x402   :  { %v1737_v33 = vpop.f32.mrf.mxu1  ;;  %v1824_v41 = vmul.f32 1.442695, %v1804_v31  ;;  %v1805_v55 = vsub.f32 0.0, %v1789_v47  ;;  %v1792_v6 = vand.u32 2147483647, %v5034_v61  ;;  %v1659_v26 = vadd.f32 %v1658_v18, %v5011_v9  ;;  %v6434_v18 = vld [vmem:[#allocation24_spill] sm:$0xff] }
 0x403   :  { %v5029_v42 = vadd.f32 %v1736_v35, %v6424_v48  ;;  %v1802_v45 = vsub.f32 0.0, %v1786_v53  ;;  %v1738_v40 = vadd.f32 %v1737_v33, %v1550_v30  ;;  %v5042_v54 = vadd.f32 %v1655_v2, %v6427_v58  ;;  %v1660_v31 = vpop.f32.mrf.mxu0  ;;  %v6435_v58 = vld [vmem:[#allocation9_spill] sm:$0xff] }
 0x404   :  { %v1741_v7 = vpop.f32.mrf.mxu1  ;;  %3399 = vpow2.f32 %v1824_v41  ;;  %v1808_v8 = vsub.f32 0.0, %v1792_v6  ;;  %v1826_v30 = vmul.f32 1.442695, %v1805_v55  ;;  %v5056_v50 = vadd.f32 %v1659_v26, %v6431_v62 }
 0x405   :  { %v1790_v63 = vand.u32 2147483647, %v5029_v42  ;;  %v1742_v59 = vadd.f32 %v1741_v7, %v1555_v57  ;;  %v1820_v36 = vmul.f32 1.442695, %v1802_v45  ;;  %v1793_v5 = vand.u32 2147483647, %v5042_v54 }
 0x406   :  { %v1743_v3 = vpop.f32.mrf.mxu1  ;;  %v5053_v12 = vadd.f32 %v1738_v40, %v6430_v60  ;;  %v1832_v17 = vmul.f32 1.442695, %v1808_v8  ;;  %v1796_v49 = vand.u32 2147483647, %v5056_v50  ;;  %v1785_v32 = vand.u32 2147483647, %v5049_v14 }
 0x407   :  { %v1806_v23 = vsub.f32 0.0, %v1790_v63  ;;  %v5037_v20 = vadd.f32 %v1742_v59, %v6426_v0  ;;  %v1744_v56 = vadd.f32 %v1743_v3, %v1555_v57  ;;  %3401 = vpow2.f32 %v1820_v36 }
 0x408   :  { %v1747_v57 = vpop.f32.mrf.mxu1  ;;  %v1809_v38 = vsub.f32 0.0, %v1793_v5  ;;  %v1791_v35 = vand.u32 2147483647, %v5053_v12  ;;  %v1787_v41 = vand.u32 2147483647, %v5060_v34  ;;  %v1812_v63 = vsub.f32 0.0, %v1796_v49 }
 0x409   :  { %v1794_v21 = vand.u32 2147483647, %v5037_v20  ;;  %v1828_v44 = vmul.f32 1.442695, %v1806_v23  ;;  %v5046_v15 = vadd.f32 %v1744_v56, %v6428_v52  ;;  %v1748_v46 = vadd.f32 %v1747_v57, %v5011_v9 }
 0x40a   :  { %v1834_v33 = vmul.f32 1.442695, %v1809_v38  ;;  %v1661_v27 = vadd.f32 %v1660_v31, %v5011_v9  ;;  %v1801_v1 = vsub.f32 0.0, %v1785_v32  ;;  %v1807_v3 = vsub.f32 0.0, %v1791_v35  ;;  %v1749_v45 = vpop.f32.mrf.mxu1 }
 0x40b   :  { %v1810_v51 = vsub.f32 0.0, %v1794_v21  ;;  %3403 = vpow2.f32 %v1828_v44  ;;  %v1795_v43 = vand.u32 2147483647, %v5046_v15  ;;  %v5069_v53 = vadd.f32 %v1748_v46, %v6433_v10 }
 0x40c   :  { %3405 = vpow2.f32 %v1826_v30  ;;  %v1840_v23 = vmul.f32 1.442695, %v1812_v63  ;;  %v1803_v2 = vsub.f32 0.0, %v1787_v41  ;;  %v5079_v37 = vadd.f32 %v1661_v27, %v6434_v18 }
 0x40d   :  { %v1836_v25 = vmul.f32 1.442695, %v1810_v51  ;;  %v5066_v39 = vpop.eup %3397  ;;  %3407 = vpow2.f32 %v1832_v17  ;;  %v1811_v7 = vsub.f32 0.0, %v1795_v43  ;;  %v1798_v4 = vand.u32 2147483647, %v5069_v53 }
 0x40e   :  { %v1848_v47 = vadd.f32 1.0, %v5066_v39  ;;  %v1750_v55 = vadd.f32 %v1749_v45, %v5011_v9  ;;  %v1818_v36 = vmul.f32 1.442695, %v1801_v1  ;;  %v1830_v40 = vmul.f32 1.442695, %v1807_v3 }
 0x40f   :  { %3409 = vpow2.f32 %v1836_v25  ;;  %v1838_v0 = vmul.f32 1.442695, %v1811_v7  ;;  %v1814_v56 = vsub.f32 0.0, %v1798_v4  ;;  %v1797_v44 = vand.u32 2147483647, %v5079_v37 }
 0x410   :  { %3411 = vpow2.f32 %v1834_v33  ;;  %v5086_v26 = vadd.f32 %v1750_v55, %v6435_v58  ;;  %v1822_v8 = vmul.f32 1.442695, %v1803_v2  ;;  %v1851_v17 = vmul.f32 -0.5, %v5066_v39 }
 0x411   :  { %v5071_v48 = vpop.eup %3399  ;;  %3413 = vpow2.f32 %v1840_v23  ;;  %v1844_v21 = vmul.f32 1.442695, %v1814_v56  ;;  %v1813_v52 = vsub.f32 0.0, %v1797_v44  ;;  %v1772_v38 = vmax.f32 %v5018_v28, 0.0 }
 0x412   :  { %v1884_v59 = vadd.f32 1.0, %v5071_v48  ;;  %3415 = vlog2.f32 %v1848_v47  ;;  %v1799_v9 = vand.u32 2147483647, %v5086_v26  ;;  %v1887_v43 = vmul.f32 -0.5, %v5071_v48 }
 0x413   :  { %v1842_v5 = vmul.f32 1.442695, %v1813_v52  ;;  %v1854_v10 = vand.u32 2147483647, %v5066_v39  ;;  %v1852_v63 = vadd.f32 1.0, %v1851_v17  ;;  %v1770_v55 = vmax.f32 %v5021_v19, 0.0 }
 0x414   :  { %v5082_v6 = vpop.eup %3401  ;;  %3417 = vlog2.f32 %v1884_v59  ;;  %v1815_v60 = vsub.f32 0.0, %v1799_v9  ;;  %v1890_v27 = vand.u32 2147483647, %v5071_v48  ;;  %v1888_v3 = vadd.f32 1.0, %v1887_v43 }
 0x415   :  { %3419 = vpow2.f32 %v1838_v0  ;;  %v1866_v24 = vadd.f32 1.0, %v5082_v6  ;;  %v1869_v35 = vmul.f32 -0.5, %v5082_v6  ;;  %vm5122_vm4 = vcmp.lt.f32.partialorder %v1854_v10, 0.0004427343 }
 0x416   :  { %3421 = vpow2.f32 %v1844_v21  ;;  %v1846_v49 = vmul.f32 1.442695, %v1815_v60  ;;  %v5132_v58 = vmul.f32 %v5066_v39, %v1852_v63  ;;  %vm5135_vm6 = vcmp.lt.f32.partialorder %v1890_v27, 0.0004427343 }
 0x417   :  { %3423 = vpow2.f32 %v1830_v40  ;;  %v1870_v2 = vadd.f32 1.0, %v1869_v35  ;;  %v6498_v19 = vmov 0.0  }
 0x418   :  { %v5088_v16 = vpop.eup %3403  ;;  %3425 = vpow2.f32 %v1818_v36 }
 0x419   :  { %v5091_v57 = vpop.eup %3405  ;;  %v1902_v30 = vadd.f32 1.0, %v5088_v16  ;;  %3427 = vpow2.f32 %v1822_v8  ;;  %v1905_v47 = vmul.f32 -0.5, %v5088_v16  ;;  %v5147_v39 = vmul.f32 %v5082_v6, %v1870_v2 }
 0x41a   :  { %v5095_v51 = vpop.eup %3407  ;;  %3429 = vpow2.f32 %v1842_v5  ;;  %v1893_v29 = vadd.f32 1.0, %v5091_v57 }
 0x41b   :  { %3431 = vlog2.f32 %v1866_v24  ;;  %v1920_v31 = vadd.f32 1.0, %v5095_v51  ;;  %v1906_v9 = vadd.f32 1.0, %v1905_v47  ;;  %v1923_v5 = vmul.f32 -0.5, %v5095_v51 }
 0x41c   :  { %v5103_v32 = vpop.eup %3409  ;;  %3433 = vlog2.f32 %v1902_v30  ;;  %v1889_v30 = vmul.f32 %v5071_v48, %v1888_v3 }
 0x41d   :  { %v5108_v33 = vpop.eup %3411  ;;  %3435 = vpow2.f32 %v1846_v49  ;;  %v1938_v23 = vadd.f32 1.0, %v5103_v32  ;;  %v5160_v27 = vmul.f32 %v5088_v16, %v1906_v9  ;;  %v1924_v2 = vadd.f32 1.0, %v1923_v5 }
 0x41e   :  { %3437 = vlog2.f32 %v1893_v29  ;;  %v5115_v1 = vpop.eup %3413  ;;  %v1929_v56 = vadd.f32 1.0, %v5108_v33  ;;  %v1941_v29 = vmul.f32 -0.5, %v5103_v32  ;;  %v1932_v59 = vmul.f32 -0.5, %v5108_v33 }
 0x41f   :  { %v3416_v4 = vpop.eup %3415  ;;  %3439 = vlog2.f32 %v1920_v31  ;;  %v1956_v21 = vadd.f32 1.0, %v5115_v1  ;;  %v1896_v31 = vmul.f32 -0.5, %v5091_v57  ;;  %v1959_v36 = vmul.f32 -0.5, %v5115_v1 }
 0x420   :  { %3441 = vlog2.f32 %v1938_v23  ;;  %v5157_v63 = vmul.f32 0.6931472, %v3416_v4  ;;  %v1942_v7 = vadd.f32 1.0, %v1941_v29  ;;  %v1925_v52 = vmul.f32 %v5095_v51, %v1924_v2 }
 0x421   :  { %v3418_v18 = vpop.eup %3417  ;;  %3443 = vlog2.f32 %v1929_v56  ;;  %v1926_v56 = vand.u32 2147483647, %v5095_v51  ;;  %v1897_v5 = vadd.f32 1.0, %v1896_v31  ;;  %v1935_v51 = vand.u32 2147483647, %v5108_v33 }
 0x422   :  { %v5129_v44 = vpop.eup %3419  ;;  %v1886_v35 = vmul.f32 0.6931472, %v3418_v18  ;;  %3445 = vlog2.f32 %v1956_v21  ;;  %v1899_v18 = vand.u32 2147483647, %v5091_v57  ;;  %v1962_v4 = vand.u32 2147483647, %v5115_v1 }
 0x423   :  { %v5139_v24 = vpop.eup %3421  ;;  %v1947_v48 = vadd.f32 1.0, %v5129_v44  ;;  %vm5183_vm7 = vcmp.lt.f32.partialorder %v1926_v56, 0.0004427343  ;;  %v1933_v0 = vadd.f32 1.0, %v1932_v59  ;;  %vm5213_vm9 = vcmp.lt.f32.partialorder %v1935_v51, 0.0004427343 }
 0x424   :  { %v5144_v17 = vpop.eup %3423  ;;  %v1974_v43 = vadd.f32 1.0, %v5139_v24  ;;  %v1892_v46 = vsel %vm5135_vm6, %v1889_v30, %v1886_v35  ;;  %v1977_v28 = vmul.f32 -0.5, %v5139_v24  ;;  %v1980_v59 = vand.u32 2147483647, %v5139_v24 }
 0x425   :  { %v5151_v49 = vpop.eup %3425  ;;  %v1911_v21 = vadd.f32 1.0, %v5144_v17  ;;  %v5193_v29 = vadd.f32 %v1892_v46, %v1772_v38  ;;  %vm5218_vm10 = vcmp.lt.f32.partialorder %v1899_v18, 0.0004427343  ;;  %vm5223_vm11 = vcmp.lt.f32.partialorder %v1962_v4, 0.0004427343 }
 0x426   :  { %v5155_v10 = vpop.eup %3427  ;;  %3447 = vlog2.f32 %v1974_v43  ;;  %v1944_v43 = vand.u32 2147483647, %v5103_v32  ;;  %v1857_v38 = vadd.f32 1.0, %v5151_v49  ;;  %v1978_v51 = vadd.f32 1.0, %v1977_v28 }
 0x427   :  { %v5164_v23 = vpop.eup %3429  ;;  %3449 = vlog2.f32 %v1947_v48  ;;  %v1950_v48 = vmul.f32 -0.5, %v5129_v44  ;;  %6442 = vst [vmem:[#allocation26_spill] sm:$0xff] %v5193_v29  ;;  %v1875_v40 = vadd.f32 1.0, %v5155_v10  ;;  %vm5239_vm12 = vcmp.lt.f32.partialorder %v1980_v59, 0.0004427343 }
 0x428   :  { %v3432_v41 = vpop.eup %3431  ;;  %v1965_v9 = vadd.f32 1.0, %v5164_v23  ;;  %vm5202_vm8 = vcmp.lt.f32.partialorder %v1944_v43, 0.0004427343  ;;  %v1968_v43 = vmul.f32 -0.5, %v5164_v23  ;;  %v1860_v59 = vmul.f32 -0.5, %v5151_v49 }
 0x429   :  { %v3434_v62 = vpop.eup %3433  ;;  %v5189_v31 = vmul.f32 0.6931472, %v3432_v41  ;;  %v1960_v41 = vadd.f32 1.0, %v1959_v36 }
 0x42a   :  { %v5174_v8 = vpop.eup %3435  ;;  %3451 = vlog2.f32 %v1965_v9  ;;  %v5196_v9 = vmul.f32 %v5103_v32, %v1942_v7  ;;  %v5199_v56 = vmul.f32 0.6931472, %v3434_v62  ;;  %v1951_v32 = vadd.f32 1.0, %v1950_v48 }
 0x42b   :  { %v3438_v60 = vpop.eup %3437  ;;  %v1983_v35 = vadd.f32 1.0, %v5174_v8  ;;  %3453 = vlog2.f32 %v1911_v21  ;;  %v1953_v7 = vand.u32 2147483647, %v5129_v44  ;;  %v1898_v62 = vmul.f32 %v5091_v57, %v1897_v5 }
 0x42c   :  { %v3440_v2 = vpop.eup %3439  ;;  %v1895_v46 = vmul.f32 0.6931472, %v3438_v60  ;;  %v1934_v48 = vmul.f32 %v5108_v33, %v1933_v0  ;;  %v1914_v57 = vmul.f32 -0.5, %v5144_v17  ;;  %v1986_v47 = vmul.f32 -0.5, %v5174_v8 }
 0x42d   :  { %3455 = vlog2.f32 %v1983_v35  ;;  %v3442_v3 = vpop.eup %3441  ;;  %v1922_v35 = vmul.f32 0.6931472, %v3440_v2  ;;  %v1961_v33 = vmul.f32 %v5115_v1, %v1960_v41  ;;  %v1971_v0 = vand.u32 2147483647, %v5164_v23 }
 0x42e   :  { %3457 = vlog2.f32 %v1857_v38  ;;  %v3444_v60 = vpop.eup %3443  ;;  %v1901_v38 = vsel %vm5218_vm10, %v1898_v62, %v1895_v46  ;;  %v5230_v25 = vmul.f32 0.6931472, %v3442_v3  ;;  %v5235_v18 = vmul.f32 %v5129_v44, %v1951_v32 }
 0x42f   :  { %3459 = vlog2.f32 %v1875_v40  ;;  %v3446_v5 = vpop.eup %3445  ;;  %v1928_v40 = vsel %vm5183_vm7, %v1925_v52, %v1922_v35  ;;  %v1969_v28 = vadd.f32 1.0, %v1968_v43  ;;  %vm5243_vm14 = vcmp.lt.f32.partialorder %v1953_v7, 0.0004427343 }
 0x430   :  { %v1958_v46 = vmul.f32 0.6931472, %v3446_v5  ;;  %v1931_v1 = vmul.f32 0.6931472, %v3444_v60  ;;  %v6455_v41 = vmax.f32 %v5025_v22, 0.0  ;;  %v1915_v44 = vadd.f32 1.0, %v1914_v57 }
 0x431   :  { %v1979_v52 = vmul.f32 %v5139_v24, %v1978_v51  ;;  %v1987_v30 = vadd.f32 1.0, %v1986_v47  ;;  %v1917_v35 = vand.u32 2147483647, %v5144_v17  ;;  %v6457_v43 = vand.u32 2147483647, %v5088_v16 }
 0x432   :  { %v5249_v62 = vadd.f32 %v1901_v38, %v6455_v41  ;;  %v6460_v22 = vmax.f32 %v5034_v61, 0.0  ;;  %v1946_v24 = vsel %vm5202_vm8, %v5196_v9, %v5230_v25  ;;  %vm5268_vm0 = vcmp.lt.f32.partialorder %v1971_v0, 0.0004427343 }
 0x433   :  { %v3448_v3 = vpop.eup %3447  ;;  %vm5256_vm15 = vcmp.lt.f32.partialorder %v6457_v43, 0.0004427343  ;;  %v1878_v57 = vmul.f32 -0.5, %v5155_v10  ;;  %v1970_v38 = vmul.f32 %v5164_v23, %v1969_v28  ;;  %v1989_v61 = vand.u32 2147483647, %v5174_v8 }
 0x434   :  { %6456 = vst [vmem:[#allocation25_spill] sm:$0xff] %v5249_v62  ;;  %v3450_v32 = vpop.eup %3449  ;;  %v5262_v60 = vadd.f32 %v1928_v40, %v6460_v22  ;;  %v1976_v5 = vmul.f32 0.6931472, %v3448_v3  ;;  %v1964_v40 = vsel %vm5223_vm11, %v1961_v33, %v1958_v46  ;;  %v1937_v21 = vsel %vm5213_vm9, %v1934_v48, %v1931_v1 }
 0x435   :  { %v1949_v25 = vmul.f32 0.6931472, %v3450_v32  ;;  %v1916_v9 = vmul.f32 %v5144_v17, %v1915_v44  ;;  %v1988_v3 = vmul.f32 %v5174_v8, %v1987_v30  ;;  %v1863_v23 = vand.u32 2147483647, %v5151_v49 }
 0x436   :  { %6461 = vst [vmem:[#allocation21_spill] sm:$0xff] %v5262_v60  ;;  %v6464_v28 = vmax.f32 %v5079_v37, 0.0  ;;  %v1879_v36 = vadd.f32 1.0, %v1878_v57  ;;  %v6466_v48 = vmax.f32 %v5056_v50, 0.0  ;;  %v1982_v17 = vsel %vm5239_vm12, %v1979_v52, %v1976_v5 }
 0x437   :  { %v3452_v7 = vpop.eup %3451  ;;  %vm1990_vm1 = vcmp.lt.f32.partialorder %v1989_v61, 0.0004427343  ;;  %v1881_v8 = vand.u32 2147483647, %v5155_v10  ;;  %v6468_v37 = vmax.f32 %v5042_v54, 0.0  ;;  %v1955_v50 = vsel %vm5243_vm14, %v5235_v18, %v1949_v25 }
 0x438   :  { %v3454_v16 = vpop.eup %3453  ;;  %v1967_v51 = vmul.f32 0.6931472, %v3452_v7  ;;  %v1861_v7 = vadd.f32 1.0, %v1860_v59  ;;  %v5290_v46 = vadd.f32 %v1964_v40, %v6466_v48  ;;  %vm5303_vm3 = vcmp.lt.f32.partialorder %v1917_v35, 0.0004427343 }
 0x439   :  { %v1913_v33 = vmul.f32 0.6931472, %v3454_v16  ;;  %v5298_v32 = vadd.f32 %v1937_v21, %v6468_v37  ;;  %v6472_v52 = vmax.f32 %v5086_v26, 0.0  ;;  %vm5313_vm5 = vcmp.lt.f32.partialorder %v1863_v23, 0.0004427343 }
 0x43a   :  { %v3456_v0 = vpop.eup %3455  ;;  %v1973_v41 = vsel %vm5268_vm0, %v1970_v38, %v1967_v51  ;;  %6467 = vst [vmem:[#allocation20_spill] sm:$0xff] %v5290_v46  ;;  %v1862_v54 = vmul.f32 %v5151_v49, %v1861_v7  ;;  %v6476_v18 = vmax.f32 %v5069_v53, 0.0  ;;  %v1880_v57 = vmul.f32 %v5155_v10, %v1879_v36 }
 0x43b   :  { %v5286_v43 = vadd.f32 %v1973_v41, %v6464_v28  ;;  %v1985_v2 = vmul.f32 0.6931472, %v3456_v0  ;;  %v3458_v1 = vpop.eup %3457  ;;  %6469 = vst [vmem:[#allocation19_spill] sm:$0xff] %v5298_v32  ;;  %v1919_v26 = vsel %vm5303_vm3, %v1916_v9, %v1913_v33  ;;  %v1910_v49 = vsel %vm5256_vm15, %v5160_v27, %v5199_v56  ;;  %v2031_v9 = vpop.permute.xlu1 %2030 }
 0x43c   :  { %v3460_v4 = vpop.eup %3459  ;;  %v1859_v22 = vmul.f32 0.6931472, %v3458_v1  ;;  %v5319_v45 = vadd.f32 %v1982_v17, %v6476_v18  ;;  %v6478_v16 = vmax.f32 %v5046_v15, 0.0  ;;  %vm5337_vm2 = vcmp.lt.f32.partialorder %v1881_v8, 0.0004427343  ;;  %v5423_v0 = vpop.permute.xlu0 %2035 }
 0x43d   :  { %6465 = vst [vmem:[#allocation23_spill] sm:$0xff] %v5286_v43  ;;  %2074 = vmatprep.subr.mxu0 %v5286_v43  ;;  %v1991_v44 = vsel %vm1990_vm1, %v1988_v3, %v1985_v2  ;;  %v1877_v35 = vmul.f32 0.6931472, %v3460_v4  ;;  %v6482_v10 = vand.u32 2147483647, %v5082_v6  ;;  %v6485_v27 = vmax.f32 %v5037_v20, 0.0 }
 0x43e   :  { %v5309_v59 = vadd.f32 %v1991_v44, %v6472_v52  ;;  %2075 = vmatpush1.msra.mxu0 %v5290_v46  ;;  %6477 = vst [vmem:[#allocation7_spill] sm:$0xff] %v5319_v45  ;;  %v5332_v53 = vadd.f32 %v1955_v50, %v6478_v16  ;;  %v1865_v5 = vsel %vm5313_vm5, %v1862_v54, %v1859_v22  ;;  %v6487_v56 = vmax.f32 %v5049_v14, 0.0 }
 0x43f   :  { %2076 = vmatprep.subr.mxu0 %v5298_v32  ;;  %vm5343_vm6 = vcmp.lt.f32.partialorder %v6482_v10, 0.0004427343  ;;  %v5349_v15 = vadd.f32 %v1946_v24, %v6485_v27  ;;  %v1883_v61 = vsel %vm5337_vm2, %v1880_v57, %v1877_v35  ;;  %v6489_v6 = vmax.f32 %v5014_v13, 0.0  ;;  %v3164_v13 = vld [vmem:[%s6140_s5 + $0x20] sm:$0xff]  ;;  %v2021_v41 = vpop.permute.xlu1 %2020 }
 0x440   :  { %6473 = vst [vmem:[#allocation16_spill] sm:$0xff] %v5309_v59  ;;  %2163 = vmatprep.subr.mxu1 %v5309_v59  ;;  %6479 = vst [vmem:[#allocation18_spill] sm:$0xff] %v5332_v53  ;;  %2077 = vmatpush1.msra.mxu0 %v5262_v60  ;;  %v5355_v38 = vadd.f32 %v1865_v5, %v6487_v56  ;;  %v6490_v20 = vsel %vm5122_vm4, %v5132_v58, %v5157_v63  ;;  %v1771_v14 = vmax.f32 %v5060_v34, 0.0  ;;  %v2026_v2 = vpop.permute.xlu0 %2025 }
 0x441   :  { %6486 = vst [vmem:[#allocation13_spill] sm:$0xff] %v5349_v15  ;;  %2164 = vmatpush1.msra.mxu1 %v5319_v45  ;;  %2078 = vmatprep.subr.mxu0 %v5249_v62  ;;  %v5366_v24 = vadd.f32 %v6490_v20, %v6489_v6  ;;  %v1874_v40 = vsel %vm5343_vm6, %v5147_v39, %v5189_v31  ;;  %v6492_v21 = vmax.f32 %v5053_v12, 0.0  ;;  %v6494_v58 = vmax.f32 %v5029_v42, 0.0  ;;  %v3165_v42 = vld [vmem:[%s6140_s5 + $0x28] sm:$0xff]  ;;  %v3166_v39 = vld [vmem:[%s6140_s5 + $0x30] sm:$0xff]  ;;  %v3167_v31 = vld [vmem:[%s6140_s5 + $0x38] sm:$0xff] }
 0x442   :  { %6488 = vst [vmem:[#allocation17_spill] sm:$0xff] %v5355_v38  ;;  %2165 = vmatprep.subr.mxu1 %v5332_v53  ;;  %2079 = vmatpush1.msra.mxu0 %v5193_v29  ;;  %v5390_v12 = vadd.f32 %v1883_v61, %v1771_v14  ;;  %v5393_v34 = vadd.f32 %v1874_v40, %v1770_v55 }
 0x443   :  { %6491 = vst [vmem:[#allocation22_spill] sm:$0xff] %v5366_v24  ;;  %v5376_v25 = vadd.f32 %v1919_v26, %v6492_v21  ;;  %v5385_v63 = vadd.f32 %v1910_v49, %v6494_v58  ;;  %2166 = vmatpush1.msra.mxu1 %v5349_v15  ;;  %2080 = vmatprep.subr.mxu0 %v5355_v38 }
 0x444   :  { %6496 = vst [vmem:[#allocation11_spill] sm:$0xff] %v5390_v12  ;;  %2081 = vmatpush1.msra.mxu0 %v5366_v24  ;;  %6497 = vst [vmem:[#allocation15_spill] sm:$0xff] %v5393_v34 }
 0x445   :  { %6493 = vst [vmem:[#allocation12_spill] sm:$0xff] %v5376_v25  ;;  %6495 = vst [vmem:[#allocation6_spill] sm:$0xff] %v5385_v63  ;;  %2167 = vmatprep.subr.mxu1 %v5376_v25  ;;  %3172 = vmatmul.mubr.msk.f32.vlgmr.msra.gmra.mxu0 %vm629_vm13, %v3164_v13 }
 0x446   :  { %2168 = vmatpush1.msra.mxu1 %v5385_v63  ;;  %2120 = vmatprep.mubr.f32.mxu0 %v6498_v19 }
 0x447   :  { %2169 = vmatprep.subr.mxu1 %v5390_v12 }
 0x448   :  { %2170 = vmatpush1.msra.mxu1 %v5393_v34 }
 0x449   :  { %3176 = vmatmul.mubr.msk.f32.vlgmr.msra.gmra.mxu1 %vm629_vm13, %v3164_v13  ;;  %3173 = vmatmul.mubr.msk.f32.gmra.mxu0 %vm629_vm13, %v3165_v42 }
 0x44a   :  { %2209 = vmatprep.mubr.f32.mxu1 %v6498_v19  ;;  %2126 = vmatprep.mubr.f32.mxu0 %v6498_v19 }
 0x44d   :  { %3177 = vmatmul.mubr.msk.f32.gmra.mxu1 %vm629_vm13, %v3165_v42  ;;  %3174 = vmatmul.mubr.msk.f32.gmra.mxu0 %vm629_vm13, %v3166_v39 }
 0x44e   :  { %2215 = vmatprep.mubr.f32.mxu1 %v6498_v19  ;;  %2132 = vmatprep.mubr.f32.mxu0 %v6498_v19 }
 0x451   :  { %3178 = vmatmul.mubr.msk.f32.gmra.mxu1 %vm629_vm13, %v3166_v39  ;;  %3175 = vmatmul.mubr.msk.f32.gmra.mxu0 %vm629_vm13, %v3167_v31 }
 0x452   :  { %2221 = vmatprep.mubr.f32.mxu1 %v6498_v19  ;;  %2574 = vmatprep.mubr.f32.mxu0 %v6498_v19 }
 0x455   :  { %3179 = vmatmul.mubr.msk.f32.gmra.mxu1 %vm629_vm13, %v3167_v31 }
 0x456   :  { %2663 = vmatprep.mubr.f32.mxu1 %v6498_v19 }
 0x505   :  { %v2116_v3 = vpop.f32.mrf.mxu0 }
 0x506   :  { %v5425_v7 = vadd.f32 %v2116_v3, %v2021_v41 }
 0x507   :  { %v2118_v23 = vpop.f32.mrf.mxu0 }
 0x508   :  { %v2244_v33 = vand.u32 2147483647, %v5425_v7  ;;  %v5443_v27 = vadd.f32 %v2118_v23, %v2021_v41 }
 0x509   :  { %v2205_v28 = vpop.f32.mrf.mxu1  ;;  %v2122_v48 = vpop.f32.mrf.mxu0 }
 0x50a   :  { %v5428_v36 = vadd.f32 %v2205_v28, %v2021_v41  ;;  %v5430_v8 = vadd.f32 %v2122_v48, %v2026_v2  ;;  %v2260_v30 = vsub.f32 0.0, %v2244_v33  ;;  %v2245_v3 = vand.u32 2147483647, %v5443_v27 }
 0x50b   :  { %v2207_v17 = vpop.f32.mrf.mxu1  ;;  %v2124_v44 = vpop.f32.mrf.mxu0 }
 0x50c   :  { %6499 = vst [vmem:[#allocation14_spill] sm:$0xff] %v5428_v36  ;;  %v2246_v1 = vand.u32 2147483647, %v5428_v36  ;;  %v2248_v37 = vand.u32 2147483647, %v5430_v8  ;;  %v5437_v49 = vadd.f32 %v2124_v44, %v2026_v2 }
 0x50d   :  { %v2211_v50 = vpop.f32.mrf.mxu1  ;;  %v2128_v52 = vpop.f32.mrf.mxu0  ;;  %v2276_v35 = vmul.f32 1.442695, %v2260_v30 }
 0x50e   :  { %v5434_v4 = vadd.f32 %v2211_v50, %v2026_v2  ;;  %v2262_v54 = vsub.f32 0.0, %v2246_v1  ;;  %v2264_v18 = vsub.f32 0.0, %v2248_v37  ;;  %v5439_v16 = vadd.f32 %v2128_v52, %v2031_v9 }
 0x50f   :  { %v2213_v22 = vpop.f32.mrf.mxu1  ;;  %v2130_v47 = vpop.f32.mrf.mxu0  ;;  %3461 = vpow2.f32 %v2276_v35  ;;  %v2249_v14 = vand.u32 2147483647, %v5437_v49  ;;  %v5461_v1 = vadd.f32 %v2207_v17, %v2021_v41 }
 0x510   :  { %6500 = vst [vmem:[#allocation5_spill] sm:$0xff] %v5434_v4  ;;  %v2250_v57 = vand.u32 2147483647, %v5434_v4  ;;  %v2280_v51 = vmul.f32 1.442695, %v2262_v54  ;;  %v5447_v40 = vadd.f32 %v2130_v47, %v2031_v9  ;;  %v5455_v58 = vadd.f32 %v2213_v22, %v2026_v2 }
 0x511   :  { %v2217_v26 = vpop.f32.mrf.mxu1  ;;  %v2134_v11 = vpop.f32.mrf.mxu0  ;;  %v2284_v56 = vmul.f32 1.442695, %v2264_v18  ;;  %v2252_v61 = vand.u32 2147483647, %v5439_v16  ;;  %6502 = vst [vmem:[#allocation10_spill] sm:$0xff] %v5461_v1  ;;  %v2265_v50 = vsub.f32 0.0, %v2249_v14 }
 0x512   :  { %v5441_v5 = vadd.f32 %v2217_v26, %v2031_v9  ;;  %v2266_v6 = vsub.f32 0.0, %v2250_v57  ;;  %v5453_v55 = vadd.f32 %v2134_v11, %v5423_v0  ;;  %3463 = vpow2.f32 %v2280_v51  ;;  %6501 = vst [vmem:[#allocation8_spill] sm:$0xff] %v5455_v58 }
 0x513   :  { %v2219_v10 = vpop.f32.mrf.mxu1  ;;  %v2268_v21 = vsub.f32 0.0, %v2252_v61  ;;  %v2253_v39 = vand.u32 2147483647, %v5447_v40  ;;  %3465 = vpow2.f32 %v2284_v56  ;;  %v2251_v30 = vand.u32 2147483647, %v5455_v58  ;;  %v2136_v22 = vpop.f32.mrf.mxu0 }
 0x514   :  { %v2254_v20 = vand.u32 2147483647, %v5441_v5  ;;  %v5450_v13 = vadd.f32 %v2219_v10, %v2031_v9  ;;  %v2288_v33 = vmul.f32 1.442695, %v2266_v6  ;;  %v2256_v9 = vand.u32 2147483647, %v5453_v55 }
 0x515   :  { %v2223_v31 = vpop.f32.mrf.mxu1  ;;  %v2292_v23 = vmul.f32 1.442695, %v2268_v21  ;;  %v2269_v48 = vsub.f32 0.0, %v2253_v39  ;;  %v2261_v47 = vsub.f32 0.0, %v2245_v3  ;;  %v2247_v26 = vand.u32 2147483647, %v5461_v1 }
 0x516   :  { %v2270_v42 = vsub.f32 0.0, %v2254_v20  ;;  %v2255_v28 = vand.u32 2147483647, %v5450_v13  ;;  %v5464_v2 = vadd.f32 %v2223_v31, %v5423_v0  ;;  %v2272_v54 = vsub.f32 0.0, %v2256_v9 }
 0x517   :  { %3467 = vpow2.f32 %v2292_v23  ;;  %v2294_v52 = vmul.f32 1.442695, %v2269_v48  ;;  %v5470_v17 = vadd.f32 %v2136_v22, %v5423_v0  ;;  %v2286_v35 = vmul.f32 1.442695, %v2265_v50  ;;  %v2225_v51 = vpop.f32.mrf.mxu1 }
 0x518   :  { %v2296_v44 = vmul.f32 1.442695, %v2270_v42  ;;  %v2271_v37 = vsub.f32 0.0, %v2255_v28  ;;  %3469 = vpow2.f32 %v2288_v33  ;;  %v2258_v18 = vand.u32 2147483647, %v5464_v2 }
 0x519   :  { %v2267_v57 = vsub.f32 0.0, %v2251_v30  ;;  %v2300_v10 = vmul.f32 1.442695, %v2272_v54  ;;  %v2278_v11 = vmul.f32 1.442695, %v2261_v47  ;;  %v2263_v6 = vsub.f32 0.0, %v2247_v26 }
 0x51a   :  { %3471 = vpow2.f32 %v2296_v44  ;;  %v2298_v41 = vmul.f32 1.442695, %v2271_v37  ;;  %v2274_v56 = vsub.f32 0.0, %v2258_v18  ;;  %v2257_v20 = vand.u32 2147483647, %v5470_v17 }
 0x51b   :  { %3473 = vpow2.f32 %v2294_v52  ;;  %v5476_v14 = vadd.f32 %v2225_v51, %v5423_v0  ;;  %v2290_v21 = vmul.f32 1.442695, %v2267_v57  ;;  %v2282_v28 = vmul.f32 1.442695, %v2263_v6 }
 0x51c   :  { %v5472_v61 = vpop.eup %3461  ;;  %3475 = vpow2.f32 %v2298_v41  ;;  %v2304_v39 = vmul.f32 1.442695, %v2274_v56  ;;  %v2273_v31 = vsub.f32 0.0, %v2257_v20 }
 0x51d   :  { %3477 = vpow2.f32 %v2286_v35  ;;  %v2308_v23 = vadd.f32 1.0, %v5472_v61  ;;  %v2259_v48 = vand.u32 2147483647, %v5476_v14  ;;  %v2311_v35 = vmul.f32 -0.5, %v5472_v61 }
 0x51e   :  { %3479 = vpow2.f32 %v2300_v10  ;;  %v2302_v33 = vmul.f32 1.442695, %v2273_v31 }
 0x51f   :  { %v5478_v42 = vpop.eup %3463  ;;  %3481 = vpow2.f32 %v2278_v11  ;;  %v2275_v37 = vsub.f32 0.0, %v2259_v48 }
 0x520   :  { %v5480_v3 = vpop.eup %3465  ;;  %3483 = vpow2.f32 %v2304_v39  ;;  %v2326_v0 = vadd.f32 1.0, %v5478_v42  ;;  %v2329_v10 = vmul.f32 -0.5, %v5478_v42 }
 0x521   :  { %3485 = vpow2.f32 %v2290_v21  ;;  %v2344_v44 = vadd.f32 1.0, %v5480_v3  ;;  %v2306_v26 = vmul.f32 1.442695, %v2275_v37  ;;  %v2347_v11 = vmul.f32 -0.5, %v5480_v3 }
 0x522   :  { %3487 = vpow2.f32 %v2302_v33  ;;  %v2330_v51 = vadd.f32 1.0, %v2329_v10 }
 0x523   :  { %3489 = vlog2.f32 %v2308_v23  ;;  %v2348_v20 = vadd.f32 1.0, %v2347_v11 }
 0x524   :  { %v5485_v9 = vpop.eup %3467  ;;  %3491 = vpow2.f32 %v2282_v28 }
 0x525   :  { %v5488_v50 = vpop.eup %3469  ;;  %3493 = vlog2.f32 %v2326_v0  ;;  %v2380_v18 = vadd.f32 1.0, %v5485_v9  ;;  %v2312_v0 = vadd.f32 1.0, %v2311_v35 }
 0x526   :  { %3495 = vlog2.f32 %v2344_v44  ;;  %v2362_v56 = vadd.f32 1.0, %v5488_v50  ;;  %v2365_v23 = vmul.f32 -0.5, %v5488_v50  ;;  %v2314_v44 = vand.u32 2147483647, %v5472_v61 }
 0x527   :  { %v5493_v54 = vpop.eup %3471  ;;  %3497 = vpow2.f32 %v2306_v26  ;;  %v2350_v26 = vand.u32 2147483647, %v5480_v3 }
 0x528   :  { %v5497_v41 = vpop.eup %3473  ;;  %v2398_v21 = vadd.f32 1.0, %v5493_v54  ;;  %3499 = vlog2.f32 %v2380_v18  ;;  %v2366_v57 = vadd.f32 1.0, %v2365_v23  ;;  %vm5533_vm4 = vcmp.lt.f32.partialorder %v2314_v44, 0.0004427343 }
 0x529   :  { %v5509_v31 = vpop.eup %3475  ;;  %v2389_v33 = vadd.f32 1.0, %v5497_v41  ;;  %3501 = vlog2.f32 %v2362_v56  ;;  %v2401_v52 = vmul.f32 -0.5, %v5493_v54  ;;  %v5543_v23 = vmul.f32 %v5472_v61, %v2312_v0 }
 0x52a   :  { %v5514_v48 = vpop.eup %3477  ;;  %3503 = vlog2.f32 %v2398_v21  ;;  %v2407_v28 = vadd.f32 1.0, %v5509_v31  ;;  %v2383_v21 = vmul.f32 -0.5, %v5485_v9  ;;  %v5549_v44 = vmul.f32 %v5480_v3, %v2348_v20 }
 0x52b   :  { %v5519_v47 = vpop.eup %3479  ;;  %3505 = vlog2.f32 %v2389_v33  ;;  %v2353_v10 = vadd.f32 1.0, %v5514_v48  ;;  %v5546_v33 = vmul.f32 %v5478_v42, %v2330_v51  ;;  %v2356_v43 = vmul.f32 -0.5, %v5514_v48 }
 0x52c   :  { %v5522_v30 = vpop.eup %3481  ;;  %v2416_v35 = vadd.f32 1.0, %v5519_v47  ;;  %vm5557_vm7 = vcmp.lt.f32.partialorder %v2350_v26, 0.0004427343  ;;  %v2386_v51 = vand.u32 2147483647, %v5485_v9  ;;  %v5565_v59 = vmul.f32 %v5488_v50, %v2366_v57 }
 0x52d   :  { %v5527_v22 = vpop.eup %3483  ;;  %6505 = vst [vmem:[#allocation24_spill] sm:$0xff] %v5546_v33  ;;  %v2402_v18 = vadd.f32 1.0, %v2401_v52  ;;  %v2404_v26 = vand.u32 2147483647, %v5493_v54  ;;  %v2359_v25 = vand.u32 2147483647, %v5514_v48 }
 0x52e   :  { %v5531_v11 = vpop.eup %3485  ;;  %3507 = vlog2.f32 %v2416_v35  ;;  %v2434_v37 = vadd.f32 1.0, %v5527_v22  ;;  %v2392_v35 = vmul.f32 -0.5, %v5497_v41  ;;  %v2395_v53 = vand.u32 2147483647, %v5497_v41 }
 0x52f   :  { %v5540_v39 = vpop.eup %3487  ;;  %3509 = vlog2.f32 %v2407_v28  ;;  %v2371_v20 = vadd.f32 1.0, %v5531_v11  ;;  %v2384_v28 = vadd.f32 1.0, %v2383_v21  ;;  %v2410_v32 = vmul.f32 -0.5, %v5509_v31 }
 0x530   :  { %v3490_v6 = vpop.eup %3489  ;;  %v2425_v3 = vadd.f32 1.0, %v5540_v39  ;;  %3511 = vlog2.f32 %v2353_v10  ;;  %v2393_v10 = vadd.f32 1.0, %v2392_v35  ;;  %v2317_v57 = vadd.f32 1.0, %v5522_v30 }
 0x531   :  { %v5555_v45 = vpop.eup %3491  ;;  %3513 = vlog2.f32 %v2434_v37  ;;  %v5567_v46 = vmul.f32 0.6931472, %v3490_v6  ;;  %vm5576_vm8 = vcmp.lt.f32.partialorder %v2386_v51, 0.0004427343  ;;  %v2357_v37 = vadd.f32 1.0, %v2356_v43 }
 0x532   :  { %v3494_v0 = vpop.eup %3493  ;;  %3515 = vlog2.f32 %v2425_v3  ;;  %v2385_v15 = vmul.f32 %v5485_v9, %v2384_v28  ;;  %v5585_v35 = vmul.f32 %v5493_v54, %v2402_v18  ;;  %v2419_v60 = vmul.f32 -0.5, %v5519_v47 }
 0x533   :  { %v3496_v12 = vpop.eup %3495  ;;  %3517 = vlog2.f32 %v2371_v20  ;;  %v5592_v63 = vmul.f32 0.6931472, %v3494_v0  ;;  %vm5594_vm9 = vcmp.lt.f32.partialorder %v2404_v26, 0.0004427343  ;;  %v5600_v54 = vmul.f32 %v5497_v41, %v2393_v10 }
 0x534   :  { %v5571_v38 = vpop.eup %3497  ;;  %v5581_v3 = vmul.f32 0.6931472, %v3496_v12  ;;  %v2437_v12 = vmul.f32 -0.5, %v5527_v22  ;;  %vm5602_vm10 = vcmp.lt.f32.partialorder %v2395_v53, 0.0004427343  ;;  %v2411_v20 = vadd.f32 1.0, %v2410_v32 }
 0x535   :  { %v2443_v6 = vadd.f32 1.0, %v5571_v38  ;;  %v3500_v21 = vpop.eup %3499  ;;  %v2413_v28 = vand.u32 2147483647, %v5509_v31  ;;  %v2422_v51 = vand.u32 2147483647, %v5519_v47  ;;  %v2428_v62 = vmul.f32 -0.5, %v5540_v39 }
 0x536   :  { %v3502_v9 = vpop.eup %3501  ;;  %v2382_v26 = vmul.f32 0.6931472, %v3500_v21  ;;  %v2420_v41 = vadd.f32 1.0, %v2419_v60  ;;  %v2440_v32 = vand.u32 2147483647, %v5527_v22  ;;  %v2335_v10 = vadd.f32 1.0, %v5555_v45 }
 0x537   :  { %3519 = vlog2.f32 %v2443_v6  ;;  %v3504_v0 = vpop.eup %3503  ;;  %v5610_v6 = vmul.f32 %v5514_v48, %v2357_v37  ;;  %v5618_v21 = vmul.f32 0.6931472, %v3502_v9  ;;  %v2438_v34 = vadd.f32 1.0, %v2437_v12 }
 0x538   :  { %3521 = vlog2.f32 %v2317_v57  ;;  %v3506_v29 = vpop.eup %3505  ;;  %v2431_v24 = vand.u32 2147483647, %v5540_v39  ;;  %v2374_v48 = vmul.f32 -0.5, %v5531_v11  ;;  %v5622_v37 = vmul.f32 0.6931472, %v3504_v0 }
 0x539   :  { %v2446_v19 = vmul.f32 -0.5, %v5571_v38  ;;  %v5626_v4 = vmul.f32 %v5509_v31, %v2411_v20  ;;  %vm5628_vm11 = vcmp.lt.f32.partialorder %v2359_v25, 0.0004427343  ;;  %3523 = vlog2.f32 %v2335_v10 }
 0x53a   :  { %v2388_v12 = vsel %vm5576_vm8, %v2385_v15, %v2382_v26  ;;  %vm5634_vm12 = vcmp.lt.f32.partialorder %v2422_v51, 0.0004427343  ;;  %v2429_v0 = vadd.f32 1.0, %v2428_v62  ;;  %v2391_v36 = vmul.f32 0.6931472, %v3506_v29 }
 0x53b   :  { %v3508_v57 = vpop.eup %3507  ;;  %v2421_v31 = vmul.f32 %v5519_v47, %v2420_v41  ;;  %vm5639_vm14 = vcmp.lt.f32.partialorder %v2440_v32, 0.0004427343  ;;  %vm5643_vm15 = vcmp.lt.f32.partialorder %v2413_v28, 0.0004427343  ;;  %v2320_v15 = vmul.f32 -0.5, %v5522_v30 }
 0x53c   :  { %v3510_v53 = vpop.eup %3509  ;;  %v2418_v1 = vmul.f32 0.6931472, %v3508_v57  ;;  %v2439_v51 = vmul.f32 %v5527_v22, %v2438_v34  ;;  %vm5649_vm0 = vcmp.lt.f32.partialorder %v2431_v24, 0.0004427343  ;;  %v2375_v29 = vadd.f32 1.0, %v2374_v48 }
 0x53d   :  { %v3512_v58 = vpop.eup %3511  ;;  %v2377_v47 = vand.u32 2147483647, %v5531_v11  ;;  %v6524_v41 = vand.u32 2147483647, %v5488_v50  ;;  %v6527_v32 = vmax.f32 %v5439_v16, 0.0  ;;  %v2406_v24 = vsel %vm5594_vm9, %v5585_v35, %v5622_v37 }
 0x53e   :  { %v3514_v52 = vpop.eup %3513  ;;  %v2447_v34 = vadd.f32 1.0, %v2446_v19  ;;  %v2449_v22 = vand.u32 2147483647, %v5571_v38  ;;  %v2430_v48 = vmul.f32 %v5540_v39, %v2429_v0  ;;  %v2397_v50 = vsel %vm5602_vm10, %v5600_v54, %v2391_v36 }
 0x53f   :  { %v3516_v26 = vpop.eup %3515  ;;  %vm5656_vm1 = vcmp.lt.f32.partialorder %v6524_v41, 0.0004427343  ;;  %v2460_v10 = vadd.f32 %v2388_v12, %v6527_v32  ;;  %v2355_v41 = vmul.f32 0.6931472, %v3512_v58  ;;  %v2424_v16 = vsel %vm5634_vm12, %v2421_v31, %v2418_v1  ;;  %v2491_v1 = vpop.permute.xlu1 %2490 }
 0x540   :  { %v2427_v57 = vmul.f32 0.6931472, %v3516_v26  ;;  %v3518_v33 = vpop.eup %3517  ;;  %v2436_v12 = vmul.f32 0.6931472, %v3514_v52  ;;  %v2321_v32 = vadd.f32 1.0, %v2320_v15  ;;  %v2338_v43 = vmul.f32 -0.5, %v5555_v45 }
 0x541   :  { %v2409_v35 = vmul.f32 0.6931472, %v3510_v53  ;;  %v2376_v37 = vmul.f32 %v5531_v11, %v2375_v29  ;;  %v2323_v39 = vand.u32 2147483647, %v5522_v30  ;;  %v6528_v36 = vmax.f32 %v5470_v17, 0.0 }
 0x542   :  { %v2433_v19 = vsel %vm5649_vm0, %v2430_v48, %v2427_v57  ;;  %v2448_v54 = vmul.f32 %v5571_v38, %v2447_v34  ;;  %vm5681_vm3 = vcmp.lt.f32.partialorder %v2449_v22, 0.0004427343  ;;  %v6531_v18 = vmax.f32 %v5447_v40, 0.0 }
 0x543   :  { %v2465_v58 = vadd.f32 %v2433_v19, %v6528_v36  ;;  %v6532_v53 = vmax.f32 %v5453_v55, 0.0  ;;  %v2361_v52 = vsel %vm5628_vm11, %v5610_v6, %v2355_v41  ;;  %v2373_v17 = vmul.f32 0.6931472, %v3518_v33  ;;  %v6555_v19 = vld [vmem:[#allocation5_spill] sm:$0xff]  ;;  %v3181_v36 = vld [vmem:[%s6142_s7 + $0x28] sm:$0xff] }
 0x544   :  { %v3520_v0 = vpop.eup %3519  ;;  %v2461_v9 = vadd.f32 %v2397_v50, %v6531_v18  ;;  %v2442_v38 = vsel %vm5639_vm14, %v2439_v51, %v2436_v12  ;;  %v2322_v29 = vmul.f32 %v5522_v30, %v2321_v32  ;;  %v2339_v26 = vadd.f32 1.0, %v2338_v43  ;;  %v5788_v18 = vpop.permute.xlu0 %2495 }
 0x545   :  { %v3522_v31 = vpop.eup %3521  ;;  %v2464_v15 = vadd.f32 %v2424_v16, %v6532_v53  ;;  %v2445_v11 = vmul.f32 0.6931472, %v3520_v0  ;;  %2534 = vmatprep.subr.mxu0 %v2465_v58  ;;  %v2415_v55 = vsel %vm5643_vm15, %v5626_v4, %v2409_v35  ;;  %vm5700_vm5 = vcmp.lt.f32.partialorder %v2323_v39, 0.0004427343  ;;  %v3182_v58 = vld [vmem:[%s6142_s7 + $0x30] sm:$0xff] }
 0x546   :  { %v2319_v62 = vmul.f32 0.6931472, %v3522_v31  ;;  %v2341_v33 = vand.u32 2147483647, %v5555_v45  ;;  %v6535_v6 = vmax.f32 %v5476_v14, 0.0  ;;  %v6536_v30 = vmax.f32 %v5437_v49, 0.0  ;;  %v3524_v20 = vpop.eup %3523 }
 0x547   :  { %v2451_v40 = vsel %vm5681_vm3, %v2448_v54, %v2445_v11  ;;  %2535 = vmatpush1.msra.mxu0 %v2464_v15  ;;  %vm5709_vm2 = vcmp.lt.f32.partialorder %v2377_v47, 0.0004427343  ;;  %v6539_v22 = vmax.f32 %v5430_v8, 0.0  ;;  %v6540_v14 = vsel %vm5557_vm7, %v5549_v44, %v5581_v3  ;;  %v3183_v54 = vld [vmem:[%s6142_s7 + $0x38] sm:$0xff] }
 0x548   :  { %v2467_v25 = vadd.f32 %v2451_v40, %v6535_v6  ;;  %2536 = vmatprep.subr.mxu0 %v2461_v9  ;;  %v2457_v51 = vadd.f32 %v2361_v52, %v6536_v30  ;;  %v2325_v4 = vsel %vm5700_vm5, %v2322_v29, %v2319_v62  ;;  %v2370_v49 = vsel %vm5656_vm1, %v5565_v59, %v5618_v21  ;;  %v2481_v9 = vpop.permute.xlu1 %2480  ;;  %v6558_v11 = vld [vmem:[#allocation22_spill] sm:$0xff]  ;;  %v2486_v62 = vpop.permute.xlu0 %2485  ;;  %v6559_v6 = vld [vmem:[#allocation15_spill] sm:$0xff] }
 0x549   :  { %v2456_v57 = vadd.f32 %v6540_v14, %v6539_v22  ;;  %v6541_v47 = vmax.f32 %v5464_v2, 0.0  ;;  %2537 = vmatpush1.msra.mxu0 %v2460_v10  ;;  %v2379_v50 = vsel %vm5709_vm2, %v2376_v37, %v2373_v17  ;;  %v6542_v8 = vmax.f32 %v5450_v13, 0.0  ;;  %v6560_v30 = vld [vmem:[#allocation26_spill] sm:$0xff] }
 0x54a   :  { %2623 = vmatprep.subr.mxu1 %v2467_v25  ;;  %2538 = vmatprep.subr.mxu0 %v2457_v51  ;;  %v6543_v44 = vmax.f32 %v5443_v27, 0.0  ;;  %v2337_v41 = vmul.f32 0.6931472, %v3524_v20  ;;  %v2340_v16 = vmul.f32 %v5555_v45, %v2339_v26  ;;  %v6544_v59 = vmax.f32 %v5425_v7, 0.0  ;;  %v3180_v45 = vld [vmem:[%s6142_s7 + $0x20] sm:$0xff]  ;;  %v6550_v7 = vld [vmem:[#allocation24_spill] sm:$0xff] }
 0x54b   :  { %v2466_v48 = vadd.f32 %v2442_v38, %v6541_v47  ;;  %v2463_v61 = vadd.f32 %v2415_v55, %v6542_v8  ;;  %v6545_v2 = vsel %vm5533_vm4, %v5543_v23, %v5567_v46  ;;  %v6546_v28 = vand.u32 2147483647, %v5478_v42  ;;  %2539 = vmatpush1.msra.mxu0 %v2456_v57  ;;  %v6551_v42 = vld [vmem:[#allocation10_spill] sm:$0xff]  ;;  %v6552_v23 = vld [vmem:[#allocation8_spill] sm:$0xff] }
 0x54c   :  { %v2453_v3 = vadd.f32 %v2325_v4, %v6543_v44  ;;  %v2452_v21 = vadd.f32 %v6545_v2, %v6544_v59  ;;  %v6549_v27 = vmax.f32 %v5441_v5, 0.0  ;;  %vm2342_vm7 = vcmp.lt.f32.partialorder %v2341_v33, 0.0004427343 }
 0x54d   :  { %vm5744_vm6 = vcmp.lt.f32.partialorder %v6546_v28, 0.0004427343  ;;  %2624 = vmatpush1.msra.mxu1 %v2466_v48  ;;  %v2231_v56 = vmax.f32 %v6551_v42, 0.0  ;;  %v6553_v12 = vmax.f32 %v6552_v23, 0.0  ;;  %v2343_v5 = vsel %vm2342_vm7, %v2340_v16, %v2337_v41  ;;  %v6564_v42 = vld [vmem:[#allocation13_spill] sm:$0xff] }
 0x54e   :  { %v2462_v10 = vadd.f32 %v2406_v24, %v6549_v27  ;;  %v2334_v46 = vsel %vm5744_vm6, %v6550_v7, %v5592_v63  ;;  %2625 = vmatprep.subr.mxu1 %v2463_v61  ;;  %2540 = vmatprep.subr.mxu0 %v2453_v3  ;;  %v6554_v24 = vld [vmem:[#allocation14_spill] sm:$0xff]  ;;  %v6556_v35 = vmax.f32 %v6555_v19, 0.0  ;;  %v6557_v0 = vmov 0.0  }
 0x54f   :  { %v2459_v32 = vadd.f32 %v2379_v50, %v6553_v12  ;;  %v2230_v43 = vmax.f32 %v6554_v24, 0.0  ;;  %2541 = vmatpush1.msra.mxu0 %v2452_v21  ;;  %v2455_v39 = vadd.f32 %v2343_v5, %v2231_v56  ;;  %v6562_v61 = vld [vmem:[#allocation6_spill] sm:$0xff] }
 0x550   :  { %v2458_v37 = vadd.f32 %v2370_v49, %v6556_v35  ;;  %2626 = vmatpush1.msra.mxu1 %v2462_v10  ;;  %3188 = vmatmul.mubr.msk.f32.vlgmr.msra.gmra.mxu0 %vm629_vm13, %v3180_v45  ;;  %v6561_v49 = vld [vmem:[#allocation25_spill] sm:$0xff] }
 0x551   :  { %2627 = vmatprep.subr.mxu1 %v2459_v32  ;;  %v2454_v63 = vadd.f32 %v2334_v46, %v2230_v43  ;;  %2580 = vmatprep.mubr.f32.mxu0 %v6557_v0 }
 0x552   :  { %2628 = vmatpush1.msra.mxu1 %v2458_v37 }
 0x553   :  { %2629 = vmatprep.subr.mxu1 %v2455_v39  ;;  %v6565_v39 = vld [vmem:[#allocation19_spill] sm:$0xff] }
 0x554   :  { %2630 = vmatpush1.msra.mxu1 %v2454_v63  ;;  %3189 = vmatmul.mubr.msk.f32.gmra.mxu0 %vm629_vm13, %v3181_v36 }
 0x555   :  { %3192 = vmatmul.mubr.msk.f32.vlgmr.msra.gmra.mxu1 %vm629_vm13, %v3180_v45  ;;  %2586 = vmatprep.mubr.f32.mxu0 %v6557_v0  ;;  %v6563_v45 = vld [vmem:[#allocation21_spill] sm:$0xff] }
 0x556   :  { %2669 = vmatprep.mubr.f32.mxu1 %v6557_v0 }
 0x558   :  { %3190 = vmatmul.mubr.msk.f32.gmra.mxu0 %vm629_vm13, %v3182_v58 }
 0x559   :  { %3193 = vmatmul.mubr.msk.f32.gmra.mxu1 %vm629_vm13, %v3181_v36  ;;  %2592 = vmatprep.mubr.f32.mxu0 %v6557_v0 }
 0x55a   :  { %2675 = vmatprep.mubr.f32.mxu1 %v6557_v0 }
 0x55c   :  { %3191 = vmatmul.mubr.msk.f32.gmra.mxu0 %vm629_vm13, %v3183_v54 }
 0x55d   :  { %3194 = vmatmul.mubr.msk.f32.gmra.mxu1 %vm629_vm13, %v3182_v58  ;;  %3018 = vmatprep.mubr.f32.mxu0 %v6557_v0 }
 0x55e   :  { %2681 = vmatprep.mubr.f32.mxu1 %v6557_v0 }
 0x561   :  { %3195 = vmatmul.mubr.msk.f32.gmra.mxu1 %vm629_vm13, %v3183_v54  ;;  %v6566_v54 = vld [vmem:[#allocation18_spill] sm:$0xff] }
 0x562   :  { %3089 = vmatprep.mubr.f32.mxu1 %v6557_v0 }
 0x610   :  { %v2576_v31 = vpop.f32.mrf.mxu0 }
 0x611   :  { %v2577_v53 = vadd.f32 %v2576_v31, %v2481_v9 }
 0x612   :  { %v2578_v15 = vpop.f32.mrf.mxu0 }
 0x613   :  { %v5791_v52 = vadd.f32 %v2577_v53, %v6558_v11  ;;  %v2579_v32 = vadd.f32 %v2578_v15, %v2481_v9  ;;  %v6567_v53 = vld [vmem:[#allocation17_spill] sm:$0xff] }
 0x614   :  { %v2582_v38 = vpop.f32.mrf.mxu0 }
 0x615   :  { %v2665_v17 = vpop.f32.mrf.mxu1  ;;  %v2720_v29 = vand.u32 2147483647, %v5791_v52  ;;  %v2583_v55 = vadd.f32 %v2582_v38, %v2486_v62  ;;  %v5826_v15 = vadd.f32 %v2579_v32, %v6567_v53  ;;  %v6568_v38 = vld [vmem:[#allocation12_spill] sm:$0xff] }
 0x616   :  { %v2666_v26 = vadd.f32 %v2665_v17, %v2481_v9  ;;  %v2584_v60 = vpop.f32.mrf.mxu0 }
 0x617   :  { %v2667_v40 = vpop.f32.mrf.mxu1  ;;  %v2736_v33 = vsub.f32 0.0, %v2720_v29  ;;  %v5798_v51 = vadd.f32 %v2583_v55, %v6560_v30  ;;  %v2585_v4 = vadd.f32 %v2584_v60, %v2486_v62  ;;  %v6570_v60 = vld [vmem:[#allocation11_spill] sm:$0xff] }
 0x618   :  { %v5795_v25 = vadd.f32 %v2666_v26, %v6559_v6  ;;  %v2588_v57 = vpop.f32.mrf.mxu0  ;;  %v2668_v36 = vadd.f32 %v2667_v40, %v2481_v9  ;;  %v6569_v26 = vld [vmem:[#allocation20_spill] sm:$0xff] }
 0x619   :  { %v2671_v34 = vpop.f32.mrf.mxu1  ;;  %v2724_v20 = vand.u32 2147483647, %v5798_v51  ;;  %v5802_v47 = vadd.f32 %v2585_v4, %v6561_v49  ;;  %v2752_v48 = vmul.f32 1.442695, %v2736_v33  ;;  %v2589_v21 = vadd.f32 %v2588_v57, %v2491_v1 }
 0x61a   :  { %v2672_v22 = vadd.f32 %v2671_v34, %v2486_v62  ;;  %v2722_v50 = vand.u32 2147483647, %v5795_v25  ;;  %v2590_v59 = vpop.f32.mrf.mxu0  ;;  %v5837_v33 = vadd.f32 %v2668_v36, %v6570_v60  ;;  %v2721_v4 = vand.u32 2147483647, %v5826_v15 }
 0x61b   :  { %v2673_v14 = vpop.f32.mrf.mxu1  ;;  %v2740_v8 = vsub.f32 0.0, %v2724_v20  ;;  %v2725_v2 = vand.u32 2147483647, %v5802_v47  ;;  %3525 = vpow2.f32 %v2752_v48  ;;  %v5811_v7 = vadd.f32 %v2589_v21, %v6563_v45  ;;  %v6571_v48 = vld [vmem:[#allocation7_spill] sm:$0xff] }
 0x61c   :  { %v5806_v44 = vadd.f32 %v2672_v22, %v6562_v61  ;;  %v2738_v13 = vsub.f32 0.0, %v2722_v50  ;;  %v2591_v46 = vadd.f32 %v2590_v59, %v2491_v1  ;;  %v2594_v12 = vpop.f32.mrf.mxu0  ;;  %v2674_v43 = vadd.f32 %v2673_v14, %v2486_v62 }
 0x61d   :  { %v2677_v3 = vpop.f32.mrf.mxu1  ;;  %v2760_v41 = vmul.f32 1.442695, %v2740_v8  ;;  %v2741_v5 = vsub.f32 0.0, %v2725_v2  ;;  %v2728_v19 = vand.u32 2147483647, %v5811_v7  ;;  %v2595_v0 = vadd.f32 %v2594_v12, %v5788_v18 }
 0x61e   :  { %v2726_v16 = vand.u32 2147483647, %v5806_v44  ;;  %v2678_v27 = vadd.f32 %v2677_v3, %v2491_v1  ;;  %v2756_v24 = vmul.f32 1.442695, %v2738_v13  ;;  %v5819_v63 = vadd.f32 %v2591_v46, %v6565_v39  ;;  %v2596_v14 = vpop.f32.mrf.mxu0 }
 0x61f   :  { %v2679_v28 = vpop.f32.mrf.mxu1  ;;  %3527 = vpow2.f32 %v2760_v41  ;;  %v2744_v58 = vsub.f32 0.0, %v2728_v19  ;;  %v2762_v11 = vmul.f32 1.442695, %v2741_v5  ;;  %v5830_v62 = vadd.f32 %v2674_v43, %v6568_v38 }
 0x620   :  { %v2742_v10 = vsub.f32 0.0, %v2726_v16  ;;  %v5814_v56 = vadd.f32 %v2678_v27, %v6564_v42  ;;  %v2680_v23 = vadd.f32 %v2679_v28, %v2491_v1  ;;  %v2729_v17 = vand.u32 2147483647, %v5819_v63 }
 0x621   :  { %v2683_v1 = vpop.f32.mrf.mxu1  ;;  %3529 = vpow2.f32 %v2756_v24  ;;  %v5833_v55 = vadd.f32 %v2595_v0, %v6569_v26  ;;  %v2768_v9 = vmul.f32 1.442695, %v2744_v58  ;;  %v2727_v20 = vand.u32 2147483647, %v5830_v62 }
 0x622   :  { %v2730_v35 = vand.u32 2147483647, %v5814_v56  ;;  %v2764_v37 = vmul.f32 1.442695, %v2742_v10  ;;  %v5823_v31 = vadd.f32 %v2680_v23, %v6566_v54  ;;  %v2684_v40 = vadd.f32 %v2683_v1, %v5788_v18  ;;  %v6572_v23 = vld [vmem:[#allocation23_spill] sm:$0xff] }
 0x623   :  { %v2745_v6 = vsub.f32 0.0, %v2729_v17  ;;  %v2732_v34 = vand.u32 2147483647, %v5833_v55  ;;  %v2723_v61 = vand.u32 2147483647, %v5837_v33  ;;  %v2597_v16 = vadd.f32 %v2596_v14, %v5788_v18  ;;  %v2685_v28 = vpop.f32.mrf.mxu1 }
 0x624   :  { %v2746_v29 = vsub.f32 0.0, %v2730_v35  ;;  %3531 = vpow2.f32 %v2764_v37  ;;  %v2731_v30 = vand.u32 2147483647, %v5823_v31  ;;  %v5846_v50 = vadd.f32 %v2684_v40, %v6571_v48  ;;  %v6573_v37 = vld [vmem:[#allocation16_spill] sm:$0xff] }
 0x625   :  { %3533 = vpow2.f32 %v2762_v11  ;;  %v2770_v49 = vmul.f32 1.442695, %v2745_v6  ;;  %v2748_v41 = vsub.f32 0.0, %v2732_v34  ;;  %v2737_v2 = vsub.f32 0.0, %v2721_v4 }
 0x626   :  { %v2772_v22 = vmul.f32 1.442695, %v2746_v29  ;;  %3535 = vpow2.f32 %v2768_v9  ;;  %v2747_v3 = vsub.f32 0.0, %v2731_v30  ;;  %v2743_v21 = vsub.f32 0.0, %v2727_v20 }
 0x627   :  { %v2776_v27 = vmul.f32 1.442695, %v2748_v41  ;;  %v2734_v10 = vand.u32 2147483647, %v5846_v50  ;;  %v2739_v45 = vsub.f32 0.0, %v2723_v61  ;;  %v5856_v12 = vadd.f32 %v2597_v16, %v6572_v23 }
 0x628   :  { %v5843_v57 = vpop.eup %3525  ;;  %3537 = vpow2.f32 %v2772_v22  ;;  %v2774_v46 = vmul.f32 1.442695, %v2747_v3  ;;  %v2686_v32 = vadd.f32 %v2685_v28, %v5788_v18  ;;  %v2754_v5 = vmul.f32 1.442695, %v2737_v2 }
 0x629   :  { %v2784_v59 = vadd.f32 1.0, %v5843_v57  ;;  %3539 = vpow2.f32 %v2770_v49  ;;  %v2750_v42 = vsub.f32 0.0, %v2734_v10  ;;  %v2766_v24 = vmul.f32 1.442695, %v2743_v21 }
 0x62a   :  { %3541 = vpow2.f32 %v2776_v27  ;;  %v2733_v35 = vand.u32 2147483647, %v5856_v12  ;;  %v5863_v39 = vadd.f32 %v2686_v32, %v6573_v37  ;;  %v2758_v36 = vmul.f32 1.442695, %v2739_v45 }
 0x62b   :  { %3543 = vlog2.f32 %v2784_v59  ;;  %v2780_v19 = vmul.f32 1.442695, %v2750_v42  ;;  %v2787_v26 = vmul.f32 -0.5, %v5843_v57  ;;  %v2708_v6 = vmax.f32 %v5798_v51, 0.0 }
 0x62c   :  { %v5848_v8 = vpop.eup %3527  ;;  %v2749_v58 = vsub.f32 0.0, %v2733_v35  ;;  %v2735_v18 = vand.u32 2147483647, %v5863_v39  ;;  %v2709_v20 = vmax.f32 %v5802_v47, 0.0  ;;  %v2790_v49 = vand.u32 2147483647, %v5843_v57 }
 0x62d   :  { %v2820_v13 = vadd.f32 1.0, %v5848_v8  ;;  %v2823_v4 = vmul.f32 -0.5, %v5848_v8  ;;  %v2788_v3 = vadd.f32 1.0, %v2787_v26  ;;  %v2826_v41 = vand.u32 2147483647, %v5848_v8 }
 0x62e   :  { %v5859_v43 = vpop.eup %3529  ;;  %v2778_v11 = vmul.f32 1.442695, %v2749_v58  ;;  %v2751_v17 = vsub.f32 0.0, %v2735_v18  ;;  %vm5899_vm4 = vcmp.lt.f32.partialorder %v2790_v49, 0.0004427343  ;;  %v2706_v23 = vmax.f32 %v5795_v25, 0.0 }
 0x62f   :  { %3545 = vlog2.f32 %v2820_v13  ;;  %v2802_v1 = vadd.f32 1.0, %v5859_v43  ;;  %v2805_v60 = vmul.f32 -0.5, %v5859_v43  ;;  %v2824_v10 = vadd.f32 1.0, %v2823_v4 }
 0x630   :  { %3547 = vpow2.f32 %v2774_v46  ;;  %v2782_v30 = vmul.f32 1.442695, %v2751_v17  ;;  %v5909_v35 = vmul.f32 %v5843_v57, %v2788_v3  ;;  %vm5912_vm8 = vcmp.lt.f32.partialorder %v2826_v41, 0.0004427343 }
 0x631   :  { %v5865_v0 = vpop.eup %3531  ;;  %3549 = vpow2.f32 %v2780_v19  ;;  %v2806_v2 = vadd.f32 1.0, %v2805_v60  ;;  %v2825_v57 = vmul.f32 %v5848_v8, %v2824_v10 }
 0x632   :  { %v5868_v54 = vpop.eup %3533  ;;  %3551 = vpow2.f32 %v2766_v24  ;;  %v2838_v53 = vadd.f32 1.0, %v5865_v0  ;;  %v2841_v16 = vmul.f32 -0.5, %v5865_v0 }
 0x633   :  { %3553 = vpow2.f32 %v2754_v5  ;;  %v5872_v38 = vpop.eup %3535  ;;  %v2829_v40 = vadd.f32 1.0, %v5868_v54  ;;  %v2835_v10 = vand.u32 2147483647, %v5868_v54 }
 0x634   :  { %3555 = vpow2.f32 %v2758_v36  ;;  %v2856_v22 = vadd.f32 1.0, %v5872_v38  ;;  %v2842_v58 = vadd.f32 1.0, %v2841_v16 }
 0x635   :  { %3557 = vpow2.f32 %v2778_v11  ;;  %v5880_v34 = vpop.eup %3537  ;;  %vm5995_vm12 = vcmp.lt.f32.partialorder %v2835_v10, 0.0004427343 }
 0x636   :  { %3559 = vlog2.f32 %v2802_v1  ;;  %v5885_v14 = vpop.eup %3539  ;;  %v2874_v13 = vadd.f32 1.0, %v5880_v34  ;;  %v5919_v1 = vmul.f32 %v5859_v43, %v2806_v2  ;;  %v2877_v26 = vmul.f32 -0.5, %v5880_v34 }
 0x637   :  { %3561 = vlog2.f32 %v2838_v53  ;;  %v5892_v59 = vpop.eup %3541  ;;  %v2865_v46 = vadd.f32 1.0, %v5885_v14  ;;  %v2859_v53 = vmul.f32 -0.5, %v5872_v38  ;;  %v5937_v41 = vmul.f32 %v5865_v0, %v2842_v58 }
 0x638   :  { %3563 = vpow2.f32 %v2782_v30  ;;  %v3544_v27 = vpop.eup %3543  ;;  %v2892_v24 = vadd.f32 1.0, %v5892_v59  ;;  %v2878_v48 = vadd.f32 1.0, %v2877_v26  ;;  %v2868_v58 = vmul.f32 -0.5, %v5885_v14 }
 0x639   :  { %3565 = vlog2.f32 %v2829_v40  ;;  %v5930_v30 = vmul.f32 0.6931472, %v3544_v27  ;;  %v2862_v27 = vand.u32 2147483647, %v5872_v38  ;;  %v2895_v37 = vmul.f32 -0.5, %v5892_v59 }
 0x63a   :  { %3567 = vlog2.f32 %v2856_v22  ;;  %v2832_v22 = vmul.f32 -0.5, %v5868_v54  ;;  %v5969_v36 = vmul.f32 %v5880_v34, %v2878_v48 }
 0x63b   :  { %3569 = vlog2.f32 %v2874_v13  ;;  %v2860_v13 = vadd.f32 1.0, %v2859_v53  ;;  %vm5960_vm9 = vcmp.lt.f32.partialorder %v2862_v27, 0.0004427343  ;;  %v2898_v27 = vand.u32 2147483647, %v5892_v59 }
 0x63c   :  { %v3546_v42 = vpop.eup %3545  ;;  %3571 = vlog2.f32 %v2865_v46  ;;  %v2833_v9 = vadd.f32 1.0, %v2832_v22 }
 0x63d   :  { %v5906_v19 = vpop.eup %3547  ;;  %3573 = vlog2.f32 %v2892_v24  ;;  %v2822_v3 = vmul.f32 0.6931472, %v3546_v42  ;;  %v2861_v11 = vmul.f32 %v5872_v38, %v2860_v13  ;;  %vm6000_vm14 = vcmp.lt.f32.partialorder %v2898_v27, 0.0004427343 }
 0x63e   :  { %v5916_v18 = vpop.eup %3549  ;;  %v2883_v4 = vadd.f32 1.0, %v5906_v19  ;;  %v2886_v22 = vmul.f32 -0.5, %v5906_v19  ;;  %v2889_v51 = vand.u32 2147483647, %v5906_v19 }
 0x63f   :  { %v5923_v17 = vpop.eup %3551  ;;  %v2910_v40 = vadd.f32 1.0, %v5916_v18  ;;  %v2828_v26 = vsel %vm5912_vm8, %v2825_v57, %v2822_v3  ;;  %v2869_v57 = vadd.f32 1.0, %v2868_v58  ;;  %v2871_v3 = vand.u32 2147483647, %v5885_v14 }
 0x640   :  { %v5928_v60 = vpop.eup %3553  ;;  %v2847_v46 = vadd.f32 1.0, %v5923_v17  ;;  %v5974_v38 = vadd.f32 %v2828_v26, %v2708_v6  ;;  %v2887_v53 = vadd.f32 1.0, %v2886_v22  ;;  %v2834_v6 = vmul.f32 %v5868_v54, %v2833_v9 }
 0x641   :  { %v5934_v49 = vpop.eup %3555  ;;  %3575 = vlog2.f32 %v2910_v40  ;;  %v2880_v40 = vand.u32 2147483647, %v5880_v34  ;;  %v2913_v34 = vmul.f32 -0.5, %v5916_v18  ;;  %v2793_v58 = vadd.f32 1.0, %v5928_v60 }
 0x642   :  { %v5941_v2 = vpop.eup %3557  ;;  %3577 = vlog2.f32 %v2883_v4  ;;  %vm5990_vm11 = vcmp.lt.f32.partialorder %v2871_v3, 0.0004427343  ;;  %v2870_v22 = vmul.f32 %v5885_v14, %v2869_v57  ;;  %v2850_v54 = vmul.f32 -0.5, %v5923_v17 }
 0x643   :  { %v3560_v24 = vpop.eup %3559  ;;  %v2901_v42 = vadd.f32 1.0, %v5941_v2  ;;  %vm5979_vm10 = vcmp.lt.f32.partialorder %v2880_v40, 0.0004427343  ;;  %v2916_v40 = vand.u32 2147483647, %v5916_v18  ;;  %v2914_v3 = vadd.f32 1.0, %v2913_v34 }
 0x644   :  { %v3562_v61 = vpop.eup %3561  ;;  %v5966_v29 = vmul.f32 0.6931472, %v3560_v24  ;;  %v2896_v24 = vadd.f32 1.0, %v2895_v37  ;;  %v2907_v10 = vand.u32 2147483647, %v5941_v2  ;;  %v6012_v57 = vmul.f32 %v5906_v19, %v2887_v53 }
 0x645   :  { %v5953_v28 = vpop.eup %3563  ;;  %3579 = vlog2.f32 %v2901_v42  ;;  %v5976_v13 = vmul.f32 0.6931472, %v3562_v61  ;;  %v2811_v61 = vadd.f32 1.0, %v5934_v49  ;;  %vm6016_vm15 = vcmp.lt.f32.partialorder %v2916_v40, 0.0004427343 }
 0x646   :  { %v3566_v32 = vpop.eup %3565  ;;  %v2919_v4 = vadd.f32 1.0, %v5953_v28  ;;  %3581 = vlog2.f32 %v2847_v46  ;;  %v2922_v21 = vmul.f32 -0.5, %v5953_v28  ;;  %v2897_v14 = vmul.f32 %v5892_v59, %v2896_v24 }
 0x647   :  { %v3568_v42 = vpop.eup %3567  ;;  %v2831_v48 = vmul.f32 0.6931472, %v3566_v32  ;;  %vm6020_vm0 = vcmp.lt.f32.partialorder %v2889_v51, 0.0004427343  ;;  %v2851_v19 = vadd.f32 1.0, %v2850_v54  ;;  %v2915_v45 = vmul.f32 %v5916_v18, %v2914_v3 }
 0x648   :  { %3583 = vlog2.f32 %v2919_v4  ;;  %v3570_v26 = vpop.eup %3569  ;;  %v2858_v5 = vmul.f32 0.6931472, %v3568_v42  ;;  %v2904_v4 = vmul.f32 -0.5, %v5941_v2  ;;  %v6592_v51 = vand.u32 2147483647, %v5865_v0 }
 0x649   :  { %3585 = vlog2.f32 %v2793_v58  ;;  %v3572_v32 = vpop.eup %3571  ;;  %v2837_v58 = vsel %vm5995_vm12, %v2834_v6, %v2831_v48  ;;  %v6007_v8 = vmul.f32 0.6931472, %v3570_v26  ;;  %v2796_v26 = vmul.f32 -0.5, %v5928_v60 }
 0x64a   :  { %3587 = vlog2.f32 %v2811_v61  ;;  %v3574_v9 = vpop.eup %3573  ;;  %v2864_v27 = vsel %vm5960_vm9, %v2861_v11, %v2858_v5  ;;  %v2905_v34 = vadd.f32 1.0, %v2904_v4  ;;  %v2867_v59 = vmul.f32 0.6931472, %v3572_v32 }
 0x64b   :  { %v2894_v6 = vmul.f32 0.6931472, %v3574_v9  ;;  %v2933_v24 = vadd.f32 %v2837_v58, %v2709_v20  ;;  %v2923_v5 = vadd.f32 1.0, %v2922_v21  ;;  %v2853_v11 = vand.u32 2147483647, %v5923_v17 }
 0x64c   :  { %vm6031_vm1 = vcmp.lt.f32.partialorder %v6592_v51, 0.0004427343  ;;  %v6595_v32 = vmax.f32 %v5811_v7, 0.0  ;;  %v2882_v20 = vsel %vm5979_vm10, %v5969_v36, %v6007_v8  ;;  %vm6041_vm3 = vcmp.lt.f32.partialorder %v2907_v10, 0.0004427343 }
 0x64d   :  { %v2814_v18 = vmul.f32 -0.5, %v5934_v49  ;;  %v2906_v3 = vmul.f32 %v5941_v2, %v2905_v34  ;;  %v2925_v58 = vand.u32 2147483647, %v5953_v28  ;;  %v2900_v7 = vsel %vm6000_vm14, %v2897_v14, %v2894_v6 }
 0x64e   :  { %v3576_v48 = vpop.eup %3575  ;;  %v2936_v47 = vadd.f32 %v2864_v27, %v6595_v32  ;;  %v2873_v46 = vsel %vm5990_vm11, %v2870_v22, %v2867_v59  ;;  %v2852_v36 = vmul.f32 %v5923_v17, %v2851_v19  ;;  %v2799_v2 = vand.u32 2147483647, %v5928_v60 }
 0x64f   :  { %v3578_v53 = vpop.eup %3577  ;;  %v2912_v0 = vmul.f32 0.6931472, %v3576_v48  ;;  %v2924_v48 = vmul.f32 %v5953_v28, %v2923_v5  ;;  %v6598_v34 = vmax.f32 %v5856_v12, 0.0  ;;  %v2815_v6 = vadd.f32 1.0, %v2814_v18 }
 0x650   :  { %v2885_v8 = vmul.f32 0.6931472, %v3578_v53  ;;  %v6599_v37 = vmax.f32 %v5833_v55, 0.0  ;;  %vm2926_vm5 = vcmp.lt.f32.partialorder %v2925_v58, 0.0004427343  ;;  %v6600_v53 = vmax.f32 %v5819_v63, 0.0 }
 0x651   :  { %v2918_v17 = vsel %vm6016_vm15, %v2915_v45, %v2912_v0  ;;  %v2817_v59 = vand.u32 2147483647, %v5934_v49  ;;  %vm6069_vm2 = vcmp.lt.f32.partialorder %v2853_v11, 0.0004427343  ;;  %v6603_v61 = vmax.f32 %v5863_v39, 0.0 }
 0x652   :  { %v3580_v40 = vpop.eup %3579  ;;  %v2940_v22 = vadd.f32 %v2900_v7, %v6599_v37  ;;  %v2937_v5 = vadd.f32 %v2873_v46, %v6600_v53  ;;  %v2891_v12 = vsel %vm6020_vm0, %v6012_v57, %v2885_v8  ;;  %vm6076_vm6 = vcmp.lt.f32.partialorder %v2799_v2, 0.0004427343 }
 0x653   :  { %v3582_v54 = vpop.eup %3581  ;;  %v2903_v9 = vmul.f32 0.6931472, %v3580_v40  ;;  %v2797_v40 = vadd.f32 1.0, %v2796_v26  ;;  %v6606_v63 = vmax.f32 %v5846_v50, 0.0  ;;  %v2846_v39 = vsel %vm6031_vm1, %v5937_v41, %v5976_v13 }
 0x654   :  { %v2849_v14 = vmul.f32 0.6931472, %v3582_v54  ;;  %v2816_v54 = vmul.f32 %v5934_v49, %v2815_v6  ;;  %vm6093_vm7 = vcmp.lt.f32.partialorder %v2817_v59, 0.0004427343  ;;  %v6613_v41 = vmax.f32 %v5814_v56, 0.0 }
 0x655   :  { %v3584_v10 = vpop.eup %3583  ;;  %v2909_v27 = vsel %vm6041_vm3, %v2906_v3, %v2903_v9  ;;  %v2798_v21 = vmul.f32 %v5928_v60, %v2797_v40  ;;  %v2942_v16 = vadd.f32 %v2918_v17, %v6606_v63  ;;  %v6607_v60 = vmax.f32 %v5823_v31, 0.0 }
 0x656   :  { %v2941_v51 = vadd.f32 %v2909_v27, %v6598_v34  ;;  %v2921_v42 = vmul.f32 0.6931472, %v3584_v10  ;;  %v3586_v19 = vpop.eup %3585  ;;  %v2855_v57 = vsel %vm6069_vm2, %v2852_v36, %v2849_v14  ;;  %v6610_v3 = vand.u32 2147483647, %v5859_v43 }
 0x657   :  { %v3588_v55 = vpop.eup %3587  ;;  %v2795_v32 = vmul.f32 0.6931472, %v3586_v19  ;;  %v2939_v0 = vadd.f32 %v2891_v12, %v6607_v60  ;;  %v2938_v13 = vadd.f32 %v2882_v20, %v6613_v41  ;;  %v6614_v31 = vmax.f32 %v5826_v15, 0.0 }
 0x658   :  { %2978 = vmatprep.subr.mxu0 %v2941_v51  ;;  %v2927_v28 = vsel %vm2926_vm5, %v2924_v48, %v2921_v42  ;;  %v2813_v11 = vmul.f32 0.6931472, %v3588_v55  ;;  %vm6099_vm8 = vcmp.lt.f32.partialorder %v6610_v3, 0.0004427343  ;;  %v6615_v58 = vmax.f32 %v5791_v52, 0.0 }
 0x659   :  { %v2943_v45 = vadd.f32 %v2927_v28, %v6603_v61  ;;  %2979 = vmatpush1.msra.mxu0 %v2940_v22  ;;  %v2801_v50 = vsel %vm6076_vm6, %v2798_v21, %v2795_v32  ;;  %v6616_v43 = vsel %vm5899_vm4, %v5909_v35, %v5930_v30  ;;  %v2810_v56 = vsel %vm6099_vm8, %v5919_v1, %v5966_v29  ;;  %v2944_v52 = vld [vmem:[%s6144_s9] sm:$0x7]  ;;  %v2949_v1 = vpop.permute.xlu0 %2948  ;;  %s3613_s9 = smov [#allocation2]  }
 0x65a   :  { %2980 = vmatprep.subr.mxu0 %v2937_v5  ;;  %v2929_v4 = vadd.f32 %v2801_v50, %v6614_v31  ;;  %v2928_v7 = vadd.f32 %v6616_v43, %v6615_v58  ;;  %v6617_v15 = vmax.f32 %v5830_v62, 0.0  ;;  %v6618_v35 = vmax.f32 %v5806_v44, 0.0  ;;  %s3112_s18 = sshll.u32 %s3613_s9, 4  ;;  %s3113_s18 = int_to_ptr.vmem [resolvable:$true] %s3112_s18 }
 0x65b   :  { %3049 = vmatprep.subr.mxu1 %v2943_v45  ;;  %2981 = vmatpush1.msra.mxu0 %v2936_v47  ;;  %v2819_v47 = vsel %vm6093_vm7, %v2816_v54, %v2813_v11  ;;  %s3589_s19 = scalar_lea.vmem %s3113_s18, 256  ;;  %p3594_p1 = scmp.lt.s32.totalorder %s3113_s18, %s3113_s18 }
 0x65c   :  { %3050 = vmatpush1.msra.mxu1 %v2942_v16  ;;  %2982 = vmatprep.subr.mxu0 %v2933_v24  ;;  %v2707_v24 = vmax.f32 %v5837_v33, 0.0  ;;  %v2935_v20 = vadd.f32 %v2855_v57, %v6617_v15  ;;  %v2934_v30 = vadd.f32 %v2846_v39, %v6618_v35  ;;  %v2930_v33 = vadd.f32 %v2810_v56, %v2706_v23  ;;  %p3590_p0 = scmp.ne.s32.totalorder %s3113_s18, %s3589_s19  ;;  %p3595_p2 = scmp.lt.s32.totalorder %s3589_s19, %s3589_s19 }
 0x65d   :  { %3051 = vmatprep.subr.mxu1 %v2939_v0  ;;  %2983 = vmatpush1.msra.mxu0 %v5974_v38 }
 0x65e   :  { %3052 = vmatpush1.msra.mxu1 %v2938_v13  ;;  %2984 = vmatprep.subr.mxu0 %v2929_v4  ;;  %v2931_v29 = vadd.f32 %v2819_v47, %v2707_v24  ;;  %p3596_p3 = por %p3595_p2, %p3594_p1 }
 0x65f   :  { %3053 = vmatprep.subr.mxu1 %v2935_v20  ;;  %2985 = vmatpush1.msra.mxu0 %v2928_v7 }
 0x660   :  { %3054 = vmatpush1.msra.mxu1 %v2934_v30  ;;  %3196 = vmatmul.mubr.msk.f32.vlgmr.msra.gmra.mxu0 %vm629_vm13, %v2944_v52  ;;  %p3597_p4 = pnand %p3596_p3, %p3590_p0 }
 0x661   :  { %3055 = vmatprep.subr.mxu1 %v2931_v29 }
 0x662   :  { %3056 = vmatpush1.msra.mxu1 %v2930_v33 }
 0x663   :  { %3197 = vmatmul.mubr.msk.f32.vlgmr.msra.gmra.mxu1 %vm629_vm13, %v2944_v52 }
 0x720   :  { %v3020_v62 = vpop.f32.mrf.mxu0 }
 0x721   :  { %v3021_v25 = vadd.f32 %v3020_v62, %v2949_v1 }
 0x722   :  { %v3022_v38 = vpop.f32.mrf.mxu0 }
 0x723   :  { %v3091_v46 = vpop.f32.mrf.mxu1  ;;  %v3023_v44 = vadd.f32 %v3022_v38, %v2949_v1 }
 0x724   :  { %v3092_v10 = vadd.f32 %v3091_v46, %v2949_v1 }
 0x725   :  { %v3100_v8 = vcombine.low %v3021_v25, %v3023_v44  ;;  %v3093_v36 = vpop.f32.mrf.mxu1 }
 0x726   :  { %v3094_v27 = vadd.f32 %v3093_v36, %v2949_v1 }
 0x727   :  { %3104 = vst [vmem:[#allocation2] sm:$0x77] %v3100_v8 }
 0x728   :  { %v3101_v48 = vcombine.low %v3092_v10, %v3094_v27 }
 0x72a   :  { %3105 = vst [vmem:[#allocation2 + $0x8] sm:$0x77] %v3101_v48 }
 0x72b   :  { %3600 = shalt.err (!%p3597_p4)
}
 0x72c   :  { %3115 = dma.vmem_to_hbm [thread:$0]  %s3113_s18, 256, %s6146_s11, [#allocation3]  }
 0x72d   :  { %3609 = dma.done.wait [#allocation3], 256  }
 0x72e   :  { %3610 = vsyncadd [#allocation3], 4294967040 }
 0x72f   :  { %3119 = vsyncpa [#allocation3], 1 }

</bundles_post_ra>
